<compile_context>
chip_gen: v7x
topology: tpu7x:2x2x1
jax: 0.10.0
libtpu: 0.0.40
codegen_flags: <defaults>
</compile_context>

<pallas_src>
import math
import jax
import jax.numpy as jnp
from jax.experimental import pallas as pl
from jax.experimental.pallas import tpu as pltpu

# ---------------- small-shape configuration (scaled-down MyModel) -----------
B = 2        # batch
N = 8        # number of tokens (269 in the original)
D = 32       # d_model / embed dim (256 in the original)
H = 4        # attention heads
DK = 32      # d_k per head (256 in the original)
DV = 32      # d_v per head for attn1/attn2 (256 in the original)
DV3 = 16     # d_v per head for attn3 (128 in the original)
OUT = 16     # head output dim (128 in the original)
LN_EPS = 1e-5
WDT = jnp.bfloat16   # weight / MXU-operand dtype


# ----------------------- in-kernel building blocks ---------------------------
def _layer_norm(y, gamma, beta):
    mean = jnp.mean(y, axis=-1, keepdims=True)
    var = jnp.mean(jnp.square(y - mean), axis=-1, keepdims=True)
    return (y - mean) * jax.lax.rsqrt(var + LN_EPS) * gamma + beta


def _fusion(x2d, skip2d, w_ref, b_ref, g_ref, be_ref):
    """FusionBlock: SiLU(LayerNorm(cat(x, skip) @ W + b)) on (B*N, D) rows."""
    d = x2d.shape[-1]
    w = w_ref[...]                                   # (2D, D) bf16, W^T split below
    y = (jnp.dot(x2d.astype(WDT), w[:d, :], preferred_element_type=jnp.float32)
         + jnp.dot(skip2d.astype(WDT), w[d:, :], preferred_element_type=jnp.float32)
         + b_ref[...])
    y = _layer_norm(y, g_ref[...], be_ref[...])      # f32 element-wise math
    return y * jax.nn.sigmoid(y)                     # SiLU (dropout = identity)


def _attention(x2d, wqkv_ref, bqkv_ref, wo_ref, bo_ref, g_ref, be_ref,
               *, bsz, n_tok, h, d_k, d_v):
    """ResidualAttentionBlock: LayerNorm(x + MHA(x, x, x)) on (B*N, D) rows."""
    scale = 1.0 / math.sqrt(d_k)
    # fused QKV projection — one MXU pass over the concatenated bf16 weight
    qkv = (jnp.dot(x2d.astype(WDT), wqkv_ref[...],
                   preferred_element_type=jnp.float32)
           + bqkv_ref[...])                          # (B*N, 2*h*d_k + h*d_v) f32
    q = qkv[:, :h * d_k].reshape(bsz, n_tok, h * d_k)
    k = qkv[:, h * d_k:2 * h * d_k].reshape(bsz, n_tok, h * d_k)
    v = qkv[:, 2 * h * d_k:].reshape(bsz, n_tok, h * d_v).astype(WDT)

    heads = []
    for i in range(h):                               # static unroll over heads
        qi = q[..., i * d_k:(i + 1) * d_k].astype(WDT)   # (B, N, d_k)
        ki = k[..., i * d_k:(i + 1) * d_k].astype(WDT)
        vi = v[..., i * d_v:(i + 1) * d_v]               # (B, N, d_v) bf16
        s = jnp.einsum("bqd,bkd->bqk", qi, ki,
                       preferred_element_type=jnp.float32) * scale
        s = s - jnp.max(s, axis=-1, keepdims=True)       # softmax in f32
        p = jnp.exp(s)
        # approx reciprocal runs on the EUP slot; ~1e-3 rel. error, inference-only.
        p = p * pl.reciprocal(jnp.sum(p, axis=-1, keepdims=True), approx=True)
        heads.append(jnp.einsum("bqk,bkv->bqv", p.astype(WDT), vi,
                                preferred_element_type=jnp.float32))
    # merged output projection: one (B*N, h*d_v) @ (h*d_v, D) matmul
    o = jnp.concatenate(heads, axis=-1).reshape(bsz * n_tok, h * d_v)
    o2d = jnp.dot(o.astype(WDT), wo_ref[...], preferred_element_type=jnp.float32)
    y = x2d + o2d + bo_ref[...]                      # residual (drop_path = 0)
    return _layer_norm(y, g_ref[...], be_ref[...])


# ----------------------------- fused kernel ----------------------------------
def _fused_forward_kernel(*refs):
    (x_ref, e1_ref, l1_ref, e2_ref, l2_ref, pe_ref) = refs[:6]
    o_ref, hw_vmem, hw_sem = refs[-3], refs[-2], refs[-1]
    it = iter(refs[6:-3])
    take = lambda n: tuple(next(it) for _ in range(n))
    f0, a1 = take(4), take(6)
    f1, a2 = take(4), take(6)
    f2, a3 = take(4), take(6)
    f3 = take(4)
    hw_hbm, hb_ref = take(2)

    # Prefetch the (largest) head weight HBM->VMEM now; it overlaps with the
    # 4 fusion + 3 attention blocks below and is waited on just before use.
    hw_copy = pltpu.make_async_copy(hw_hbm, hw_vmem, hw_sem)
    hw_copy.start()

    bsz, n_tok, d = x_ref.shape
    flat = (bsz * n_tok, d)                          # fold batch into sublanes
    x = x_ref[...].reshape(flat)                     # activations stay f32
    e1 = e1_ref[...].reshape(flat)
    l1 = l1_ref[...].reshape(flat)
    e2 = e2_ref[...].reshape(flat)
    l2 = l2_ref[...].reshape(flat)

    x = _fusion(x, e1, *f0)                                              # fusion0
    x = (x.reshape(bsz, n_tok, d) + pe_ref[...]).reshape(flat)           # posEmbed
    x = _attention(x, *a1, bsz=bsz, n_tok=n_tok, h=H, d_k=DK, d_v=DV)    # attn1
    x = _fusion(x, l1, *f1)                                              # fusion1
    x = _attention(x, *a2, bsz=bsz, n_tok=n_tok, h=H, d_k=DK, d_v=DV)    # attn2
    x = _fusion(x, e2, *f2)                                              # fusion2
    x = _attention(x, *a3, bsz=bsz, n_tok=n_tok, h=H, d_k=DK, d_v=DV3)   # attn3
    x = _fusion(x, l2, *f3)                                              # fusion3

    # head: flatten(x, 1) @ Wh + bh, decomposed per token as
    #   out = sum_t x[:, t, :] @ Wh3[t]      (Wh3 = Wh reshaped to (N, D, OUT))
    # -> N matmuls with M=B (no sublane->lane reshape, no 1-row concat).
    hw_copy.wait()                                   # head weight now in VMEM
    x3 = x.reshape(bsz, n_tok, d)
    out_dim = o_ref.shape[-1]
    acc = jnp.zeros((bsz, out_dim), jnp.float32)
    for t in range(n_tok):                           # static unroll (N small)
        acc = acc + jnp.dot(x3[:, t, :].astype(WDT), hw_vmem[t],
                            preferred_element_type=jnp.float32)
    # TODO(synk): at real OUT=128 the output is lane-dense; at OUT=16 the final
    # store is a masked partial vst (negligible at this size).
    o_ref[...] = (acc + hb_ref[...]).astype(o_ref.dtype)


# ------------------------- non-kernel glue ----------------------------------
def positional_encoding_1d(n, d, dtype=jnp.float32):
    """positional_encodings.PositionalEncoding1D (interleaved sin/cos), (N, D)."""
    channels = int(math.ceil(d / 2) * 2)
    inv_freq = 1.0 / (10000 ** (jnp.arange(0, channels, 2, dtype=jnp.float32) / channels))
    pos = jnp.arange(n, dtype=jnp.float32)
    sin_inp = jnp.einsum("i,j->ij", pos, inv_freq)
    emb = jnp.stack([jnp.sin(sin_inp), jnp.cos(sin_inp)], axis=-1).reshape(n, channels)
    return emb[:, :d].astype(dtype)


def xavier_normal(key, fan_in, fan_out, dtype=jnp.float32):
    std = math.sqrt(2.0 / (fan_in + fan_out))
    w = std * jax.random.normal(key, (fan_in, fan_out), dtype=jnp.float32)
    return w.astype(dtype)


def init_fusion_params(key, d):
    w = xavier_normal(key, 2 * d, d, WDT)             # stored as W^T: (2D, D) bf16
    b = jnp.zeros((1, d), jnp.float32)
    g = jnp.ones((1, d), jnp.float32)
    be = jnp.zeros((1, d), jnp.float32)
    return (w, b, g, be)


def init_attn_params(key, d, h, d_k, d_v):
    ks = jax.random.split(key, 4)
    wq = xavier_normal(ks[0], d, h * d_k)
    wk = xavier_normal(ks[1], d, h * d_k)
    wv = xavier_normal(ks[2], d, h * d_v)
    wo = xavier_normal(ks[3], h * d_v, d, WDT)
    wqkv = jnp.concatenate([wq, wk, wv], axis=1).astype(WDT)   # fused QKV weight
    bqkv = jnp.zeros((1, 2 * h * d_k + h * d_v), jnp.float32)
    return (wqkv, bqkv, wo, jnp.zeros((1, d), jnp.float32),
            jnp.ones((1, d), jnp.float32), jnp.zeros((1, d), jnp.float32))


def init_params(key):
    ks = jax.random.split(key, 8)
    hw = xavier_normal(ks[7], N * D, OUT, WDT).reshape(N, D, OUT)  # (N, D, OUT) bf16
    hb = jnp.zeros((1, OUT), jnp.float32)
    return {
        "fusion0": init_fusion_params(ks[0], D),
        "fusion1": init_fusion_params(ks[1], D),
        "fusion2": init_fusion_params(ks[2], D),
        "fusion3": init_fusion_params(ks[3], D),
        "attn1": init_attn_params(ks[4], D, H, DK, DV),
        "attn2": init_attn_params(ks[5], D, H, DK, DV),
        "attn3": init_attn_params(ks[6], D, H, DK, DV3),
        "head": (hw, hb),
    }


@jax.jit
def my_model_forward(params, x_tokens, early1, late1, early2, late2):
    # TODO(synk): stem / localbranch1 / localbranch2 / patchEmbed not defined in
    # the reference source — their token outputs are provided as inputs here.
    Bn, Nn, Dn = x_tokens.shape
    pe = positional_encoding_1d(Nn, Dn, jnp.float32)          # (N, D), no batch tile
    flat_params = (params["fusion0"] + params["attn1"] + params["fusion1"]
                   + params["attn2"] + params["fusion2"] + params["attn3"]
                   + params["fusion3"] + params["head"])
    inputs = (x_tokens, early1, late1, early2, late2, pe) + flat_params

    hw, hb = params["head"]
    in_specs = [pl.BlockSpec(memory_space=pltpu.MemorySpace.VMEM)] * len(inputs)
    in_specs[-2] = pl.BlockSpec(memory_space=pl.ANY)   # head weight stays in HBM;
                                                       # DMA'd manually in-kernel
    out_dim = hb.shape[-1]
    return pl.pallas_call(
        _fused_forward_kernel,
        out_shape=jax.ShapeDtypeStruct((Bn, out_dim), x_tokens.dtype),
        in_specs=in_specs,
        out_specs=pl.BlockSpec(memory_space=pltpu.MemorySpace.VMEM),
        scratch_shapes=[
            pltpu.VMEM(hw.shape, hw.dtype),            # prefetch target for head W
            pltpu.SemaphoreType.DMA(()),               # its DMA semaphore
        ],
        compiler_params=pltpu.CompilerParams(
            vmem_limit_bytes=64 * 1024 * 1024,         # fits v5e/v6e/v7x physical VMEM
        ),
    )(*inputs)


if __name__ == "__main__":
    key = jax.random.PRNGKey(0)
    kp, kx, k1, k2, k3, k4 = jax.random.split(key, 6)
    params = init_params(kp)

    x_tokens = jax.random.normal(kx, (B, N, D), jnp.float32)   # patchEmbed output
    early1 = jax.random.normal(k1, (B, N, D), jnp.float32)     # localbranch1 early
    late1 = jax.random.normal(k2, (B, N, D), jnp.float32)      # localbranch1 late
    early2 = jax.random.normal(k3, (B, N, D), jnp.float32)     # localbranch2 early
    late2 = jax.random.normal(k4, (B, N, D), jnp.float32)      # localbranch2 late

    out = my_model_forward(params, x_tokens, early1, late1, early2, late2)
    out = jax.block_until_ready(out)
    assert out.shape == (B, OUT) and bool(jnp.all(jnp.isfinite(out)))
    print("KERNEL_OK")
</pallas_src>

<mosaic_0001>
module attributes {stable_mosaic.version = 11 : i64} {
  func.func @_fused_forward_kernel(%arg0: memref<2x8x32xf32, #tpu.memory_space<vmem>>, %arg1: memref<2x8x32xf32, #tpu.memory_space<vmem>>, %arg2: memref<2x8x32xf32, #tpu.memory_space<vmem>>, %arg3: memref<2x8x32xf32, #tpu.memory_space<vmem>>, %arg4: memref<2x8x32xf32, #tpu.memory_space<vmem>>, %arg5: memref<8x32xf32, #tpu.memory_space<vmem>>, %arg6: memref<64x32xbf16, #tpu.memory_space<vmem>>, %arg7: memref<1x32xf32, #tpu.memory_space<vmem>>, %arg8: memref<1x32xf32, #tpu.memory_space<vmem>>, %arg9: memref<1x32xf32, #tpu.memory_space<vmem>>, %arg10: memref<32x384xbf16, #tpu.memory_space<vmem>>, %arg11: memref<1x384xf32, #tpu.memory_space<vmem>>, %arg12: memref<128x32xbf16, #tpu.memory_space<vmem>>, %arg13: memref<1x32xf32, #tpu.memory_space<vmem>>, %arg14: memref<1x32xf32, #tpu.memory_space<vmem>>, %arg15: memref<1x32xf32, #tpu.memory_space<vmem>>, %arg16: memref<64x32xbf16, #tpu.memory_space<vmem>>, %arg17: memref<1x32xf32, #tpu.memory_space<vmem>>, %arg18: memref<1x32xf32, #tpu.memory_space<vmem>>, %arg19: memref<1x32xf32, #tpu.memory_space<vmem>>, %arg20: memref<32x384xbf16, #tpu.memory_space<vmem>>, %arg21: memref<1x384xf32, #tpu.memory_space<vmem>>, %arg22: memref<128x32xbf16, #tpu.memory_space<vmem>>, %arg23: memref<1x32xf32, #tpu.memory_space<vmem>>, %arg24: memref<1x32xf32, #tpu.memory_space<vmem>>, %arg25: memref<1x32xf32, #tpu.memory_space<vmem>>, %arg26: memref<64x32xbf16, #tpu.memory_space<vmem>>, %arg27: memref<1x32xf32, #tpu.memory_space<vmem>>, %arg28: memref<1x32xf32, #tpu.memory_space<vmem>>, %arg29: memref<1x32xf32, #tpu.memory_space<vmem>>, %arg30: memref<32x320xbf16, #tpu.memory_space<vmem>>, %arg31: memref<1x320xf32, #tpu.memory_space<vmem>>, %arg32: memref<64x32xbf16, #tpu.memory_space<vmem>>, %arg33: memref<1x32xf32, #tpu.memory_space<vmem>>, %arg34: memref<1x32xf32, #tpu.memory_space<vmem>>, %arg35: memref<1x32xf32, #tpu.memory_space<vmem>>, %arg36: memref<64x32xbf16, #tpu.memory_space<vmem>>, %arg37: memref<1x32xf32, #tpu.memory_space<vmem>>, %arg38: memref<1x32xf32, #tpu.memory_space<vmem>>, %arg39: memref<1x32xf32, #tpu.memory_space<vmem>>, %arg40: memref<8x32x16xbf16, #tpu.memory_space<any>>, %arg41: memref<1x16xf32, #tpu.memory_space<vmem>>, %arg42: memref<2x16xf32, #tpu.memory_space<vmem>>, %arg43: memref<8x32x16xbf16, #tpu.memory_space<vmem>>, %arg44: memref<!tpu.dma_semaphore, #tpu.memory_space<semaphore_mem>>) attributes {dimension_semantics = [], scalar_prefetch = 0 : i64, scratch_operands = 2 : i64, tpu.core_type = #tpu.core_type<tc>} {
    tpu.enqueue_dma source(%arg40 : memref<8x32x16xbf16, #tpu.memory_space<any>>) target(%arg43 : memref<8x32x16xbf16, #tpu.memory_space<vmem>>) target_semaphore(%arg44 : memref<!tpu.dma_semaphore, #tpu.memory_space<semaphore_mem>>)
    %c0 = arith.constant 0 : index
    %c0_0 = arith.constant 0 : index
    %c0_1 = arith.constant 0 : index
    %0 = vector.load %arg0[%c0, %c0_0, %c0_1] : memref<2x8x32xf32, #tpu.memory_space<vmem>>, vector<2x8x32xf32>
    %1 = vector.shape_cast %0 : vector<2x8x32xf32> to vector<16x32xf32>
    %c0_2 = arith.constant 0 : index
    %c0_3 = arith.constant 0 : index
    %c0_4 = arith.constant 0 : index
    %2 = vector.load %arg1[%c0_2, %c0_3, %c0_4] : memref<2x8x32xf32, #tpu.memory_space<vmem>>, vector<2x8x32xf32>
    %3 = vector.shape_cast %2 : vector<2x8x32xf32> to vector<16x32xf32>
    %c0_5 = arith.constant 0 : index
    %c0_6 = arith.constant 0 : index
    %c0_7 = arith.constant 0 : index
    %4 = vector.load %arg2[%c0_5, %c0_6, %c0_7] : memref<2x8x32xf32, #tpu.memory_space<vmem>>, vector<2x8x32xf32>
    %5 = vector.shape_cast %4 : vector<2x8x32xf32> to vector<16x32xf32>
    %c0_8 = arith.constant 0 : index
    %c0_9 = arith.constant 0 : index
    %c0_10 = arith.constant 0 : index
    %6 = vector.load %arg3[%c0_8, %c0_9, %c0_10] : memref<2x8x32xf32, #tpu.memory_space<vmem>>, vector<2x8x32xf32>
    %7 = vector.shape_cast %6 : vector<2x8x32xf32> to vector<16x32xf32>
    %c0_11 = arith.constant 0 : index
    %c0_12 = arith.constant 0 : index
    %c0_13 = arith.constant 0 : index
    %8 = vector.load %arg4[%c0_11, %c0_12, %c0_13] : memref<2x8x32xf32, #tpu.memory_space<vmem>>, vector<2x8x32xf32>
    %9 = vector.shape_cast %8 : vector<2x8x32xf32> to vector<16x32xf32>
    %c0_14 = arith.constant 0 : index
    %c0_15 = arith.constant 0 : index
    %10 = vector.load %arg6[%c0_14, %c0_15] : memref<64x32xbf16, #tpu.memory_space<vmem>>, vector<64x32xbf16>
    %11 = arith.truncf %1 : vector<16x32xf32> to vector<16x32xbf16>
    %12 = vector.extract_strided_slice %10 {offsets = [0, 0], sizes = [32, 32], strides = [1, 1]} : vector<64x32xbf16> to vector<32x32xbf16>
    %cst = arith.constant dense<0.000000e+00> : vector<16x32xf32>
    %13 = tpu.matmul %11, %12, %cst {dimension_numbers = #tpu.dot_dimension_numbers<[1], [0], [0], [1], [0, 0, 1, 1], [], []>} : vector<16x32xbf16>, vector<32x32xbf16>, vector<16x32xf32> -> vector<16x32xf32>
    %14 = arith.truncf %3 : vector<16x32xf32> to vector<16x32xbf16>
    %15 = vector.extract_strided_slice %10 {offsets = [32, 0], sizes = [32, 32], strides = [1, 1]} : vector<64x32xbf16> to vector<32x32xbf16>
    %cst_16 = arith.constant dense<0.000000e+00> : vector<16x32xf32>
    %16 = tpu.matmul %14, %15, %cst_16 {dimension_numbers = #tpu.dot_dimension_numbers<[1], [0], [0], [1], [0, 0, 1, 1], [], []>} : vector<16x32xbf16>, vector<32x32xbf16>, vector<16x32xf32> -> vector<16x32xf32>
    %17 = arith.addf %13, %16 : vector<16x32xf32>
    %c0_17 = arith.constant 0 : index
    %c0_18 = arith.constant 0 : index
    %18 = vector.load %arg7[%c0_17, %c0_18] : memref<1x32xf32, #tpu.memory_space<vmem>>, vector<1x32xf32>
    %19 = vector.broadcast %18 : vector<1x32xf32> to vector<16x32xf32>
    %20 = arith.addf %17, %19 : vector<16x32xf32>
    %c0_19 = arith.constant 0 : index
    %c0_20 = arith.constant 0 : index
    %21 = vector.load %arg8[%c0_19, %c0_20] : memref<1x32xf32, #tpu.memory_space<vmem>>, vector<1x32xf32>
    %c0_21 = arith.constant 0 : index
    %c0_22 = arith.constant 0 : index
    %22 = vector.load %arg9[%c0_21, %c0_22] : memref<1x32xf32, #tpu.memory_space<vmem>>, vector<1x32xf32>
    %cst_23 = arith.constant dense<0.000000e+00> : vector<16xf32>
    %23 = vector.multi_reduction <add>, %20, %cst_23 [1] : vector<16x32xf32> to vector<16xf32>
    %24 = vector.shape_cast %23 : vector<16xf32> to vector<16x1xf32>
    %cst_24 = arith.constant 3.200000e+01 : f32
    %25 = vector.broadcast %cst_24 : f32 to vector<16x1xf32>
    %26 = arith.divf %24, %25 : vector<16x1xf32>
    %27 = vector.broadcast %26 : vector<16x1xf32> to vector<16x32xf32>
    %28 = arith.subf %20, %27 : vector<16x32xf32>
    %29 = arith.mulf %28, %28 : vector<16x32xf32>
    %cst_25 = arith.constant dense<0.000000e+00> : vector<16xf32>
    %30 = vector.multi_reduction <add>, %29, %cst_25 [1] : vector<16x32xf32> to vector<16xf32>
    %31 = vector.shape_cast %30 : vector<16xf32> to vector<16x1xf32>
    %cst_26 = arith.constant 3.200000e+01 : f32
    %32 = vector.broadcast %cst_26 : f32 to vector<16x1xf32>
    %33 = arith.divf %31, %32 : vector<16x1xf32>
    %34 = vector.broadcast %26 : vector<16x1xf32> to vector<16x32xf32>
    %35 = arith.subf %20, %34 : vector<16x32xf32>
    %cst_27 = arith.constant 9.99999974E-6 : f32
    %36 = vector.broadcast %cst_27 : f32 to vector<16x1xf32>
    %37 = arith.addf %33, %36 : vector<16x1xf32>
    %38 = math.rsqrt %37 : vector<16x1xf32>
    %39 = vector.broadcast %38 : vector<16x1xf32> to vector<16x32xf32>
    %40 = arith.mulf %35, %39 : vector<16x32xf32>
    %41 = vector.broadcast %21 : vector<1x32xf32> to vector<16x32xf32>
    %42 = arith.mulf %40, %41 : vector<16x32xf32>
    %43 = vector.broadcast %22 : vector<1x32xf32> to vector<16x32xf32>
    %44 = arith.addf %42, %43 : vector<16x32xf32>
    %45 = arith.negf %44 : vector<16x32xf32>
    %46 = math.exp %45 : vector<16x32xf32>
    %cst_28 = arith.constant 1.000000e+00 : f32
    %47 = vector.broadcast %cst_28 : f32 to vector<16x32xf32>
    %48 = arith.addf %47, %46 : vector<16x32xf32>
    %49 = arith.divf %47, %48 : vector<16x32xf32>
    %50 = arith.mulf %44, %49 : vector<16x32xf32>
    %51 = vector.shape_cast %50 : vector<16x32xf32> to vector<2x8x32xf32>
    %c0_29 = arith.constant 0 : index
    %c0_30 = arith.constant 0 : index
    %52 = vector.load %arg5[%c0_29, %c0_30] : memref<8x32xf32, #tpu.memory_space<vmem>>, vector<8x32xf32>
    %53 = vector.shape_cast %52 : vector<8x32xf32> to vector<1x8x32xf32>
    %54 = vector.broadcast %53 : vector<1x8x32xf32> to vector<2x8x32xf32>
    %55 = arith.addf %51, %54 : vector<2x8x32xf32>
    %56 = vector.shape_cast %55 : vector<2x8x32xf32> to vector<16x32xf32>
    %57 = arith.truncf %56 : vector<16x32xf32> to vector<16x32xbf16>
    %c0_31 = arith.constant 0 : index
    %c0_32 = arith.constant 0 : index
    %58 = vector.load %arg10[%c0_31, %c0_32] : memref<32x384xbf16, #tpu.memory_space<vmem>>, vector<32x384xbf16>
    %cst_33 = arith.constant dense<0.000000e+00> : vector<16x384xf32>
    %59 = tpu.matmul %57, %58, %cst_33 {dimension_numbers = #tpu.dot_dimension_numbers<[1], [0], [0], [1], [0, 0, 1, 1], [], []>} : vector<16x32xbf16>, vector<32x384xbf16>, vector<16x384xf32> -> vector<16x384xf32>
    %c0_34 = arith.constant 0 : index
    %c0_35 = arith.constant 0 : index
    %60 = vector.load %arg11[%c0_34, %c0_35] : memref<1x384xf32, #tpu.memory_space<vmem>>, vector<1x384xf32>
    %61 = vector.broadcast %60 : vector<1x384xf32> to vector<16x384xf32>
    %62 = arith.addf %59, %61 : vector<16x384xf32>
    %63 = vector.extract_strided_slice %62 {offsets = [0, 0], sizes = [16, 128], strides = [1, 1]} : vector<16x384xf32> to vector<16x128xf32>
    %64 = vector.shape_cast %63 : vector<16x128xf32> to vector<2x8x128xf32>
    %65 = vector.extract_strided_slice %62 {offsets = [0, 128], sizes = [16, 128], strides = [1, 1]} : vector<16x384xf32> to vector<16x128xf32>
    %66 = vector.shape_cast %65 : vector<16x128xf32> to vector<2x8x128xf32>
    %67 = vector.extract_strided_slice %62 {offsets = [0, 256], sizes = [16, 128], strides = [1, 1]} : vector<16x384xf32> to vector<16x128xf32>
    %68 = vector.shape_cast %67 : vector<16x128xf32> to vector<2x8x128xf32>
    %69 = arith.truncf %68 : vector<2x8x128xf32> to vector<2x8x128xbf16>
    %70 = vector.extract_strided_slice %64 {offsets = [0, 0, 0], sizes = [2, 8, 32], strides = [1, 1, 1]} : vector<2x8x128xf32> to vector<2x8x32xf32>
    %71 = arith.truncf %70 : vector<2x8x32xf32> to vector<2x8x32xbf16>
    %72 = vector.extract_strided_slice %66 {offsets = [0, 0, 0], sizes = [2, 8, 32], strides = [1, 1, 1]} : vector<2x8x128xf32> to vector<2x8x32xf32>
    %73 = arith.truncf %72 : vector<2x8x32xf32> to vector<2x8x32xbf16>
    %74 = vector.extract_strided_slice %69 {offsets = [0, 0, 0], sizes = [2, 8, 32], strides = [1, 1, 1]} : vector<2x8x128xbf16> to vector<2x8x32xbf16>
    "tpu.trace_start"() <{level = 10 : i32, message = "bqd,bkd->bqk"}> : () -> ()
    %cst_36 = arith.constant dense<0.000000e+00> : vector<2x8x8xf32>
    %75 = tpu.matmul %71, %73, %cst_36 {dimension_numbers = #tpu.dot_dimension_numbers<[2], [2], [1], [1], [0, 0, 0, 1, 1, 1], [0], [0]>} : vector<2x8x32xbf16>, vector<2x8x32xbf16>, vector<2x8x8xf32> -> vector<2x8x8xf32>
    "tpu.trace_stop"() : () -> ()
    %cst_37 = arith.constant 0.176776692 : f32
    %76 = vector.broadcast %cst_37 : f32 to vector<2x8x8xf32>
    %77 = arith.mulf %75, %76 : vector<2x8x8xf32>
    %cst_38 = arith.constant dense<0xFF800000> : vector<2x8xf32>
    %78 = vector.multi_reduction <maximumf>, %77, %cst_38 [2] : vector<2x8x8xf32> to vector<2x8xf32>
    %79 = vector.shape_cast %78 : vector<2x8xf32> to vector<2x8x1xf32>
    %80 = vector.broadcast %79 : vector<2x8x1xf32> to vector<2x8x8xf32>
    %81 = arith.subf %77, %80 : vector<2x8x8xf32>
    %82 = math.exp %81 : vector<2x8x8xf32>
    %cst_39 = arith.constant dense<0.000000e+00> : vector<2x8xf32>
    %83 = vector.multi_reduction <add>, %82, %cst_39 [2] : vector<2x8x8xf32> to vector<2x8xf32>
    %84 = vector.shape_cast %83 : vector<2x8xf32> to vector<2x8x1xf32>
    %85 = tpu.reciprocal %84 {approx = true} : vector<2x8x1xf32> -> vector<2x8x1xf32>
    %86 = vector.broadcast %85 : vector<2x8x1xf32> to vector<2x8x8xf32>
    %87 = arith.mulf %82, %86 : vector<2x8x8xf32>
    %88 = arith.truncf %87 : vector<2x8x8xf32> to vector<2x8x8xbf16>
    "tpu.trace_start"() <{level = 10 : i32, message = "bqk,bkv->bqv"}> : () -> ()
    %cst_40 = arith.constant dense<0.000000e+00> : vector<2x8x32xf32>
    %89 = tpu.matmul %88, %74, %cst_40 {dimension_numbers = #tpu.dot_dimension_numbers<[2], [1], [1], [2], [0, 0, 0, 1, 1, 2], [0], [0]>} : vector<2x8x8xbf16>, vector<2x8x32xbf16>, vector<2x8x32xf32> -> vector<2x8x32xf32>
    "tpu.trace_stop"() : () -> ()
    %90 = vector.extract_strided_slice %64 {offsets = [0, 0, 32], sizes = [2, 8, 32], strides = [1, 1, 1]} : vector<2x8x128xf32> to vector<2x8x32xf32>
    %91 = arith.truncf %90 : vector<2x8x32xf32> to vector<2x8x32xbf16>
    %92 = vector.extract_strided_slice %66 {offsets = [0, 0, 32], sizes = [2, 8, 32], strides = [1, 1, 1]} : vector<2x8x128xf32> to vector<2x8x32xf32>
    %93 = arith.truncf %92 : vector<2x8x32xf32> to vector<2x8x32xbf16>
    %94 = vector.extract_strided_slice %69 {offsets = [0, 0, 32], sizes = [2, 8, 32], strides = [1, 1, 1]} : vector<2x8x128xbf16> to vector<2x8x32xbf16>
    "tpu.trace_start"() <{level = 10 : i32, message = "bqd,bkd->bqk"}> : () -> ()
    %cst_41 = arith.constant dense<0.000000e+00> : vector<2x8x8xf32>
    %95 = tpu.matmul %91, %93, %cst_41 {dimension_numbers = #tpu.dot_dimension_numbers<[2], [2], [1], [1], [0, 0, 0, 1, 1, 1], [0], [0]>} : vector<2x8x32xbf16>, vector<2x8x32xbf16>, vector<2x8x8xf32> -> vector<2x8x8xf32>
    "tpu.trace_stop"() : () -> ()
    %cst_42 = arith.constant 0.176776692 : f32
    %96 = vector.broadcast %cst_42 : f32 to vector<2x8x8xf32>
    %97 = arith.mulf %95, %96 : vector<2x8x8xf32>
    %cst_43 = arith.constant dense<0xFF800000> : vector<2x8xf32>
    %98 = vector.multi_reduction <maximumf>, %97, %cst_43 [2] : vector<2x8x8xf32> to vector<2x8xf32>
    %99 = vector.shape_cast %98 : vector<2x8xf32> to vector<2x8x1xf32>
    %100 = vector.broadcast %99 : vector<2x8x1xf32> to vector<2x8x8xf32>
    %101 = arith.subf %97, %100 : vector<2x8x8xf32>
    %102 = math.exp %101 : vector<2x8x8xf32>
    %cst_44 = arith.constant dense<0.000000e+00> : vector<2x8xf32>
    %103 = vector.multi_reduction <add>, %102, %cst_44 [2] : vector<2x8x8xf32> to vector<2x8xf32>
    %104 = vector.shape_cast %103 : vector<2x8xf32> to vector<2x8x1xf32>
    %105 = tpu.reciprocal %104 {approx = true} : vector<2x8x1xf32> -> vector<2x8x1xf32>
    %106 = vector.broadcast %105 : vector<2x8x1xf32> to vector<2x8x8xf32>
    %107 = arith.mulf %102, %106 : vector<2x8x8xf32>
    %108 = arith.truncf %107 : vector<2x8x8xf32> to vector<2x8x8xbf16>
    "tpu.trace_start"() <{level = 10 : i32, message = "bqk,bkv->bqv"}> : () -> ()
    %cst_45 = arith.constant dense<0.000000e+00> : vector<2x8x32xf32>
    %109 = tpu.matmul %108, %94, %cst_45 {dimension_numbers = #tpu.dot_dimension_numbers<[2], [1], [1], [2], [0, 0, 0, 1, 1, 2], [0], [0]>} : vector<2x8x8xbf16>, vector<2x8x32xbf16>, vector<2x8x32xf32> -> vector<2x8x32xf32>
    "tpu.trace_stop"() : () -> ()
    %110 = vector.extract_strided_slice %64 {offsets = [0, 0, 64], sizes = [2, 8, 32], strides = [1, 1, 1]} : vector<2x8x128xf32> to vector<2x8x32xf32>
    %111 = arith.truncf %110 : vector<2x8x32xf32> to vector<2x8x32xbf16>
    %112 = vector.extract_strided_slice %66 {offsets = [0, 0, 64], sizes = [2, 8, 32], strides = [1, 1, 1]} : vector<2x8x128xf32> to vector<2x8x32xf32>
    %113 = arith.truncf %112 : vector<2x8x32xf32> to vector<2x8x32xbf16>
    %114 = vector.extract_strided_slice %69 {offsets = [0, 0, 64], sizes = [2, 8, 32], strides = [1, 1, 1]} : vector<2x8x128xbf16> to vector<2x8x32xbf16>
    "tpu.trace_start"() <{level = 10 : i32, message = "bqd,bkd->bqk"}> : () -> ()
    %cst_46 = arith.constant dense<0.000000e+00> : vector<2x8x8xf32>
    %115 = tpu.matmul %111, %113, %cst_46 {dimension_numbers = #tpu.dot_dimension_numbers<[2], [2], [1], [1], [0, 0, 0, 1, 1, 1], [0], [0]>} : vector<2x8x32xbf16>, vector<2x8x32xbf16>, vector<2x8x8xf32> -> vector<2x8x8xf32>
    "tpu.trace_stop"() : () -> ()
    %cst_47 = arith.constant 0.176776692 : f32
    %116 = vector.broadcast %cst_47 : f32 to vector<2x8x8xf32>
    %117 = arith.mulf %115, %116 : vector<2x8x8xf32>
    %cst_48 = arith.constant dense<0xFF800000> : vector<2x8xf32>
    %118 = vector.multi_reduction <maximumf>, %117, %cst_48 [2] : vector<2x8x8xf32> to vector<2x8xf32>
    %119 = vector.shape_cast %118 : vector<2x8xf32> to vector<2x8x1xf32>
    %120 = vector.broadcast %119 : vector<2x8x1xf32> to vector<2x8x8xf32>
    %121 = arith.subf %117, %120 : vector<2x8x8xf32>
    %122 = math.exp %121 : vector<2x8x8xf32>
    %cst_49 = arith.constant dense<0.000000e+00> : vector<2x8xf32>
    %123 = vector.multi_reduction <add>, %122, %cst_49 [2] : vector<2x8x8xf32> to vector<2x8xf32>
    %124 = vector.shape_cast %123 : vector<2x8xf32> to vector<2x8x1xf32>
    %125 = tpu.reciprocal %124 {approx = true} : vector<2x8x1xf32> -> vector<2x8x1xf32>
    %126 = vector.broadcast %125 : vector<2x8x1xf32> to vector<2x8x8xf32>
    %127 = arith.mulf %122, %126 : vector<2x8x8xf32>
    %128 = arith.truncf %127 : vector<2x8x8xf32> to vector<2x8x8xbf16>
    "tpu.trace_start"() <{level = 10 : i32, message = "bqk,bkv->bqv"}> : () -> ()
    %cst_50 = arith.constant dense<0.000000e+00> : vector<2x8x32xf32>
    %129 = tpu.matmul %128, %114, %cst_50 {dimension_numbers = #tpu.dot_dimension_numbers<[2], [1], [1], [2], [0, 0, 0, 1, 1, 2], [0], [0]>} : vector<2x8x8xbf16>, vector<2x8x32xbf16>, vector<2x8x32xf32> -> vector<2x8x32xf32>
    "tpu.trace_stop"() : () -> ()
    %130 = vector.extract_strided_slice %64 {offsets = [0, 0, 96], sizes = [2, 8, 32], strides = [1, 1, 1]} : vector<2x8x128xf32> to vector<2x8x32xf32>
    %131 = arith.truncf %130 : vector<2x8x32xf32> to vector<2x8x32xbf16>
    %132 = vector.extract_strided_slice %66 {offsets = [0, 0, 96], sizes = [2, 8, 32], strides = [1, 1, 1]} : vector<2x8x128xf32> to vector<2x8x32xf32>
    %133 = arith.truncf %132 : vector<2x8x32xf32> to vector<2x8x32xbf16>
    %134 = vector.extract_strided_slice %69 {offsets = [0, 0, 96], sizes = [2, 8, 32], strides = [1, 1, 1]} : vector<2x8x128xbf16> to vector<2x8x32xbf16>
    "tpu.trace_start"() <{level = 10 : i32, message = "bqd,bkd->bqk"}> : () -> ()
    %cst_51 = arith.constant dense<0.000000e+00> : vector<2x8x8xf32>
    %135 = tpu.matmul %131, %133, %cst_51 {dimension_numbers = #tpu.dot_dimension_numbers<[2], [2], [1], [1], [0, 0, 0, 1, 1, 1], [0], [0]>} : vector<2x8x32xbf16>, vector<2x8x32xbf16>, vector<2x8x8xf32> -> vector<2x8x8xf32>
    "tpu.trace_stop"() : () -> ()
    %cst_52 = arith.constant 0.176776692 : f32
    %136 = vector.broadcast %cst_52 : f32 to vector<2x8x8xf32>
    %137 = arith.mulf %135, %136 : vector<2x8x8xf32>
    %cst_53 = arith.constant dense<0xFF800000> : vector<2x8xf32>
    %138 = vector.multi_reduction <maximumf>, %137, %cst_53 [2] : vector<2x8x8xf32> to vector<2x8xf32>
    %139 = vector.shape_cast %138 : vector<2x8xf32> to vector<2x8x1xf32>
    %140 = vector.broadcast %139 : vector<2x8x1xf32> to vector<2x8x8xf32>
    %141 = arith.subf %137, %140 : vector<2x8x8xf32>
    %142 = math.exp %141 : vector<2x8x8xf32>
    %cst_54 = arith.constant dense<0.000000e+00> : vector<2x8xf32>
    %143 = vector.multi_reduction <add>, %142, %cst_54 [2] : vector<2x8x8xf32> to vector<2x8xf32>
    %144 = vector.shape_cast %143 : vector<2x8xf32> to vector<2x8x1xf32>
    %145 = tpu.reciprocal %144 {approx = true} : vector<2x8x1xf32> -> vector<2x8x1xf32>
    %146 = vector.broadcast %145 : vector<2x8x1xf32> to vector<2x8x8xf32>
    %147 = arith.mulf %142, %146 : vector<2x8x8xf32>
    %148 = arith.truncf %147 : vector<2x8x8xf32> to vector<2x8x8xbf16>
    "tpu.trace_start"() <{level = 10 : i32, message = "bqk,bkv->bqv"}> : () -> ()
    %cst_55 = arith.constant dense<0.000000e+00> : vector<2x8x32xf32>
    %149 = tpu.matmul %148, %134, %cst_55 {dimension_numbers = #tpu.dot_dimension_numbers<[2], [1], [1], [2], [0, 0, 0, 1, 1, 2], [0], [0]>} : vector<2x8x8xbf16>, vector<2x8x32xbf16>, vector<2x8x32xf32> -> vector<2x8x32xf32>
    "tpu.trace_stop"() : () -> ()
    %150 = tpu.concatenate %89, %109, %129, %149 in 2 : vector<2x8x32xf32>, vector<2x8x32xf32>, vector<2x8x32xf32>, vector<2x8x32xf32> -> vector<2x8x128xf32>
    %151 = vector.shape_cast %150 : vector<2x8x128xf32> to vector<16x128xf32>
    %152 = arith.truncf %151 : vector<16x128xf32> to vector<16x128xbf16>
    %c0_56 = arith.constant 0 : index
    %c0_57 = arith.constant 0 : index
    %153 = vector.load %arg12[%c0_56, %c0_57] : memref<128x32xbf16, #tpu.memory_space<vmem>>, vector<128x32xbf16>
    %cst_58 = arith.constant dense<0.000000e+00> : vector<16x32xf32>
    %154 = tpu.matmul %152, %153, %cst_58 {dimension_numbers = #tpu.dot_dimension_numbers<[1], [0], [0], [1], [0, 0, 1, 1], [], []>} : vector<16x128xbf16>, vector<128x32xbf16>, vector<16x32xf32> -> vector<16x32xf32>
    %155 = arith.addf %56, %154 : vector<16x32xf32>
    %c0_59 = arith.constant 0 : index
    %c0_60 = arith.constant 0 : index
    %156 = vector.load %arg13[%c0_59, %c0_60] : memref<1x32xf32, #tpu.memory_space<vmem>>, vector<1x32xf32>
    %157 = vector.broadcast %156 : vector<1x32xf32> to vector<16x32xf32>
    %158 = arith.addf %155, %157 : vector<16x32xf32>
    %c0_61 = arith.constant 0 : index
    %c0_62 = arith.constant 0 : index
    %159 = vector.load %arg14[%c0_61, %c0_62] : memref<1x32xf32, #tpu.memory_space<vmem>>, vector<1x32xf32>
    %c0_63 = arith.constant 0 : index
    %c0_64 = arith.constant 0 : index
    %160 = vector.load %arg15[%c0_63, %c0_64] : memref<1x32xf32, #tpu.memory_space<vmem>>, vector<1x32xf32>
    %cst_65 = arith.constant dense<0.000000e+00> : vector<16xf32>
    %161 = vector.multi_reduction <add>, %158, %cst_65 [1] : vector<16x32xf32> to vector<16xf32>
    %162 = vector.shape_cast %161 : vector<16xf32> to vector<16x1xf32>
    %cst_66 = arith.constant 3.200000e+01 : f32
    %163 = vector.broadcast %cst_66 : f32 to vector<16x1xf32>
    %164 = arith.divf %162, %163 : vector<16x1xf32>
    %165 = vector.broadcast %164 : vector<16x1xf32> to vector<16x32xf32>
    %166 = arith.subf %158, %165 : vector<16x32xf32>
    %167 = arith.mulf %166, %166 : vector<16x32xf32>
    %cst_67 = arith.constant dense<0.000000e+00> : vector<16xf32>
    %168 = vector.multi_reduction <add>, %167, %cst_67 [1] : vector<16x32xf32> to vector<16xf32>
    %169 = vector.shape_cast %168 : vector<16xf32> to vector<16x1xf32>
    %cst_68 = arith.constant 3.200000e+01 : f32
    %170 = vector.broadcast %cst_68 : f32 to vector<16x1xf32>
    %171 = arith.divf %169, %170 : vector<16x1xf32>
    %172 = vector.broadcast %164 : vector<16x1xf32> to vector<16x32xf32>
    %173 = arith.subf %158, %172 : vector<16x32xf32>
    %cst_69 = arith.constant 9.99999974E-6 : f32
    %174 = vector.broadcast %cst_69 : f32 to vector<16x1xf32>
    %175 = arith.addf %171, %174 : vector<16x1xf32>
    %176 = math.rsqrt %175 : vector<16x1xf32>
    %177 = vector.broadcast %176 : vector<16x1xf32> to vector<16x32xf32>
    %178 = arith.mulf %173, %177 : vector<16x32xf32>
    %179 = vector.broadcast %159 : vector<1x32xf32> to vector<16x32xf32>
    %180 = arith.mulf %178, %179 : vector<16x32xf32>
    %181 = vector.broadcast %160 : vector<1x32xf32> to vector<16x32xf32>
    %182 = arith.addf %180, %181 : vector<16x32xf32>
    %c0_70 = arith.constant 0 : index
    %c0_71 = arith.constant 0 : index
    %183 = vector.load %arg16[%c0_70, %c0_71] : memref<64x32xbf16, #tpu.memory_space<vmem>>, vector<64x32xbf16>
    %184 = arith.truncf %182 : vector<16x32xf32> to vector<16x32xbf16>
    %185 = vector.extract_strided_slice %183 {offsets = [0, 0], sizes = [32, 32], strides = [1, 1]} : vector<64x32xbf16> to vector<32x32xbf16>
    %cst_72 = arith.constant dense<0.000000e+00> : vector<16x32xf32>
    %186 = tpu.matmul %184, %185, %cst_72 {dimension_numbers = #tpu.dot_dimension_numbers<[1], [0], [0], [1], [0, 0, 1, 1], [], []>} : vector<16x32xbf16>, vector<32x32xbf16>, vector<16x32xf32> -> vector<16x32xf32>
    %187 = arith.truncf %5 : vector<16x32xf32> to vector<16x32xbf16>
    %188 = vector.extract_strided_slice %183 {offsets = [32, 0], sizes = [32, 32], strides = [1, 1]} : vector<64x32xbf16> to vector<32x32xbf16>
    %cst_73 = arith.constant dense<0.000000e+00> : vector<16x32xf32>
    %189 = tpu.matmul %187, %188, %cst_73 {dimension_numbers = #tpu.dot_dimension_numbers<[1], [0], [0], [1], [0, 0, 1, 1], [], []>} : vector<16x32xbf16>, vector<32x32xbf16>, vector<16x32xf32> -> vector<16x32xf32>
    %190 = arith.addf %186, %189 : vector<16x32xf32>
    %c0_74 = arith.constant 0 : index
    %c0_75 = arith.constant 0 : index
    %191 = vector.load %arg17[%c0_74, %c0_75] : memref<1x32xf32, #tpu.memory_space<vmem>>, vector<1x32xf32>
    %192 = vector.broadcast %191 : vector<1x32xf32> to vector<16x32xf32>
    %193 = arith.addf %190, %192 : vector<16x32xf32>
    %c0_76 = arith.constant 0 : index
    %c0_77 = arith.constant 0 : index
    %194 = vector.load %arg18[%c0_76, %c0_77] : memref<1x32xf32, #tpu.memory_space<vmem>>, vector<1x32xf32>
    %c0_78 = arith.constant 0 : index
    %c0_79 = arith.constant 0 : index
    %195 = vector.load %arg19[%c0_78, %c0_79] : memref<1x32xf32, #tpu.memory_space<vmem>>, vector<1x32xf32>
    %cst_80 = arith.constant dense<0.000000e+00> : vector<16xf32>
    %196 = vector.multi_reduction <add>, %193, %cst_80 [1] : vector<16x32xf32> to vector<16xf32>
    %197 = vector.shape_cast %196 : vector<16xf32> to vector<16x1xf32>
    %cst_81 = arith.constant 3.200000e+01 : f32
    %198 = vector.broadcast %cst_81 : f32 to vector<16x1xf32>
    %199 = arith.divf %197, %198 : vector<16x1xf32>
    %200 = vector.broadcast %199 : vector<16x1xf32> to vector<16x32xf32>
    %201 = arith.subf %193, %200 : vector<16x32xf32>
    %202 = arith.mulf %201, %201 : vector<16x32xf32>
    %cst_82 = arith.constant dense<0.000000e+00> : vector<16xf32>
    %203 = vector.multi_reduction <add>, %202, %cst_82 [1] : vector<16x32xf32> to vector<16xf32>
    %204 = vector.shape_cast %203 : vector<16xf32> to vector<16x1xf32>
    %cst_83 = arith.constant 3.200000e+01 : f32
    %205 = vector.broadcast %cst_83 : f32 to vector<16x1xf32>
    %206 = arith.divf %204, %205 : vector<16x1xf32>
    %207 = vector.broadcast %199 : vector<16x1xf32> to vector<16x32xf32>
    %208 = arith.subf %193, %207 : vector<16x32xf32>
    %cst_84 = arith.constant 9.99999974E-6 : f32
    %209 = vector.broadcast %cst_84 : f32 to vector<16x1xf32>
    %210 = arith.addf %206, %209 : vector<16x1xf32>
    %211 = math.rsqrt %210 : vector<16x1xf32>
    %212 = vector.broadcast %211 : vector<16x1xf32> to vector<16x32xf32>
    %213 = arith.mulf %208, %212 : vector<16x32xf32>
    %214 = vector.broadcast %194 : vector<1x32xf32> to vector<16x32xf32>
    %215 = arith.mulf %213, %214 : vector<16x32xf32>
    %216 = vector.broadcast %195 : vector<1x32xf32> to vector<16x32xf32>
    %217 = arith.addf %215, %216 : vector<16x32xf32>
    %218 = arith.negf %217 : vector<16x32xf32>
    %219 = math.exp %218 : vector<16x32xf32>
    %cst_85 = arith.constant 1.000000e+00 : f32
    %220 = vector.broadcast %cst_85 : f32 to vector<16x32xf32>
    %221 = arith.addf %220, %219 : vector<16x32xf32>
    %222 = arith.divf %220, %221 : vector<16x32xf32>
    %223 = arith.mulf %217, %222 : vector<16x32xf32>
    %224 = arith.truncf %223 : vector<16x32xf32> to vector<16x32xbf16>
    %c0_86 = arith.constant 0 : index
    %c0_87 = arith.constant 0 : index
    %225 = vector.load %arg20[%c0_86, %c0_87] : memref<32x384xbf16, #tpu.memory_space<vmem>>, vector<32x384xbf16>
    %cst_88 = arith.constant dense<0.000000e+00> : vector<16x384xf32>
    %226 = tpu.matmul %224, %225, %cst_88 {dimension_numbers = #tpu.dot_dimension_numbers<[1], [0], [0], [1], [0, 0, 1, 1], [], []>} : vector<16x32xbf16>, vector<32x384xbf16>, vector<16x384xf32> -> vector<16x384xf32>
    %c0_89 = arith.constant 0 : index
    %c0_90 = arith.constant 0 : index
    %227 = vector.load %arg21[%c0_89, %c0_90] : memref<1x384xf32, #tpu.memory_space<vmem>>, vector<1x384xf32>
    %228 = vector.broadcast %227 : vector<1x384xf32> to vector<16x384xf32>
    %229 = arith.addf %226, %228 : vector<16x384xf32>
    %230 = vector.extract_strided_slice %229 {offsets = [0, 0], sizes = [16, 128], strides = [1, 1]} : vector<16x384xf32> to vector<16x128xf32>
    %231 = vector.shape_cast %230 : vector<16x128xf32> to vector<2x8x128xf32>
    %232 = vector.extract_strided_slice %229 {offsets = [0, 128], sizes = [16, 128], strides = [1, 1]} : vector<16x384xf32> to vector<16x128xf32>
    %233 = vector.shape_cast %232 : vector<16x128xf32> to vector<2x8x128xf32>
    %234 = vector.extract_strided_slice %229 {offsets = [0, 256], sizes = [16, 128], strides = [1, 1]} : vector<16x384xf32> to vector<16x128xf32>
    %235 = vector.shape_cast %234 : vector<16x128xf32> to vector<2x8x128xf32>
    %236 = arith.truncf %235 : vector<2x8x128xf32> to vector<2x8x128xbf16>
    %237 = vector.extract_strided_slice %231 {offsets = [0, 0, 0], sizes = [2, 8, 32], strides = [1, 1, 1]} : vector<2x8x128xf32> to vector<2x8x32xf32>
    %238 = arith.truncf %237 : vector<2x8x32xf32> to vector<2x8x32xbf16>
    %239 = vector.extract_strided_slice %233 {offsets = [0, 0, 0], sizes = [2, 8, 32], strides = [1, 1, 1]} : vector<2x8x128xf32> to vector<2x8x32xf32>
    %240 = arith.truncf %239 : vector<2x8x32xf32> to vector<2x8x32xbf16>
    %241 = vector.extract_strided_slice %236 {offsets = [0, 0, 0], sizes = [2, 8, 32], strides = [1, 1, 1]} : vector<2x8x128xbf16> to vector<2x8x32xbf16>
    "tpu.trace_start"() <{level = 10 : i32, message = "bqd,bkd->bqk"}> : () -> ()
    %cst_91 = arith.constant dense<0.000000e+00> : vector<2x8x8xf32>
    %242 = tpu.matmul %238, %240, %cst_91 {dimension_numbers = #tpu.dot_dimension_numbers<[2], [2], [1], [1], [0, 0, 0, 1, 1, 1], [0], [0]>} : vector<2x8x32xbf16>, vector<2x8x32xbf16>, vector<2x8x8xf32> -> vector<2x8x8xf32>
    "tpu.trace_stop"() : () -> ()
    %cst_92 = arith.constant 0.176776692 : f32
    %243 = vector.broadcast %cst_92 : f32 to vector<2x8x8xf32>
    %244 = arith.mulf %242, %243 : vector<2x8x8xf32>
    %cst_93 = arith.constant dense<0xFF800000> : vector<2x8xf32>
    %245 = vector.multi_reduction <maximumf>, %244, %cst_93 [2] : vector<2x8x8xf32> to vector<2x8xf32>
    %246 = vector.shape_cast %245 : vector<2x8xf32> to vector<2x8x1xf32>
    %247 = vector.broadcast %246 : vector<2x8x1xf32> to vector<2x8x8xf32>
    %248 = arith.subf %244, %247 : vector<2x8x8xf32>
    %249 = math.exp %248 : vector<2x8x8xf32>
    %cst_94 = arith.constant dense<0.000000e+00> : vector<2x8xf32>
    %250 = vector.multi_reduction <add>, %249, %cst_94 [2] : vector<2x8x8xf32> to vector<2x8xf32>
    %251 = vector.shape_cast %250 : vector<2x8xf32> to vector<2x8x1xf32>
    %252 = tpu.reciprocal %251 {approx = true} : vector<2x8x1xf32> -> vector<2x8x1xf32>
    %253 = vector.broadcast %252 : vector<2x8x1xf32> to vector<2x8x8xf32>
    %254 = arith.mulf %249, %253 : vector<2x8x8xf32>
    %255 = arith.truncf %254 : vector<2x8x8xf32> to vector<2x8x8xbf16>
    "tpu.trace_start"() <{level = 10 : i32, message = "bqk,bkv->bqv"}> : () -> ()
    %cst_95 = arith.constant dense<0.000000e+00> : vector<2x8x32xf32>
    %256 = tpu.matmul %255, %241, %cst_95 {dimension_numbers = #tpu.dot_dimension_numbers<[2], [1], [1], [2], [0, 0, 0, 1, 1, 2], [0], [0]>} : vector<2x8x8xbf16>, vector<2x8x32xbf16>, vector<2x8x32xf32> -> vector<2x8x32xf32>
    "tpu.trace_stop"() : () -> ()
    %257 = vector.extract_strided_slice %231 {offsets = [0, 0, 32], sizes = [2, 8, 32], strides = [1, 1, 1]} : vector<2x8x128xf32> to vector<2x8x32xf32>
    %258 = arith.truncf %257 : vector<2x8x32xf32> to vector<2x8x32xbf16>
    %259 = vector.extract_strided_slice %233 {offsets = [0, 0, 32], sizes = [2, 8, 32], strides = [1, 1, 1]} : vector<2x8x128xf32> to vector<2x8x32xf32>
    %260 = arith.truncf %259 : vector<2x8x32xf32> to vector<2x8x32xbf16>
    %261 = vector.extract_strided_slice %236 {offsets = [0, 0, 32], sizes = [2, 8, 32], strides = [1, 1, 1]} : vector<2x8x128xbf16> to vector<2x8x32xbf16>
    "tpu.trace_start"() <{level = 10 : i32, message = "bqd,bkd->bqk"}> : () -> ()
    %cst_96 = arith.constant dense<0.000000e+00> : vector<2x8x8xf32>
    %262 = tpu.matmul %258, %260, %cst_96 {dimension_numbers = #tpu.dot_dimension_numbers<[2], [2], [1], [1], [0, 0, 0, 1, 1, 1], [0], [0]>} : vector<2x8x32xbf16>, vector<2x8x32xbf16>, vector<2x8x8xf32> -> vector<2x8x8xf32>
    "tpu.trace_stop"() : () -> ()
    %cst_97 = arith.constant 0.176776692 : f32
    %263 = vector.broadcast %cst_97 : f32 to vector<2x8x8xf32>
    %264 = arith.mulf %262, %263 : vector<2x8x8xf32>
    %cst_98 = arith.constant dense<0xFF800000> : vector<2x8xf32>
    %265 = vector.multi_reduction <maximumf>, %264, %cst_98 [2] : vector<2x8x8xf32> to vector<2x8xf32>
    %266 = vector.shape_cast %265 : vector<2x8xf32> to vector<2x8x1xf32>
    %267 = vector.broadcast %266 : vector<2x8x1xf32> to vector<2x8x8xf32>
    %268 = arith.subf %264, %267 : vector<2x8x8xf32>
    %269 = math.exp %268 : vector<2x8x8xf32>
    %cst_99 = arith.constant dense<0.000000e+00> : vector<2x8xf32>
    %270 = vector.multi_reduction <add>, %269, %cst_99 [2] : vector<2x8x8xf32> to vector<2x8xf32>
    %271 = vector.shape_cast %270 : vector<2x8xf32> to vector<2x8x1xf32>
    %272 = tpu.reciprocal %271 {approx = true} : vector<2x8x1xf32> -> vector<2x8x1xf32>
    %273 = vector.broadcast %272 : vector<2x8x1xf32> to vector<2x8x8xf32>
    %274 = arith.mulf %269, %273 : vector<2x8x8xf32>
    %275 = arith.truncf %274 : vector<2x8x8xf32> to vector<2x8x8xbf16>
    "tpu.trace_start"() <{level = 10 : i32, message = "bqk,bkv->bqv"}> : () -> ()
    %cst_100 = arith.constant dense<0.000000e+00> : vector<2x8x32xf32>
    %276 = tpu.matmul %275, %261, %cst_100 {dimension_numbers = #tpu.dot_dimension_numbers<[2], [1], [1], [2], [0, 0, 0, 1, 1, 2], [0], [0]>} : vector<2x8x8xbf16>, vector<2x8x32xbf16>, vector<2x8x32xf32> -> vector<2x8x32xf32>
    "tpu.trace_stop"() : () -> ()
    %277 = vector.extract_strided_slice %231 {offsets = [0, 0, 64], sizes = [2, 8, 32], strides = [1, 1, 1]} : vector<2x8x128xf32> to vector<2x8x32xf32>
    %278 = arith.truncf %277 : vector<2x8x32xf32> to vector<2x8x32xbf16>
    %279 = vector.extract_strided_slice %233 {offsets = [0, 0, 64], sizes = [2, 8, 32], strides = [1, 1, 1]} : vector<2x8x128xf32> to vector<2x8x32xf32>
    %280 = arith.truncf %279 : vector<2x8x32xf32> to vector<2x8x32xbf16>
    %281 = vector.extract_strided_slice %236 {offsets = [0, 0, 64], sizes = [2, 8, 32], strides = [1, 1, 1]} : vector<2x8x128xbf16> to vector<2x8x32xbf16>
    "tpu.trace_start"() <{level = 10 : i32, message = "bqd,bkd->bqk"}> : () -> ()
    %cst_101 = arith.constant dense<0.000000e+00> : vector<2x8x8xf32>
    %282 = tpu.matmul %278, %280, %cst_101 {dimension_numbers = #tpu.dot_dimension_numbers<[2], [2], [1], [1], [0, 0, 0, 1, 1, 1], [0], [0]>} : vector<2x8x32xbf16>, vector<2x8x32xbf16>, vector<2x8x8xf32> -> vector<2x8x8xf32>
    "tpu.trace_stop"() : () -> ()
    %cst_102 = arith.constant 0.176776692 : f32
    %283 = vector.broadcast %cst_102 : f32 to vector<2x8x8xf32>
    %284 = arith.mulf %282, %283 : vector<2x8x8xf32>
    %cst_103 = arith.constant dense<0xFF800000> : vector<2x8xf32>
    %285 = vector.multi_reduction <maximumf>, %284, %cst_103 [2] : vector<2x8x8xf32> to vector<2x8xf32>
    %286 = vector.shape_cast %285 : vector<2x8xf32> to vector<2x8x1xf32>
    %287 = vector.broadcast %286 : vector<2x8x1xf32> to vector<2x8x8xf32>
    %288 = arith.subf %284, %287 : vector<2x8x8xf32>
    %289 = math.exp %288 : vector<2x8x8xf32>
    %cst_104 = arith.constant dense<0.000000e+00> : vector<2x8xf32>
    %290 = vector.multi_reduction <add>, %289, %cst_104 [2] : vector<2x8x8xf32> to vector<2x8xf32>
    %291 = vector.shape_cast %290 : vector<2x8xf32> to vector<2x8x1xf32>
    %292 = tpu.reciprocal %291 {approx = true} : vector<2x8x1xf32> -> vector<2x8x1xf32>
    %293 = vector.broadcast %292 : vector<2x8x1xf32> to vector<2x8x8xf32>
    %294 = arith.mulf %289, %293 : vector<2x8x8xf32>
    %295 = arith.truncf %294 : vector<2x8x8xf32> to vector<2x8x8xbf16>
    "tpu.trace_start"() <{level = 10 : i32, message = "bqk,bkv->bqv"}> : () -> ()
    %cst_105 = arith.constant dense<0.000000e+00> : vector<2x8x32xf32>
    %296 = tpu.matmul %295, %281, %cst_105 {dimension_numbers = #tpu.dot_dimension_numbers<[2], [1], [1], [2], [0, 0, 0, 1, 1, 2], [0], [0]>} : vector<2x8x8xbf16>, vector<2x8x32xbf16>, vector<2x8x32xf32> -> vector<2x8x32xf32>
    "tpu.trace_stop"() : () -> ()
    %297 = vector.extract_strided_slice %231 {offsets = [0, 0, 96], sizes = [2, 8, 32], strides = [1, 1, 1]} : vector<2x8x128xf32> to vector<2x8x32xf32>
    %298 = arith.truncf %297 : vector<2x8x32xf32> to vector<2x8x32xbf16>
    %299 = vector.extract_strided_slice %233 {offsets = [0, 0, 96], sizes = [2, 8, 32], strides = [1, 1, 1]} : vector<2x8x128xf32> to vector<2x8x32xf32>
    %300 = arith.truncf %299 : vector<2x8x32xf32> to vector<2x8x32xbf16>
    %301 = vector.extract_strided_slice %236 {offsets = [0, 0, 96], sizes = [2, 8, 32], strides = [1, 1, 1]} : vector<2x8x128xbf16> to vector<2x8x32xbf16>
    "tpu.trace_start"() <{level = 10 : i32, message = "bqd,bkd->bqk"}> : () -> ()
    %cst_106 = arith.constant dense<0.000000e+00> : vector<2x8x8xf32>
    %302 = tpu.matmul %298, %300, %cst_106 {dimension_numbers = #tpu.dot_dimension_numbers<[2], [2], [1], [1], [0, 0, 0, 1, 1, 1], [0], [0]>} : vector<2x8x32xbf16>, vector<2x8x32xbf16>, vector<2x8x8xf32> -> vector<2x8x8xf32>
    "tpu.trace_stop"() : () -> ()
    %cst_107 = arith.constant 0.176776692 : f32
    %303 = vector.broadcast %cst_107 : f32 to vector<2x8x8xf32>
    %304 = arith.mulf %302, %303 : vector<2x8x8xf32>
    %cst_108 = arith.constant dense<0xFF800000> : vector<2x8xf32>
    %305 = vector.multi_reduction <maximumf>, %304, %cst_108 [2] : vector<2x8x8xf32> to vector<2x8xf32>
    %306 = vector.shape_cast %305 : vector<2x8xf32> to vector<2x8x1xf32>
    %307 = vector.broadcast %306 : vector<2x8x1xf32> to vector<2x8x8xf32>
    %308 = arith.subf %304, %307 : vector<2x8x8xf32>
    %309 = math.exp %308 : vector<2x8x8xf32>
    %cst_109 = arith.constant dense<0.000000e+00> : vector<2x8xf32>
    %310 = vector.multi_reduction <add>, %309, %cst_109 [2] : vector<2x8x8xf32> to vector<2x8xf32>
    %311 = vector.shape_cast %310 : vector<2x8xf32> to vector<2x8x1xf32>
    %312 = tpu.reciprocal %311 {approx = true} : vector<2x8x1xf32> -> vector<2x8x1xf32>
    %313 = vector.broadcast %312 : vector<2x8x1xf32> to vector<2x8x8xf32>
    %314 = arith.mulf %309, %313 : vector<2x8x8xf32>
    %315 = arith.truncf %314 : vector<2x8x8xf32> to vector<2x8x8xbf16>
    "tpu.trace_start"() <{level = 10 : i32, message = "bqk,bkv->bqv"}> : () -> ()
    %cst_110 = arith.constant dense<0.000000e+00> : vector<2x8x32xf32>
    %316 = tpu.matmul %315, %301, %cst_110 {dimension_numbers = #tpu.dot_dimension_numbers<[2], [1], [1], [2], [0, 0, 0, 1, 1, 2], [0], [0]>} : vector<2x8x8xbf16>, vector<2x8x32xbf16>, vector<2x8x32xf32> -> vector<2x8x32xf32>
    "tpu.trace_stop"() : () -> ()
    %317 = tpu.concatenate %256, %276, %296, %316 in 2 : vector<2x8x32xf32>, vector<2x8x32xf32>, vector<2x8x32xf32>, vector<2x8x32xf32> -> vector<2x8x128xf32>
    %318 = vector.shape_cast %317 : vector<2x8x128xf32> to vector<16x128xf32>
    %319 = arith.truncf %318 : vector<16x128xf32> to vector<16x128xbf16>
    %c0_111 = arith.constant 0 : index
    %c0_112 = arith.constant 0 : index
    %320 = vector.load %arg22[%c0_111, %c0_112] : memref<128x32xbf16, #tpu.memory_space<vmem>>, vector<128x32xbf16>
    %cst_113 = arith.constant dense<0.000000e+00> : vector<16x32xf32>
    %321 = tpu.matmul %319, %320, %cst_113 {dimension_numbers = #tpu.dot_dimension_numbers<[1], [0], [0], [1], [0, 0, 1, 1], [], []>} : vector<16x128xbf16>, vector<128x32xbf16>, vector<16x32xf32> -> vector<16x32xf32>
    %322 = arith.addf %223, %321 : vector<16x32xf32>
    %c0_114 = arith.constant 0 : index
    %c0_115 = arith.constant 0 : index
    %323 = vector.load %arg23[%c0_114, %c0_115] : memref<1x32xf32, #tpu.memory_space<vmem>>, vector<1x32xf32>
    %324 = vector.broadcast %323 : vector<1x32xf32> to vector<16x32xf32>
    %325 = arith.addf %322, %324 : vector<16x32xf32>
    %c0_116 = arith.constant 0 : index
    %c0_117 = arith.constant 0 : index
    %326 = vector.load %arg24[%c0_116, %c0_117] : memref<1x32xf32, #tpu.memory_space<vmem>>, vector<1x32xf32>
    %c0_118 = arith.constant 0 : index
    %c0_119 = arith.constant 0 : index
    %327 = vector.load %arg25[%c0_118, %c0_119] : memref<1x32xf32, #tpu.memory_space<vmem>>, vector<1x32xf32>
    %cst_120 = arith.constant dense<0.000000e+00> : vector<16xf32>
    %328 = vector.multi_reduction <add>, %325, %cst_120 [1] : vector<16x32xf32> to vector<16xf32>
    %329 = vector.shape_cast %328 : vector<16xf32> to vector<16x1xf32>
    %cst_121 = arith.constant 3.200000e+01 : f32
    %330 = vector.broadcast %cst_121 : f32 to vector<16x1xf32>
    %331 = arith.divf %329, %330 : vector<16x1xf32>
    %332 = vector.broadcast %331 : vector<16x1xf32> to vector<16x32xf32>
    %333 = arith.subf %325, %332 : vector<16x32xf32>
    %334 = arith.mulf %333, %333 : vector<16x32xf32>
    %cst_122 = arith.constant dense<0.000000e+00> : vector<16xf32>
    %335 = vector.multi_reduction <add>, %334, %cst_122 [1] : vector<16x32xf32> to vector<16xf32>
    %336 = vector.shape_cast %335 : vector<16xf32> to vector<16x1xf32>
    %cst_123 = arith.constant 3.200000e+01 : f32
    %337 = vector.broadcast %cst_123 : f32 to vector<16x1xf32>
    %338 = arith.divf %336, %337 : vector<16x1xf32>
    %339 = vector.broadcast %331 : vector<16x1xf32> to vector<16x32xf32>
    %340 = arith.subf %325, %339 : vector<16x32xf32>
    %cst_124 = arith.constant 9.99999974E-6 : f32
    %341 = vector.broadcast %cst_124 : f32 to vector<16x1xf32>
    %342 = arith.addf %338, %341 : vector<16x1xf32>
    %343 = math.rsqrt %342 : vector<16x1xf32>
    %344 = vector.broadcast %343 : vector<16x1xf32> to vector<16x32xf32>
    %345 = arith.mulf %340, %344 : vector<16x32xf32>
    %346 = vector.broadcast %326 : vector<1x32xf32> to vector<16x32xf32>
    %347 = arith.mulf %345, %346 : vector<16x32xf32>
    %348 = vector.broadcast %327 : vector<1x32xf32> to vector<16x32xf32>
    %349 = arith.addf %347, %348 : vector<16x32xf32>
    %c0_125 = arith.constant 0 : index
    %c0_126 = arith.constant 0 : index
    %350 = vector.load %arg26[%c0_125, %c0_126] : memref<64x32xbf16, #tpu.memory_space<vmem>>, vector<64x32xbf16>
    %351 = arith.truncf %349 : vector<16x32xf32> to vector<16x32xbf16>
    %352 = vector.extract_strided_slice %350 {offsets = [0, 0], sizes = [32, 32], strides = [1, 1]} : vector<64x32xbf16> to vector<32x32xbf16>
    %cst_127 = arith.constant dense<0.000000e+00> : vector<16x32xf32>
    %353 = tpu.matmul %351, %352, %cst_127 {dimension_numbers = #tpu.dot_dimension_numbers<[1], [0], [0], [1], [0, 0, 1, 1], [], []>} : vector<16x32xbf16>, vector<32x32xbf16>, vector<16x32xf32> -> vector<16x32xf32>
    %354 = arith.truncf %7 : vector<16x32xf32> to vector<16x32xbf16>
    %355 = vector.extract_strided_slice %350 {offsets = [32, 0], sizes = [32, 32], strides = [1, 1]} : vector<64x32xbf16> to vector<32x32xbf16>
    %cst_128 = arith.constant dense<0.000000e+00> : vector<16x32xf32>
    %356 = tpu.matmul %354, %355, %cst_128 {dimension_numbers = #tpu.dot_dimension_numbers<[1], [0], [0], [1], [0, 0, 1, 1], [], []>} : vector<16x32xbf16>, vector<32x32xbf16>, vector<16x32xf32> -> vector<16x32xf32>
    %357 = arith.addf %353, %356 : vector<16x32xf32>
    %c0_129 = arith.constant 0 : index
    %c0_130 = arith.constant 0 : index
    %358 = vector.load %arg27[%c0_129, %c0_130] : memref<1x32xf32, #tpu.memory_space<vmem>>, vector<1x32xf32>
    %359 = vector.broadcast %358 : vector<1x32xf32> to vector<16x32xf32>
    %360 = arith.addf %357, %359 : vector<16x32xf32>
    %c0_131 = arith.constant 0 : index
    %c0_132 = arith.constant 0 : index
    %361 = vector.load %arg28[%c0_131, %c0_132] : memref<1x32xf32, #tpu.memory_space<vmem>>, vector<1x32xf32>
    %c0_133 = arith.constant 0 : index
    %c0_134 = arith.constant 0 : index
    %362 = vector.load %arg29[%c0_133, %c0_134] : memref<1x32xf32, #tpu.memory_space<vmem>>, vector<1x32xf32>
    %cst_135 = arith.constant dense<0.000000e+00> : vector<16xf32>
    %363 = vector.multi_reduction <add>, %360, %cst_135 [1] : vector<16x32xf32> to vector<16xf32>
    %364 = vector.shape_cast %363 : vector<16xf32> to vector<16x1xf32>
    %cst_136 = arith.constant 3.200000e+01 : f32
    %365 = vector.broadcast %cst_136 : f32 to vector<16x1xf32>
    %366 = arith.divf %364, %365 : vector<16x1xf32>
    %367 = vector.broadcast %366 : vector<16x1xf32> to vector<16x32xf32>
    %368 = arith.subf %360, %367 : vector<16x32xf32>
    %369 = arith.mulf %368, %368 : vector<16x32xf32>
    %cst_137 = arith.constant dense<0.000000e+00> : vector<16xf32>
    %370 = vector.multi_reduction <add>, %369, %cst_137 [1] : vector<16x32xf32> to vector<16xf32>
    %371 = vector.shape_cast %370 : vector<16xf32> to vector<16x1xf32>
    %cst_138 = arith.constant 3.200000e+01 : f32
    %372 = vector.broadcast %cst_138 : f32 to vector<16x1xf32>
    %373 = arith.divf %371, %372 : vector<16x1xf32>
    %374 = vector.broadcast %366 : vector<16x1xf32> to vector<16x32xf32>
    %375 = arith.subf %360, %374 : vector<16x32xf32>
    %cst_139 = arith.constant 9.99999974E-6 : f32
    %376 = vector.broadcast %cst_139 : f32 to vector<16x1xf32>
    %377 = arith.addf %373, %376 : vector<16x1xf32>
    %378 = math.rsqrt %377 : vector<16x1xf32>
    %379 = vector.broadcast %378 : vector<16x1xf32> to vector<16x32xf32>
    %380 = arith.mulf %375, %379 : vector<16x32xf32>
    %381 = vector.broadcast %361 : vector<1x32xf32> to vector<16x32xf32>
    %382 = arith.mulf %380, %381 : vector<16x32xf32>
    %383 = vector.broadcast %362 : vector<1x32xf32> to vector<16x32xf32>
    %384 = arith.addf %382, %383 : vector<16x32xf32>
    %385 = arith.negf %384 : vector<16x32xf32>
    %386 = math.exp %385 : vector<16x32xf32>
    %cst_140 = arith.constant 1.000000e+00 : f32
    %387 = vector.broadcast %cst_140 : f32 to vector<16x32xf32>
    %388 = arith.addf %387, %386 : vector<16x32xf32>
    %389 = arith.divf %387, %388 : vector<16x32xf32>
    %390 = arith.mulf %384, %389 : vector<16x32xf32>
    %391 = arith.truncf %390 : vector<16x32xf32> to vector<16x32xbf16>
    %c0_141 = arith.constant 0 : index
    %c0_142 = arith.constant 0 : index
    %392 = vector.load %arg30[%c0_141, %c0_142] : memref<32x320xbf16, #tpu.memory_space<vmem>>, vector<32x320xbf16>
    %cst_143 = arith.constant dense<0.000000e+00> : vector<16x320xf32>
    %393 = tpu.matmul %391, %392, %cst_143 {dimension_numbers = #tpu.dot_dimension_numbers<[1], [0], [0], [1], [0, 0, 1, 1], [], []>} : vector<16x32xbf16>, vector<32x320xbf16>, vector<16x320xf32> -> vector<16x320xf32>
    %c0_144 = arith.constant 0 : index
    %c0_145 = arith.constant 0 : index
    %394 = vector.load %arg31[%c0_144, %c0_145] : memref<1x320xf32, #tpu.memory_space<vmem>>, vector<1x320xf32>
    %395 = vector.broadcast %394 : vector<1x320xf32> to vector<16x320xf32>
    %396 = arith.addf %393, %395 : vector<16x320xf32>
    %397 = vector.extract_strided_slice %396 {offsets = [0, 0], sizes = [16, 128], strides = [1, 1]} : vector<16x320xf32> to vector<16x128xf32>
    %398 = vector.shape_cast %397 : vector<16x128xf32> to vector<2x8x128xf32>
    %399 = vector.extract_strided_slice %396 {offsets = [0, 128], sizes = [16, 128], strides = [1, 1]} : vector<16x320xf32> to vector<16x128xf32>
    %400 = vector.shape_cast %399 : vector<16x128xf32> to vector<2x8x128xf32>
    %401 = vector.extract_strided_slice %396 {offsets = [0, 256], sizes = [16, 64], strides = [1, 1]} : vector<16x320xf32> to vector<16x64xf32>
    %402 = vector.shape_cast %401 : vector<16x64xf32> to vector<2x8x64xf32>
    %403 = arith.truncf %402 : vector<2x8x64xf32> to vector<2x8x64xbf16>
    %404 = vector.extract_strided_slice %398 {offsets = [0, 0, 0], sizes = [2, 8, 32], strides = [1, 1, 1]} : vector<2x8x128xf32> to vector<2x8x32xf32>
    %405 = arith.truncf %404 : vector<2x8x32xf32> to vector<2x8x32xbf16>
    %406 = vector.extract_strided_slice %400 {offsets = [0, 0, 0], sizes = [2, 8, 32], strides = [1, 1, 1]} : vector<2x8x128xf32> to vector<2x8x32xf32>
    %407 = arith.truncf %406 : vector<2x8x32xf32> to vector<2x8x32xbf16>
    %408 = vector.extract_strided_slice %403 {offsets = [0, 0, 0], sizes = [2, 8, 16], strides = [1, 1, 1]} : vector<2x8x64xbf16> to vector<2x8x16xbf16>
    "tpu.trace_start"() <{level = 10 : i32, message = "bqd,bkd->bqk"}> : () -> ()
    %cst_146 = arith.constant dense<0.000000e+00> : vector<2x8x8xf32>
    %409 = tpu.matmul %405, %407, %cst_146 {dimension_numbers = #tpu.dot_dimension_numbers<[2], [2], [1], [1], [0, 0, 0, 1, 1, 1], [0], [0]>} : vector<2x8x32xbf16>, vector<2x8x32xbf16>, vector<2x8x8xf32> -> vector<2x8x8xf32>
    "tpu.trace_stop"() : () -> ()
    %cst_147 = arith.constant 0.176776692 : f32
    %410 = vector.broadcast %cst_147 : f32 to vector<2x8x8xf32>
    %411 = arith.mulf %409, %410 : vector<2x8x8xf32>
    %cst_148 = arith.constant dense<0xFF800000> : vector<2x8xf32>
    %412 = vector.multi_reduction <maximumf>, %411, %cst_148 [2] : vector<2x8x8xf32> to vector<2x8xf32>
    %413 = vector.shape_cast %412 : vector<2x8xf32> to vector<2x8x1xf32>
    %414 = vector.broadcast %413 : vector<2x8x1xf32> to vector<2x8x8xf32>
    %415 = arith.subf %411, %414 : vector<2x8x8xf32>
    %416 = math.exp %415 : vector<2x8x8xf32>
    %cst_149 = arith.constant dense<0.000000e+00> : vector<2x8xf32>
    %417 = vector.multi_reduction <add>, %416, %cst_149 [2] : vector<2x8x8xf32> to vector<2x8xf32>
    %418 = vector.shape_cast %417 : vector<2x8xf32> to vector<2x8x1xf32>
    %419 = tpu.reciprocal %418 {approx = true} : vector<2x8x1xf32> -> vector<2x8x1xf32>
    %420 = vector.broadcast %419 : vector<2x8x1xf32> to vector<2x8x8xf32>
    %421 = arith.mulf %416, %420 : vector<2x8x8xf32>
    %422 = arith.truncf %421 : vector<2x8x8xf32> to vector<2x8x8xbf16>
    "tpu.trace_start"() <{level = 10 : i32, message = "bqk,bkv->bqv"}> : () -> ()
    %cst_150 = arith.constant dense<0.000000e+00> : vector<2x8x16xf32>
    %423 = tpu.matmul %422, %408, %cst_150 {dimension_numbers = #tpu.dot_dimension_numbers<[2], [1], [1], [2], [0, 0, 0, 1, 1, 2], [0], [0]>} : vector<2x8x8xbf16>, vector<2x8x16xbf16>, vector<2x8x16xf32> -> vector<2x8x16xf32>
    "tpu.trace_stop"() : () -> ()
    %424 = vector.extract_strided_slice %398 {offsets = [0, 0, 32], sizes = [2, 8, 32], strides = [1, 1, 1]} : vector<2x8x128xf32> to vector<2x8x32xf32>
    %425 = arith.truncf %424 : vector<2x8x32xf32> to vector<2x8x32xbf16>
    %426 = vector.extract_strided_slice %400 {offsets = [0, 0, 32], sizes = [2, 8, 32], strides = [1, 1, 1]} : vector<2x8x128xf32> to vector<2x8x32xf32>
    %427 = arith.truncf %426 : vector<2x8x32xf32> to vector<2x8x32xbf16>
    %428 = vector.extract_strided_slice %403 {offsets = [0, 0, 16], sizes = [2, 8, 16], strides = [1, 1, 1]} : vector<2x8x64xbf16> to vector<2x8x16xbf16>
    "tpu.trace_start"() <{level = 10 : i32, message = "bqd,bkd->bqk"}> : () -> ()
    %cst_151 = arith.constant dense<0.000000e+00> : vector<2x8x8xf32>
    %429 = tpu.matmul %425, %427, %cst_151 {dimension_numbers = #tpu.dot_dimension_numbers<[2], [2], [1], [1], [0, 0, 0, 1, 1, 1], [0], [0]>} : vector<2x8x32xbf16>, vector<2x8x32xbf16>, vector<2x8x8xf32> -> vector<2x8x8xf32>
    "tpu.trace_stop"() : () -> ()
    %cst_152 = arith.constant 0.176776692 : f32
    %430 = vector.broadcast %cst_152 : f32 to vector<2x8x8xf32>
    %431 = arith.mulf %429, %430 : vector<2x8x8xf32>
    %cst_153 = arith.constant dense<0xFF800000> : vector<2x8xf32>
    %432 = vector.multi_reduction <maximumf>, %431, %cst_153 [2] : vector<2x8x8xf32> to vector<2x8xf32>
    %433 = vector.shape_cast %432 : vector<2x8xf32> to vector<2x8x1xf32>
    %434 = vector.broadcast %433 : vector<2x8x1xf32> to vector<2x8x8xf32>
    %435 = arith.subf %431, %434 : vector<2x8x8xf32>
    %436 = math.exp %435 : vector<2x8x8xf32>
    %cst_154 = arith.constant dense<0.000000e+00> : vector<2x8xf32>
    %437 = vector.multi_reduction <add>, %436, %cst_154 [2] : vector<2x8x8xf32> to vector<2x8xf32>
    %438 = vector.shape_cast %437 : vector<2x8xf32> to vector<2x8x1xf32>
    %439 = tpu.reciprocal %438 {approx = true} : vector<2x8x1xf32> -> vector<2x8x1xf32>
    %440 = vector.broadcast %439 : vector<2x8x1xf32> to vector<2x8x8xf32>
    %441 = arith.mulf %436, %440 : vector<2x8x8xf32>
    %442 = arith.truncf %441 : vector<2x8x8xf32> to vector<2x8x8xbf16>
    "tpu.trace_start"() <{level = 10 : i32, message = "bqk,bkv->bqv"}> : () -> ()
    %cst_155 = arith.constant dense<0.000000e+00> : vector<2x8x16xf32>
    %443 = tpu.matmul %442, %428, %cst_155 {dimension_numbers = #tpu.dot_dimension_numbers<[2], [1], [1], [2], [0, 0, 0, 1, 1, 2], [0], [0]>} : vector<2x8x8xbf16>, vector<2x8x16xbf16>, vector<2x8x16xf32> -> vector<2x8x16xf32>
    "tpu.trace_stop"() : () -> ()
    %444 = vector.extract_strided_slice %398 {offsets = [0, 0, 64], sizes = [2, 8, 32], strides = [1, 1, 1]} : vector<2x8x128xf32> to vector<2x8x32xf32>
    %445 = arith.truncf %444 : vector<2x8x32xf32> to vector<2x8x32xbf16>
    %446 = vector.extract_strided_slice %400 {offsets = [0, 0, 64], sizes = [2, 8, 32], strides = [1, 1, 1]} : vector<2x8x128xf32> to vector<2x8x32xf32>
    %447 = arith.truncf %446 : vector<2x8x32xf32> to vector<2x8x32xbf16>
    %448 = vector.extract_strided_slice %403 {offsets = [0, 0, 32], sizes = [2, 8, 16], strides = [1, 1, 1]} : vector<2x8x64xbf16> to vector<2x8x16xbf16>
    "tpu.trace_start"() <{level = 10 : i32, message = "bqd,bkd->bqk"}> : () -> ()
    %cst_156 = arith.constant dense<0.000000e+00> : vector<2x8x8xf32>
    %449 = tpu.matmul %445, %447, %cst_156 {dimension_numbers = #tpu.dot_dimension_numbers<[2], [2], [1], [1], [0, 0, 0, 1, 1, 1], [0], [0]>} : vector<2x8x32xbf16>, vector<2x8x32xbf16>, vector<2x8x8xf32> -> vector<2x8x8xf32>
    "tpu.trace_stop"() : () -> ()
    %cst_157 = arith.constant 0.176776692 : f32
    %450 = vector.broadcast %cst_157 : f32 to vector<2x8x8xf32>
    %451 = arith.mulf %449, %450 : vector<2x8x8xf32>
    %cst_158 = arith.constant dense<0xFF800000> : vector<2x8xf32>
    %452 = vector.multi_reduction <maximumf>, %451, %cst_158 [2] : vector<2x8x8xf32> to vector<2x8xf32>
    %453 = vector.shape_cast %452 : vector<2x8xf32> to vector<2x8x1xf32>
    %454 = vector.broadcast %453 : vector<2x8x1xf32> to vector<2x8x8xf32>
    %455 = arith.subf %451, %454 : vector<2x8x8xf32>
    %456 = math.exp %455 : vector<2x8x8xf32>
    %cst_159 = arith.constant dense<0.000000e+00> : vector<2x8xf32>
    %457 = vector.multi_reduction <add>, %456, %cst_159 [2] : vector<2x8x8xf32> to vector<2x8xf32>
    %458 = vector.shape_cast %457 : vector<2x8xf32> to vector<2x8x1xf32>
    %459 = tpu.reciprocal %458 {approx = true} : vector<2x8x1xf32> -> vector<2x8x1xf32>
    %460 = vector.broadcast %459 : vector<2x8x1xf32> to vector<2x8x8xf32>
    %461 = arith.mulf %456, %460 : vector<2x8x8xf32>
    %462 = arith.truncf %461 : vector<2x8x8xf32> to vector<2x8x8xbf16>
    "tpu.trace_start"() <{level = 10 : i32, message = "bqk,bkv->bqv"}> : () -> ()
    %cst_160 = arith.constant dense<0.000000e+00> : vector<2x8x16xf32>
    %463 = tpu.matmul %462, %448, %cst_160 {dimension_numbers = #tpu.dot_dimension_numbers<[2], [1], [1], [2], [0, 0, 0, 1, 1, 2], [0], [0]>} : vector<2x8x8xbf16>, vector<2x8x16xbf16>, vector<2x8x16xf32> -> vector<2x8x16xf32>
    "tpu.trace_stop"() : () -> ()
    %464 = vector.extract_strided_slice %398 {offsets = [0, 0, 96], sizes = [2, 8, 32], strides = [1, 1, 1]} : vector<2x8x128xf32> to vector<2x8x32xf32>
    %465 = arith.truncf %464 : vector<2x8x32xf32> to vector<2x8x32xbf16>
    %466 = vector.extract_strided_slice %400 {offsets = [0, 0, 96], sizes = [2, 8, 32], strides = [1, 1, 1]} : vector<2x8x128xf32> to vector<2x8x32xf32>
    %467 = arith.truncf %466 : vector<2x8x32xf32> to vector<2x8x32xbf16>
    %468 = vector.extract_strided_slice %403 {offsets = [0, 0, 48], sizes = [2, 8, 16], strides = [1, 1, 1]} : vector<2x8x64xbf16> to vector<2x8x16xbf16>
    "tpu.trace_start"() <{level = 10 : i32, message = "bqd,bkd->bqk"}> : () -> ()
    %cst_161 = arith.constant dense<0.000000e+00> : vector<2x8x8xf32>
    %469 = tpu.matmul %465, %467, %cst_161 {dimension_numbers = #tpu.dot_dimension_numbers<[2], [2], [1], [1], [0, 0, 0, 1, 1, 1], [0], [0]>} : vector<2x8x32xbf16>, vector<2x8x32xbf16>, vector<2x8x8xf32> -> vector<2x8x8xf32>
    "tpu.trace_stop"() : () -> ()
    %cst_162 = arith.constant 0.176776692 : f32
    %470 = vector.broadcast %cst_162 : f32 to vector<2x8x8xf32>
    %471 = arith.mulf %469, %470 : vector<2x8x8xf32>
    %cst_163 = arith.constant dense<0xFF800000> : vector<2x8xf32>
    %472 = vector.multi_reduction <maximumf>, %471, %cst_163 [2] : vector<2x8x8xf32> to vector<2x8xf32>
    %473 = vector.shape_cast %472 : vector<2x8xf32> to vector<2x8x1xf32>
    %474 = vector.broadcast %473 : vector<2x8x1xf32> to vector<2x8x8xf32>
    %475 = arith.subf %471, %474 : vector<2x8x8xf32>
    %476 = math.exp %475 : vector<2x8x8xf32>
    %cst_164 = arith.constant dense<0.000000e+00> : vector<2x8xf32>
    %477 = vector.multi_reduction <add>, %476, %cst_164 [2] : vector<2x8x8xf32> to vector<2x8xf32>
    %478 = vector.shape_cast %477 : vector<2x8xf32> to vector<2x8x1xf32>
    %479 = tpu.reciprocal %478 {approx = true} : vector<2x8x1xf32> -> vector<2x8x1xf32>
    %480 = vector.broadcast %479 : vector<2x8x1xf32> to vector<2x8x8xf32>
    %481 = arith.mulf %476, %480 : vector<2x8x8xf32>
    %482 = arith.truncf %481 : vector<2x8x8xf32> to vector<2x8x8xbf16>
    "tpu.trace_start"() <{level = 10 : i32, message = "bqk,bkv->bqv"}> : () -> ()
    %cst_165 = arith.constant dense<0.000000e+00> : vector<2x8x16xf32>
    %483 = tpu.matmul %482, %468, %cst_165 {dimension_numbers = #tpu.dot_dimension_numbers<[2], [1], [1], [2], [0, 0, 0, 1, 1, 2], [0], [0]>} : vector<2x8x8xbf16>, vector<2x8x16xbf16>, vector<2x8x16xf32> -> vector<2x8x16xf32>
    "tpu.trace_stop"() : () -> ()
    %484 = tpu.concatenate %423, %443, %463, %483 in 2 : vector<2x8x16xf32>, vector<2x8x16xf32>, vector<2x8x16xf32>, vector<2x8x16xf32> -> vector<2x8x64xf32>
    %485 = vector.shape_cast %484 : vector<2x8x64xf32> to vector<16x64xf32>
    %486 = arith.truncf %485 : vector<16x64xf32> to vector<16x64xbf16>
    %c0_166 = arith.constant 0 : index
    %c0_167 = arith.constant 0 : index
    %487 = vector.load %arg32[%c0_166, %c0_167] : memref<64x32xbf16, #tpu.memory_space<vmem>>, vector<64x32xbf16>
    %cst_168 = arith.constant dense<0.000000e+00> : vector<16x32xf32>
    %488 = tpu.matmul %486, %487, %cst_168 {dimension_numbers = #tpu.dot_dimension_numbers<[1], [0], [0], [1], [0, 0, 1, 1], [], []>} : vector<16x64xbf16>, vector<64x32xbf16>, vector<16x32xf32> -> vector<16x32xf32>
    %489 = arith.addf %390, %488 : vector<16x32xf32>
    %c0_169 = arith.constant 0 : index
    %c0_170 = arith.constant 0 : index
    %490 = vector.load %arg33[%c0_169, %c0_170] : memref<1x32xf32, #tpu.memory_space<vmem>>, vector<1x32xf32>
    %491 = vector.broadcast %490 : vector<1x32xf32> to vector<16x32xf32>
    %492 = arith.addf %489, %491 : vector<16x32xf32>
    %c0_171 = arith.constant 0 : index
    %c0_172 = arith.constant 0 : index
    %493 = vector.load %arg34[%c0_171, %c0_172] : memref<1x32xf32, #tpu.memory_space<vmem>>, vector<1x32xf32>
    %c0_173 = arith.constant 0 : index
    %c0_174 = arith.constant 0 : index
    %494 = vector.load %arg35[%c0_173, %c0_174] : memref<1x32xf32, #tpu.memory_space<vmem>>, vector<1x32xf32>
    %cst_175 = arith.constant dense<0.000000e+00> : vector<16xf32>
    %495 = vector.multi_reduction <add>, %492, %cst_175 [1] : vector<16x32xf32> to vector<16xf32>
    %496 = vector.shape_cast %495 : vector<16xf32> to vector<16x1xf32>
    %cst_176 = arith.constant 3.200000e+01 : f32
    %497 = vector.broadcast %cst_176 : f32 to vector<16x1xf32>
    %498 = arith.divf %496, %497 : vector<16x1xf32>
    %499 = vector.broadcast %498 : vector<16x1xf32> to vector<16x32xf32>
    %500 = arith.subf %492, %499 : vector<16x32xf32>
    %501 = arith.mulf %500, %500 : vector<16x32xf32>
    %cst_177 = arith.constant dense<0.000000e+00> : vector<16xf32>
    %502 = vector.multi_reduction <add>, %501, %cst_177 [1] : vector<16x32xf32> to vector<16xf32>
    %503 = vector.shape_cast %502 : vector<16xf32> to vector<16x1xf32>
    %cst_178 = arith.constant 3.200000e+01 : f32
    %504 = vector.broadcast %cst_178 : f32 to vector<16x1xf32>
    %505 = arith.divf %503, %504 : vector<16x1xf32>
    %506 = vector.broadcast %498 : vector<16x1xf32> to vector<16x32xf32>
    %507 = arith.subf %492, %506 : vector<16x32xf32>
    %cst_179 = arith.constant 9.99999974E-6 : f32
    %508 = vector.broadcast %cst_179 : f32 to vector<16x1xf32>
    %509 = arith.addf %505, %508 : vector<16x1xf32>
    %510 = math.rsqrt %509 : vector<16x1xf32>
    %511 = vector.broadcast %510 : vector<16x1xf32> to vector<16x32xf32>
    %512 = arith.mulf %507, %511 : vector<16x32xf32>
    %513 = vector.broadcast %493 : vector<1x32xf32> to vector<16x32xf32>
    %514 = arith.mulf %512, %513 : vector<16x32xf32>
    %515 = vector.broadcast %494 : vector<1x32xf32> to vector<16x32xf32>
    %516 = arith.addf %514, %515 : vector<16x32xf32>
    %c0_180 = arith.constant 0 : index
    %c0_181 = arith.constant 0 : index
    %517 = vector.load %arg36[%c0_180, %c0_181] : memref<64x32xbf16, #tpu.memory_space<vmem>>, vector<64x32xbf16>
    %518 = arith.truncf %516 : vector<16x32xf32> to vector<16x32xbf16>
    %519 = vector.extract_strided_slice %517 {offsets = [0, 0], sizes = [32, 32], strides = [1, 1]} : vector<64x32xbf16> to vector<32x32xbf16>
    %cst_182 = arith.constant dense<0.000000e+00> : vector<16x32xf32>
    %520 = tpu.matmul %518, %519, %cst_182 {dimension_numbers = #tpu.dot_dimension_numbers<[1], [0], [0], [1], [0, 0, 1, 1], [], []>} : vector<16x32xbf16>, vector<32x32xbf16>, vector<16x32xf32> -> vector<16x32xf32>
    %521 = arith.truncf %9 : vector<16x32xf32> to vector<16x32xbf16>
    %522 = vector.extract_strided_slice %517 {offsets = [32, 0], sizes = [32, 32], strides = [1, 1]} : vector<64x32xbf16> to vector<32x32xbf16>
    %cst_183 = arith.constant dense<0.000000e+00> : vector<16x32xf32>
    %523 = tpu.matmul %521, %522, %cst_183 {dimension_numbers = #tpu.dot_dimension_numbers<[1], [0], [0], [1], [0, 0, 1, 1], [], []>} : vector<16x32xbf16>, vector<32x32xbf16>, vector<16x32xf32> -> vector<16x32xf32>
    %524 = arith.addf %520, %523 : vector<16x32xf32>
    %c0_184 = arith.constant 0 : index
    %c0_185 = arith.constant 0 : index
    %525 = vector.load %arg37[%c0_184, %c0_185] : memref<1x32xf32, #tpu.memory_space<vmem>>, vector<1x32xf32>
    %526 = vector.broadcast %525 : vector<1x32xf32> to vector<16x32xf32>
    %527 = arith.addf %524, %526 : vector<16x32xf32>
    %c0_186 = arith.constant 0 : index
    %c0_187 = arith.constant 0 : index
    %528 = vector.load %arg38[%c0_186, %c0_187] : memref<1x32xf32, #tpu.memory_space<vmem>>, vector<1x32xf32>
    %c0_188 = arith.constant 0 : index
    %c0_189 = arith.constant 0 : index
    %529 = vector.load %arg39[%c0_188, %c0_189] : memref<1x32xf32, #tpu.memory_space<vmem>>, vector<1x32xf32>
    %cst_190 = arith.constant dense<0.000000e+00> : vector<16xf32>
    %530 = vector.multi_reduction <add>, %527, %cst_190 [1] : vector<16x32xf32> to vector<16xf32>
    %531 = vector.shape_cast %530 : vector<16xf32> to vector<16x1xf32>
    %cst_191 = arith.constant 3.200000e+01 : f32
    %532 = vector.broadcast %cst_191 : f32 to vector<16x1xf32>
    %533 = arith.divf %531, %532 : vector<16x1xf32>
    %534 = vector.broadcast %533 : vector<16x1xf32> to vector<16x32xf32>
    %535 = arith.subf %527, %534 : vector<16x32xf32>
    %536 = arith.mulf %535, %535 : vector<16x32xf32>
    %cst_192 = arith.constant dense<0.000000e+00> : vector<16xf32>
    %537 = vector.multi_reduction <add>, %536, %cst_192 [1] : vector<16x32xf32> to vector<16xf32>
    %538 = vector.shape_cast %537 : vector<16xf32> to vector<16x1xf32>
    %cst_193 = arith.constant 3.200000e+01 : f32
    %539 = vector.broadcast %cst_193 : f32 to vector<16x1xf32>
    %540 = arith.divf %538, %539 : vector<16x1xf32>
    %541 = vector.broadcast %533 : vector<16x1xf32> to vector<16x32xf32>
    %542 = arith.subf %527, %541 : vector<16x32xf32>
    %cst_194 = arith.constant 9.99999974E-6 : f32
    %543 = vector.broadcast %cst_194 : f32 to vector<16x1xf32>
    %544 = arith.addf %540, %543 : vector<16x1xf32>
    %545 = math.rsqrt %544 : vector<16x1xf32>
    %546 = vector.broadcast %545 : vector<16x1xf32> to vector<16x32xf32>
    %547 = arith.mulf %542, %546 : vector<16x32xf32>
    %548 = vector.broadcast %528 : vector<1x32xf32> to vector<16x32xf32>
    %549 = arith.mulf %547, %548 : vector<16x32xf32>
    %550 = vector.broadcast %529 : vector<1x32xf32> to vector<16x32xf32>
    %551 = arith.addf %549, %550 : vector<16x32xf32>
    %552 = arith.negf %551 : vector<16x32xf32>
    %553 = math.exp %552 : vector<16x32xf32>
    %cst_195 = arith.constant 1.000000e+00 : f32
    %554 = vector.broadcast %cst_195 : f32 to vector<16x32xf32>
    %555 = arith.addf %554, %553 : vector<16x32xf32>
    %556 = arith.divf %554, %555 : vector<16x32xf32>
    %557 = arith.mulf %551, %556 : vector<16x32xf32>
    tpu.wait_dma2 semaphore(%arg44 : memref<!tpu.dma_semaphore, #tpu.memory_space<semaphore_mem>>) src(%arg40 : memref<8x32x16xbf16, #tpu.memory_space<any>>) dst(%arg43 : memref<8x32x16xbf16, #tpu.memory_space<vmem>>)
    %558 = vector.shape_cast %557 : vector<16x32xf32> to vector<2x8x32xf32>
    %cst_196 = arith.constant 0.000000e+00 : f32
    %559 = vector.broadcast %cst_196 : f32 to vector<2x16xf32>
    %560 = vector.extract_strided_slice %558 {offsets = [0, 0, 0], sizes = [2, 1, 32], strides = [1, 1, 1]} : vector<2x8x32xf32> to vector<2x1x32xf32>
    %561 = vector.shape_cast %560 : vector<2x1x32xf32> to vector<2x32xf32>
    %562 = arith.truncf %561 : vector<2x32xf32> to vector<2x32xbf16>
    %c0_197 = arith.constant 0 : index
    %c0_198 = arith.constant 0 : index
    %c0_199 = arith.constant 0 : index
    %563 = vector.load %arg43[%c0_197, %c0_198, %c0_199] : memref<8x32x16xbf16, #tpu.memory_space<vmem>>, vector<1x32x16xbf16>
    %564 = vector.shape_cast %563 : vector<1x32x16xbf16> to vector<32x16xbf16>
    %cst_200 = arith.constant dense<0.000000e+00> : vector<2x16xf32>
    %565 = tpu.matmul %562, %564, %cst_200 {dimension_numbers = #tpu.dot_dimension_numbers<[1], [0], [0], [1], [0, 0, 1, 1], [], []>} : vector<2x32xbf16>, vector<32x16xbf16>, vector<2x16xf32> -> vector<2x16xf32>
    %566 = arith.addf %559, %565 : vector<2x16xf32>
    %567 = vector.extract_strided_slice %558 {offsets = [0, 1, 0], sizes = [2, 1, 32], strides = [1, 1, 1]} : vector<2x8x32xf32> to vector<2x1x32xf32>
    %568 = vector.shape_cast %567 : vector<2x1x32xf32> to vector<2x32xf32>
    %569 = arith.truncf %568 : vector<2x32xf32> to vector<2x32xbf16>
    %c1 = arith.constant 1 : index
    %c0_201 = arith.constant 0 : index
    %c0_202 = arith.constant 0 : index
    %570 = vector.load %arg43[%c1, %c0_201, %c0_202] : memref<8x32x16xbf16, #tpu.memory_space<vmem>>, vector<1x32x16xbf16>
    %571 = vector.shape_cast %570 : vector<1x32x16xbf16> to vector<32x16xbf16>
    %cst_203 = arith.constant dense<0.000000e+00> : vector<2x16xf32>
    %572 = tpu.matmul %569, %571, %cst_203 {dimension_numbers = #tpu.dot_dimension_numbers<[1], [0], [0], [1], [0, 0, 1, 1], [], []>} : vector<2x32xbf16>, vector<32x16xbf16>, vector<2x16xf32> -> vector<2x16xf32>
    %573 = arith.addf %566, %572 : vector<2x16xf32>
    %574 = vector.extract_strided_slice %558 {offsets = [0, 2, 0], sizes = [2, 1, 32], strides = [1, 1, 1]} : vector<2x8x32xf32> to vector<2x1x32xf32>
    %575 = vector.shape_cast %574 : vector<2x1x32xf32> to vector<2x32xf32>
    %576 = arith.truncf %575 : vector<2x32xf32> to vector<2x32xbf16>
    %c2 = arith.constant 2 : index
    %c0_204 = arith.constant 0 : index
    %c0_205 = arith.constant 0 : index
    %577 = vector.load %arg43[%c2, %c0_204, %c0_205] : memref<8x32x16xbf16, #tpu.memory_space<vmem>>, vector<1x32x16xbf16>
    %578 = vector.shape_cast %577 : vector<1x32x16xbf16> to vector<32x16xbf16>
    %cst_206 = arith.constant dense<0.000000e+00> : vector<2x16xf32>
    %579 = tpu.matmul %576, %578, %cst_206 {dimension_numbers = #tpu.dot_dimension_numbers<[1], [0], [0], [1], [0, 0, 1, 1], [], []>} : vector<2x32xbf16>, vector<32x16xbf16>, vector<2x16xf32> -> vector<2x16xf32>
    %580 = arith.addf %573, %579 : vector<2x16xf32>
    %581 = vector.extract_strided_slice %558 {offsets = [0, 3, 0], sizes = [2, 1, 32], strides = [1, 1, 1]} : vector<2x8x32xf32> to vector<2x1x32xf32>
    %582 = vector.shape_cast %581 : vector<2x1x32xf32> to vector<2x32xf32>
    %583 = arith.truncf %582 : vector<2x32xf32> to vector<2x32xbf16>
    %c3 = arith.constant 3 : index
    %c0_207 = arith.constant 0 : index
    %c0_208 = arith.constant 0 : index
    %584 = vector.load %arg43[%c3, %c0_207, %c0_208] : memref<8x32x16xbf16, #tpu.memory_space<vmem>>, vector<1x32x16xbf16>
    %585 = vector.shape_cast %584 : vector<1x32x16xbf16> to vector<32x16xbf16>
    %cst_209 = arith.constant dense<0.000000e+00> : vector<2x16xf32>
    %586 = tpu.matmul %583, %585, %cst_209 {dimension_numbers = #tpu.dot_dimension_numbers<[1], [0], [0], [1], [0, 0, 1, 1], [], []>} : vector<2x32xbf16>, vector<32x16xbf16>, vector<2x16xf32> -> vector<2x16xf32>
    %587 = arith.addf %580, %586 : vector<2x16xf32>
    %588 = vector.extract_strided_slice %558 {offsets = [0, 4, 0], sizes = [2, 1, 32], strides = [1, 1, 1]} : vector<2x8x32xf32> to vector<2x1x32xf32>
    %589 = vector.shape_cast %588 : vector<2x1x32xf32> to vector<2x32xf32>
    %590 = arith.truncf %589 : vector<2x32xf32> to vector<2x32xbf16>
    %c4 = arith.constant 4 : index
    %c0_210 = arith.constant 0 : index
    %c0_211 = arith.constant 0 : index
    %591 = vector.load %arg43[%c4, %c0_210, %c0_211] : memref<8x32x16xbf16, #tpu.memory_space<vmem>>, vector<1x32x16xbf16>
    %592 = vector.shape_cast %591 : vector<1x32x16xbf16> to vector<32x16xbf16>
    %cst_212 = arith.constant dense<0.000000e+00> : vector<2x16xf32>
    %593 = tpu.matmul %590, %592, %cst_212 {dimension_numbers = #tpu.dot_dimension_numbers<[1], [0], [0], [1], [0, 0, 1, 1], [], []>} : vector<2x32xbf16>, vector<32x16xbf16>, vector<2x16xf32> -> vector<2x16xf32>
    %594 = arith.addf %587, %593 : vector<2x16xf32>
    %595 = vector.extract_strided_slice %558 {offsets = [0, 5, 0], sizes = [2, 1, 32], strides = [1, 1, 1]} : vector<2x8x32xf32> to vector<2x1x32xf32>
    %596 = vector.shape_cast %595 : vector<2x1x32xf32> to vector<2x32xf32>
    %597 = arith.truncf %596 : vector<2x32xf32> to vector<2x32xbf16>
    %c5 = arith.constant 5 : index
    %c0_213 = arith.constant 0 : index
    %c0_214 = arith.constant 0 : index
    %598 = vector.load %arg43[%c5, %c0_213, %c0_214] : memref<8x32x16xbf16, #tpu.memory_space<vmem>>, vector<1x32x16xbf16>
    %599 = vector.shape_cast %598 : vector<1x32x16xbf16> to vector<32x16xbf16>
    %cst_215 = arith.constant dense<0.000000e+00> : vector<2x16xf32>
    %600 = tpu.matmul %597, %599, %cst_215 {dimension_numbers = #tpu.dot_dimension_numbers<[1], [0], [0], [1], [0, 0, 1, 1], [], []>} : vector<2x32xbf16>, vector<32x16xbf16>, vector<2x16xf32> -> vector<2x16xf32>
    %601 = arith.addf %594, %600 : vector<2x16xf32>
    %602 = vector.extract_strided_slice %558 {offsets = [0, 6, 0], sizes = [2, 1, 32], strides = [1, 1, 1]} : vector<2x8x32xf32> to vector<2x1x32xf32>
    %603 = vector.shape_cast %602 : vector<2x1x32xf32> to vector<2x32xf32>
    %604 = arith.truncf %603 : vector<2x32xf32> to vector<2x32xbf16>
    %c6 = arith.constant 6 : index
    %c0_216 = arith.constant 0 : index
    %c0_217 = arith.constant 0 : index
    %605 = vector.load %arg43[%c6, %c0_216, %c0_217] : memref<8x32x16xbf16, #tpu.memory_space<vmem>>, vector<1x32x16xbf16>
    %606 = vector.shape_cast %605 : vector<1x32x16xbf16> to vector<32x16xbf16>
    %cst_218 = arith.constant dense<0.000000e+00> : vector<2x16xf32>
    %607 = tpu.matmul %604, %606, %cst_218 {dimension_numbers = #tpu.dot_dimension_numbers<[1], [0], [0], [1], [0, 0, 1, 1], [], []>} : vector<2x32xbf16>, vector<32x16xbf16>, vector<2x16xf32> -> vector<2x16xf32>
    %608 = arith.addf %601, %607 : vector<2x16xf32>
    %609 = vector.extract_strided_slice %558 {offsets = [0, 7, 0], sizes = [2, 1, 32], strides = [1, 1, 1]} : vector<2x8x32xf32> to vector<2x1x32xf32>
    %610 = vector.shape_cast %609 : vector<2x1x32xf32> to vector<2x32xf32>
    %611 = arith.truncf %610 : vector<2x32xf32> to vector<2x32xbf16>
    %c7 = arith.constant 7 : index
    %c0_219 = arith.constant 0 : index
    %c0_220 = arith.constant 0 : index
    %612 = vector.load %arg43[%c7, %c0_219, %c0_220] : memref<8x32x16xbf16, #tpu.memory_space<vmem>>, vector<1x32x16xbf16>
    %613 = vector.shape_cast %612 : vector<1x32x16xbf16> to vector<32x16xbf16>
    %cst_221 = arith.constant dense<0.000000e+00> : vector<2x16xf32>
    %614 = tpu.matmul %611, %613, %cst_221 {dimension_numbers = #tpu.dot_dimension_numbers<[1], [0], [0], [1], [0, 0, 1, 1], [], []>} : vector<2x32xbf16>, vector<32x16xbf16>, vector<2x16xf32> -> vector<2x16xf32>
    %615 = arith.addf %608, %614 : vector<2x16xf32>
    %c0_222 = arith.constant 0 : index
    %c0_223 = arith.constant 0 : index
    %616 = vector.load %arg41[%c0_222, %c0_223] : memref<1x16xf32, #tpu.memory_space<vmem>>, vector<1x16xf32>
    %617 = vector.broadcast %616 : vector<1x16xf32> to vector<2x16xf32>
    %618 = arith.addf %615, %617 : vector<2x16xf32>
    %c0_224 = arith.constant 0 : index
    %c0_225 = arith.constant 0 : index
    %619 = vector.load %arg42[%c0_224, %c0_225] : memref<2x16xf32, #tpu.memory_space<vmem>>, vector<2x16xf32>
    tpu.vector_store %arg42[%c0_224, %c0_225], %618 {strides = array<i32>} : memref<2x16xf32, #tpu.memory_space<vmem>>, vector<2x16xf32>,
    return
  }
}

</mosaic_0001>

<bundles_post_ra>
// kernel: my_model_forward.1
= control target key start
LH: loop header
LB: loop body
LE: loop exit
PB: predicated region body
PF: predicated region fallthrough
CT: control target
= control target key end

     0   :  { %s7792_s6 = smov 1   ;;  %s7793_s10 = smov 2   ;;  %s9113_s0 = inlined_call_operand.smem [shape: u32[43], index: -1, kind: input, shape index: {}] }
   0x1   :  { %s7900_s5 = sld [smem:[%s9113_s0]]   ;;  %s7794_s14 = smov 3  }
   0x2   :  { %s7905_s9 = sld [smem:[%s9113_s0 + %s7792_s6]]   ;;  %s7795_s18 = smov 4  }
   0x3   :  { %s7910_s13 = sld [smem:[%s9113_s0 + %s7793_s10]]   ;;  %s7796_s22 = smov 5  }
   0x4   :  { %s7915_s17 = sld [smem:[%s9113_s0 + %s7794_s14]]   ;;  %s7797_s26 = smov 6  }
   0x5   :  { %s7920_s21 = sld [smem:[%s9113_s0 + %s7795_s18]]   ;;  %s7798_s30 = smov 7  }
   0x6   :  { %s7925_s25 = sld [smem:[%s9113_s0 + %s7796_s22]]   ;;  %s7799_s4 = smov 8  }
   0x7   :  { %9139 = sst [smem:[#allocation95_spill]] %s7900_s5  ;;  %s7800_s10 = smov 9  }
   0x8   :  { %s7930_s29 = sld [smem:[%s9113_s0 + %s7797_s26]]   ;;  %s7801_s15 = smov 10  }
   0x9   :  { %9140 = sst [smem:[#allocation96_spill]] %s7910_s13  ;;  %s7802_s20 = smov 11  }
   0xa   :  { %s7935_s3 = sld [smem:[%s9113_s0 + %s7798_s30]]   ;;  %s7803_s26 = smov 12  }
   0xb   :  { %9141 = sst [smem:[#allocation97_spill]] %s7920_s21  ;;  %s7804_s1 = smov 13  }
   0xc   :  { %s7940_s8 = sld [smem:[%s9113_s0 + %s7799_s4]]   ;;  %s7805_s7 = smov 14  }
   0xd   :  { %s7945_s14 = sld [smem:[%s9113_s0 + %s7800_s10]]   ;;  %s7807_s22 = smov 16  }
   0xe   :  { %9142 = sst [smem:[#allocation98_spill]] %s7930_s29  ;;  %s7808_s28 = smov 17  }
   0xf   :  { %s7950_s19 = sld [smem:[%s9113_s0 + %s7801_s15]]   ;;  %s7806_s15 = smov 15  }
  0x10   :  { %s7955_s24 = sld [smem:[%s9113_s0 + %s7802_s20]]  }
  0x11   :  { %s7960_s30 = sld [smem:[%s9113_s0 + %s7803_s26]]  }
  0x12   :  { %9143 = sst [smem:[#allocation99_spill]] %s7940_s8 }
  0x13   :  { %s7965_s6 = sld [smem:[%s9113_s0 + %s7804_s1]]  }
  0x14   :  { %s7970_s12 = sld [smem:[%s9113_s0 + %s7805_s7]]   ;;  %s7809_s7 = smov 18  }
  0x15   :  { %9144 = sst [smem:[#allocation100_spill]] %s7950_s19 }
  0x16   :  { %s7975_s20 = sld [smem:[%s9113_s0 + %s7806_s15]]   ;;  %s7810_s15 = smov 19  }
  0x17   :  { %9145 = sst [smem:[#allocation101_spill]] %s7960_s30 }
  0x18   :  { %s7980_s27 = sld [smem:[%s9113_s0 + %s7807_s22]]   ;;  %s7811_s22 = smov 20  }
  0x19   :  { %s7985_s4 = sld [smem:[%s9113_s0 + %s7808_s28]]   ;;  %s7812_s28 = smov 21  }
  0x1a   :  { %9146 = sst [smem:[#allocation102_spill]] %s7970_s12 }
  0x1b   :  { %s7990_s12 = sld [smem:[%s9113_s0 + %s7809_s7]]   ;;  %s7813_s7 = smov 22  }
  0x1c   :  { %s7995_s30 = sld [smem:[%s9113_s0 + %s7810_s15]]   ;;  %s7814_s15 = smov 23  }
  0x1d   :  { %s8005_s19 = sld [smem:[%s9113_s0 + %s7812_s28]]   ;;  %s7816_s28 = smov 25  }
  0x1e   :  { %9147 = sst [smem:[#allocation103_spill]] %s7980_s27 }
  0x1f   :  { %s8000_s27 = sld [smem:[%s9113_s0 + %s7811_s22]]   ;;  %s7815_s22 = smov 24  }
  0x20   :  { %s8015_s8 = sld [smem:[%s9113_s0 + %s7814_s15]]   ;;  %s7818_s15 = smov 27  }
  0x21   :  { %9148 = sst [smem:[#allocation104_spill]] %s7990_s12 }
  0x22   :  { %s8010_s12 = sld [smem:[%s9113_s0 + %s7813_s7]]   ;;  %s7817_s7 = smov 26  }
  0x23   :  { %s8025_s29 = sld [smem:[%s9113_s0 + %s7816_s28]]   ;;  %s7820_s28 = smov 29  }
  0x24   :  { %s8035_s21 = sld [smem:[%s9113_s0 + %s7818_s15]]   ;;  %s7822_s15 = smov 31  }
  0x25   :  { %9149 = sst [smem:[#allocation105_spill]] %s8000_s27 }
  0x26   :  { %s8020_s27 = sld [smem:[%s9113_s0 + %s7815_s22]]   ;;  %s7819_s22 = smov 28  }
  0x27   :  { %s8045_s13 = sld [smem:[%s9113_s0 + %s7820_s28]]   ;;  %s7824_s28 = smov 33  }
  0x28   :  { %9150 = sst [smem:[#allocation106_spill]] %s8010_s12 }
  0x29   :  { %s8030_s12 = sld [smem:[%s9113_s0 + %s7817_s7]]   ;;  %s7821_s7 = smov 30  }
  0x2a   :  { %s8055_s5 = sld [smem:[%s9113_s0 + %s7822_s15]]   ;;  %s7826_s15 = smov 35  }
  0x2c   :  { %9151 = sst [smem:[#allocation107_spill]] %s8020_s27 }
  0x2d   :  { %s8040_s27 = sld [smem:[%s9113_s0 + %s7819_s22]]   ;;  %s7823_s22 = smov 32  }
  0x2e   :  { %9154 = sst [smem:[#allocation110_spill]] %s8045_s13 }
  0x2f   :  { %9152 = sst [smem:[#allocation108_spill]] %s8030_s12 }
  0x30   :  { %s8050_s12 = sld [smem:[%s9113_s0 + %s7821_s7]]   ;;  %s7825_s7 = smov 34  }
  0x31   :  { %9156 = sst [smem:[#allocation112_spill]] %s8055_s5 }
  0x32   :  { %s8065_s13 = sld [smem:[%s9113_s0 + %s7824_s28]]   ;;  %s7828_s28 = smov 37  }
  0x33   :  { %9153 = sst [smem:[#allocation109_spill]] %s8040_s27 }
  0x34   :  { %s8060_s27 = sld [smem:[%s9113_s0 + %s7823_s22]]   ;;  %s7827_s22 = smov 36  }
  0x35   :  { %s8075_s5 = sld [smem:[%s9113_s0 + %s7826_s15]]   ;;  %s7830_s15 = smov 39  }
  0x36   :  { %9155 = sst [smem:[#allocation111_spill]] %s8050_s12 }
  0x37   :  { %s8070_s12 = sld [smem:[%s9113_s0 + %s7825_s7]]   ;;  %s7829_s7 = smov 38  }
  0x38   :  { %9158 = sst [smem:[#allocation114_spill]] %s8065_s13 }
  0x39   :  { %s8085_s13 = sld [smem:[%s9113_s0 + %s7828_s28]]   ;;  %s7832_s28 = smov 41  }
  0x3a   :  { %9157 = sst [smem:[#allocation113_spill]] %s8060_s27 }
  0x3b   :  { %9160 = sst [smem:[#allocation116_spill]] %s8075_s5 }
  0x3c   :  { %s8080_s27 = sld [smem:[%s9113_s0 + %s7827_s22]]   ;;  %s7831_s22 = smov 40  }
  0x3d   :  { %9159 = sst [smem:[#allocation115_spill]] %s8070_s12 }
  0x3e   :  { %s8090_s12 = sld [smem:[%s9113_s0 + %s7829_s7]]   ;;  %s7833_s7 = smov 42  }
  0x3f   :  { %9162 = sst [smem:[#allocation118_spill]] %s8085_s13 }
  0x40   :  { %s8095_s5 = sld [smem:[%s9113_s0 + %s7830_s15]]  }
  0x41   :  { %s8105_s13 = sld [smem:[%s9113_s0 + %s7832_s28]]  }
  0x42   :  { %9161 = sst [smem:[#allocation117_spill]] %s8080_s27 }
  0x43   :  { %s8100_s27 = sld [smem:[%s9113_s0 + %s7831_s22]]  }
  0x44   :  { %9163 = sst [smem:[#allocation119_spill]] %s8090_s12 }
  0x45   :  { %s8110_s12 = sld [smem:[%s9113_s0 + %s7833_s7]]  }
  0x46   :  { %90 = vsyncpa [#allocation5], 0 }
  0x47   :  { %91 = vsyncpa [#allocation8], 0 }
  0x48   :  { %92 = vsyncpa [#allocation11], 0 }
  0x49   :  { %93 = vsyncpa [#allocation14], 0 }
  0x4a   :  { %94 = vsyncpa [#allocation17], 0 }
  0x4b   :  { %95 = vsyncpa [#allocation20], 0 }
  0x4c   :  { %96 = vsyncpa [#allocation23], 0 }
  0x4d   :  { %97 = vsyncpa [#allocation26], 0 }
  0x4e   :  { %98 = vsyncpa [#allocation29], 0 }
  0x4f   :  { %99 = vsyncpa [#allocation32], 0 }
  0x50   :  { %100 = vsyncpa [#allocation35], 0 }
  0x51   :  { %101 = vsyncpa [#allocation38], 0 }
  0x52   :  { %102 = vsyncpa [#allocation41], 0 }
  0x53   :  { %103 = vsyncpa [#allocation44], 0 }
  0x54   :  { %104 = vsyncpa [#allocation47], 0 }
  0x55   :  { %105 = vsyncpa [#allocation50], 0 }
  0x56   :  { %106 = vsyncpa [#allocation53], 0 }
  0x57   :  { %107 = vsyncpa [#allocation56], 0 }
  0x58   :  { %108 = vsyncpa [#allocation59], 0 }
  0x59   :  { %109 = vsyncpa [#allocation62], 0 }
  0x5a   :  { %110 = vsyncpa [#allocation65], 0 }
  0x5b   :  { %111 = vsyncpa [#allocation6], 0  ;;  %s7834_s0 = smov [#allocation7]   ;;  %s7835_s16 = smov [#allocation10]  }
  0x5c   :  { %s129_s15 = sshll.u32 %s7834_s0, 4  ;;  %s153_s18 = sshll.u32 %s7835_s16, 4  ;;  %s130_s15 = int_to_ptr.vmem [resolvable:$true] %s129_s15  ;;  %s8112_s18 = int_to_ptr.vmem [resolvable:$true] %s153_s18 }
  0x5d   :  { %s6800_s22 = scalar_lea.hbm %s7905_s9, 256 }
  0x5e   :  { %p6801_p0 = scmp.ne.s32.totalorder %s7905_s9, %s6800_s22  ;;  %p6804_p1 = scmp.lt.u32.totalorder %s6800_s22, %s7905_s9 }
  0x60   :  { %p6806_p2 = pnand %p6804_p1, %p6801_p0 }
  0x62   :  { %6809 = shalt.err (!%p6806_p2)
}
  0x63   :  { %s6810_s23 = scalar_lea.vmem %s130_s15, 256  ;;  %p6815_p4 = scmp.lt.s32.totalorder %s130_s15, %s130_s15 }
  0x64   :  { %p6811_p3 = scmp.ne.s32.totalorder %s130_s15, %s6810_s23  ;;  %p6816_p5 = scmp.lt.s32.totalorder %s6810_s23, %s6810_s23 }
  0x66   :  { %p6817_p6 = por %p6816_p5, %p6815_p4 }
  0x68   :  { %p6818_p7 = pnand %p6817_p6, %p6811_p3 }
  0x6a   :  { %6821 = shalt.err (!%p6818_p7)
}
  0x6b   :  { %s7836_s26 = smov 128   ;;  %s7837_s28 = smov 8  }
  0x6c   :  { %135 = dma.hbm_to_vmem [thread:$0]  %s7905_s9, 256, %s130_s15, [#allocation8], %s7836_s26, %s7836_s26, %s7837_s28  }
  0x6d   :  { %s6822_s1 = scalar_lea.hbm %s7915_s17, 256 }
  0x6e   :  { %p6823_p8 = scmp.ne.s32.totalorder %s7915_s17, %s6822_s1  ;;  %p6826_p9 = scmp.lt.u32.totalorder %s6822_s1, %s7915_s17 }
  0x70   :  { %p6828_p10 = pnand %p6826_p9, %p6823_p8 }
  0x72   :  { %6831 = shalt.err (!%p6828_p10)
}
  0x73   :  { %s6832_s2 = scalar_lea.vmem %s8112_s18, 256  ;;  %p6837_p12 = scmp.lt.s32.totalorder %s8112_s18, %s8112_s18 }
  0x74   :  { %p6833_p11 = scmp.ne.s32.totalorder %s8112_s18, %s6832_s2  ;;  %p6838_p13 = scmp.lt.s32.totalorder %s6832_s2, %s6832_s2 }
  0x76   :  { %p6839_p0 = por %p6838_p13, %p6837_p12 }
  0x78   :  { %p6840_p1 = pnand %p6839_p0, %p6833_p11 }
  0x7a   :  { %6843 = shalt.err (!%p6840_p1)
}
  0x7b   :  { %159 = dma.hbm_to_vmem [thread:$0]  %s7915_s17, 256, %s8112_s18, [#allocation11], %s7836_s26, %s7836_s26, %s7837_s28  }
  0x7c   :  { %s7838_s9 = smov [#allocation13]   ;;  %s7839_s10 = smov [#allocation16]  }
  0x7d   :  { %s178_s7 = sshll.u32 %s7838_s9, 4  ;;  %s200_s11 = sshll.u32 %s7839_s10, 4  ;;  %s179_s7 = int_to_ptr.vmem [resolvable:$true] %s178_s7  ;;  %s201_s11 = int_to_ptr.vmem [resolvable:$true] %s200_s11 }
  0x7e   :  { %s6844_s0 = scalar_lea.hbm %s7925_s25, 128 }
  0x7f   :  { %p6845_p2 = scmp.ne.s32.totalorder %s7925_s25, %s6844_s0  ;;  %p6848_p3 = scmp.lt.u32.totalorder %s6844_s0, %s7925_s25 }
  0x81   :  { %p6850_p4 = pnand %p6848_p3, %p6845_p2 }
  0x83   :  { %6853 = shalt.err (!%p6850_p4)
}
  0x84   :  { %s6854_s15 = scalar_lea.vmem %s179_s7, 128  ;;  %p6859_p6 = scmp.lt.s32.totalorder %s179_s7, %s179_s7 }
  0x85   :  { %p6855_p5 = scmp.ne.s32.totalorder %s179_s7, %s6854_s15  ;;  %p6860_p7 = scmp.lt.s32.totalorder %s6854_s15, %s6854_s15 }
  0x87   :  { %p6861_p8 = por %p6860_p7, %p6859_p6 }
  0x89   :  { %p6862_p9 = pnand %p6861_p8, %p6855_p5 }
  0x8b   :  { %6865 = shalt.err (!%p6862_p9)
}
  0x8c   :  { %181 = dma.hbm_to_vmem [thread:$0]  %s7925_s25, 128, %s179_s7, [#allocation14]  }
  0x8d   :  { %s6866_s17 = scalar_lea.hbm %s7935_s3, 16 }
  0x8e   :  { %p6867_p10 = scmp.ne.s32.totalorder %s7935_s3, %s6866_s17  ;;  %p6870_p11 = scmp.lt.u32.totalorder %s6866_s17, %s7935_s3 }
  0x90   :  { %p6872_p12 = pnand %p6870_p11, %p6867_p10 }
  0x92   :  { %6875 = shalt.err (!%p6872_p12)
}
  0x93   :  { %s6876_s16 = scalar_lea.vmem %s201_s11, 16  ;;  %s6880_s18 = scalar_lea.vmem %s201_s11, 32 }
  0x94   :  { %p6877_p13 = scmp.ne.s32.totalorder %s201_s11, %s6876_s16  ;;  %p6881_p0 = scmp.lt.s32.totalorder %s201_s11, %s201_s11 }
  0x95   :  { %p6882_p1 = scmp.lt.s32.totalorder %s6880_s18, %s6876_s16 }
  0x97   :  { %p6883_p2 = por %p6882_p1, %p6881_p0 }
  0x99   :  { %p6884_p3 = pnand %p6883_p2, %p6877_p13 }
  0x9b   :  { %6887 = shalt.err (!%p6884_p3)
}
  0x9c   :  { %203 = dma.hbm_to_vmem [thread:$0]  %s7935_s3, 16, %s201_s11, [#allocation17]  }
  0x9d   :  { %s7840_s22 = smov [#allocation19]   ;;  %s7841_s23 = smov [#allocation22]  }
  0x9e   :  { %s220_s25 = sshll.u32 %s7840_s22, 4  ;;  %s242_s1 = sshll.u32 %s7841_s23, 4  ;;  %s221_s25 = int_to_ptr.vmem [resolvable:$true] %s220_s25  ;;  %s243_s1 = int_to_ptr.vmem [resolvable:$true] %s242_s1 }
  0x9f   :  { %s6888_s2 = scalar_lea.hbm %s7945_s14, 16 }
  0xa0   :  { %p6889_p4 = scmp.ne.s32.totalorder %s7945_s14, %s6888_s2  ;;  %p6892_p5 = scmp.lt.u32.totalorder %s6888_s2, %s7945_s14 }
  0xa2   :  { %p6894_p6 = pnand %p6892_p5, %p6889_p4 }
  0xa4   :  { %6897 = shalt.err (!%p6894_p6)
}
  0xa5   :  { %s6898_s9 = scalar_lea.vmem %s221_s25, 16  ;;  %s6902_s7 = scalar_lea.vmem %s221_s25, 32 }
  0xa6   :  { %p6899_p7 = scmp.ne.s32.totalorder %s221_s25, %s6898_s9  ;;  %p6903_p8 = scmp.lt.s32.totalorder %s221_s25, %s221_s25 }
  0xa7   :  { %p6904_p9 = scmp.lt.s32.totalorder %s6902_s7, %s6898_s9 }
  0xa9   :  { %p6905_p10 = por %p6904_p9, %p6903_p8 }
  0xab   :  { %p6906_p11 = pnand %p6905_p10, %p6899_p7 }
  0xad   :  { %6909 = shalt.err (!%p6906_p11)
}
  0xae   :  { %223 = dma.hbm_to_vmem [thread:$0]  %s7945_s14, 16, %s221_s25, [#allocation20]  }
  0xaf   :  { %s6910_s3 = scalar_lea.hbm %s7955_s24, 48 }
  0xb0   :  { %p6911_p12 = scmp.ne.s32.totalorder %s7955_s24, %s6910_s3  ;;  %p6914_p13 = scmp.lt.u32.totalorder %s6910_s3, %s7955_s24 }
  0xb2   :  { %p6916_p0 = pnand %p6914_p13, %p6911_p12 }
  0xb4   :  { %6919 = shalt.err (!%p6916_p0)
}
  0xb5   :  { %s6920_s10 = scalar_lea.vmem %s243_s1, 48  ;;  %s6924_s11 = scalar_lea.vmem %s243_s1, 64 }
  0xb6   :  { %p6921_p1 = scmp.ne.s32.totalorder %s243_s1, %s6920_s10  ;;  %p6925_p2 = scmp.lt.s32.totalorder %s243_s1, %s243_s1 }
  0xb7   :  { %p6926_p3 = scmp.lt.s32.totalorder %s6924_s11, %s6920_s10 }
  0xb9   :  { %p6927_p4 = por %p6926_p3, %p6925_p2 }
  0xbb   :  { %p6928_p5 = pnand %p6927_p4, %p6921_p1 }
  0xbd   :  { %6931 = shalt.err (!%p6928_p5)
}
  0xbe   :  { %245 = dma.hbm_to_vmem [thread:$0]  %s7955_s24, 48, %s243_s1, [#allocation23]  }
  0xbf   :  { %s7842_s0 = smov [#allocation25]   ;;  %s7843_s15 = smov [#allocation28]  }
  0xc0   :  { %s264_s14 = sshll.u32 %s7842_s0, 4  ;;  %s284_s17 = sshll.u32 %s7843_s15, 4  ;;  %s265_s14 = int_to_ptr.vmem [resolvable:$true] %s264_s14  ;;  %s285_s17 = int_to_ptr.vmem [resolvable:$true] %s284_s17 }
  0xc1   :  { %s6932_s16 = scalar_lea.hbm %s7965_s6, 16 }
  0xc2   :  { %p6933_p6 = scmp.ne.s32.totalorder %s7965_s6, %s6932_s16  ;;  %p6936_p7 = scmp.lt.u32.totalorder %s6932_s16, %s7965_s6 }
  0xc4   :  { %p6938_p8 = pnand %p6936_p7, %p6933_p6 }
  0xc6   :  { %6941 = shalt.err (!%p6938_p8)
}
  0xc7   :  { %s6942_s18 = scalar_lea.vmem %s265_s14, 16  ;;  %s6946_s22 = scalar_lea.vmem %s265_s14, 32 }
  0xc8   :  { %p6943_p9 = scmp.ne.s32.totalorder %s265_s14, %s6942_s18  ;;  %p6947_p10 = scmp.lt.s32.totalorder %s265_s14, %s265_s14 }
  0xc9   :  { %p6948_p11 = scmp.lt.s32.totalorder %s6946_s22, %s6942_s18 }
  0xcb   :  { %p6949_p12 = por %p6948_p11, %p6947_p10 }
  0xcd   :  { %p6950_p13 = pnand %p6949_p12, %p6943_p9 }
  0xcf   :  { %6953 = shalt.err (!%p6950_p13)
}
  0xd0   :  { %267 = dma.hbm_to_vmem [thread:$0]  %s7965_s6, 16, %s265_s14, [#allocation26]  }
  0xd1   :  { %s6954_s24 = scalar_lea.hbm %s7975_s20, 16 }
  0xd2   :  { %p6955_p0 = scmp.ne.s32.totalorder %s7975_s20, %s6954_s24  ;;  %p6958_p1 = scmp.lt.u32.totalorder %s6954_s24, %s7975_s20 }
  0xd4   :  { %p6960_p2 = pnand %p6958_p1, %p6955_p0 }
  0xd6   :  { %6963 = shalt.err (!%p6960_p2)
}
  0xd7   :  { %s6964_s25 = scalar_lea.vmem %s285_s17, 16  ;;  %s6968_s23 = scalar_lea.vmem %s285_s17, 32 }
  0xd8   :  { %p6965_p3 = scmp.ne.s32.totalorder %s285_s17, %s6964_s25  ;;  %p6969_p4 = scmp.lt.s32.totalorder %s285_s17, %s285_s17 }
  0xd9   :  { %p6970_p5 = scmp.lt.s32.totalorder %s6968_s23, %s6964_s25 }
  0xdb   :  { %p6971_p6 = por %p6970_p5, %p6969_p4 }
  0xdd   :  { %p6972_p7 = pnand %p6971_p6, %p6965_p3 }
  0xdf   :  { %6975 = shalt.err (!%p6972_p7)
}
  0xe0   :  { %287 = dma.hbm_to_vmem [thread:$0]  %s7975_s20, 16, %s285_s17, [#allocation29]  }
  0xe1   :  { %s7844_s1 = smov [#allocation31]   ;;  %s7845_s2 = smov [#allocation34]  }
  0xe2   :  { %s306_s6 = sshll.u32 %s7844_s1, 4  ;;  %s326_s9 = sshll.u32 %s7845_s2, 4  ;;  %s307_s6 = int_to_ptr.vmem [resolvable:$true] %s306_s6  ;;  %s327_s9 = int_to_ptr.vmem [resolvable:$true] %s326_s9 }
  0xe3   :  { %s6976_s7 = scalar_lea.hbm %s7985_s4, 16 }
  0xe4   :  { %p6977_p8 = scmp.ne.s32.totalorder %s7985_s4, %s6976_s7  ;;  %p6980_p9 = scmp.lt.u32.totalorder %s6976_s7, %s7985_s4 }
  0xe6   :  { %p6982_p10 = pnand %p6980_p9, %p6977_p8 }
  0xe8   :  { %6985 = shalt.err (!%p6982_p10)
}
  0xe9   :  { %s6986_s3 = scalar_lea.vmem %s307_s6, 16  ;;  %s6990_s10 = scalar_lea.vmem %s307_s6, 32 }
  0xea   :  { %p6987_p11 = scmp.ne.s32.totalorder %s307_s6, %s6986_s3  ;;  %p6991_p12 = scmp.lt.s32.totalorder %s307_s6, %s307_s6 }
  0xeb   :  { %p6992_p13 = scmp.lt.s32.totalorder %s6990_s10, %s6986_s3 }
  0xed   :  { %p6993_p0 = por %p6992_p13, %p6991_p12 }
  0xef   :  { %p6994_p1 = pnand %p6993_p0, %p6987_p11 }
  0xf1   :  { %6997 = shalt.err (!%p6994_p1)
}
  0xf2   :  { %309 = dma.hbm_to_vmem [thread:$0]  %s7985_s4, 16, %s307_s6, [#allocation32]  }
  0xf3   :  { %s6998_s20 = scalar_lea.hbm %s7995_s30, 16 }
  0xf4   :  { %p6999_p2 = scmp.ne.s32.totalorder %s7995_s30, %s6998_s20  ;;  %p7002_p3 = scmp.lt.u32.totalorder %s6998_s20, %s7995_s30 }
  0xf6   :  { %p7004_p4 = pnand %p7002_p3, %p6999_p2 }
  0xf8   :  { %7007 = shalt.err (!%p7004_p4)
}
  0xf9   :  { %s7008_s11 = scalar_lea.vmem %s327_s9, 16  ;;  %s7012_s0 = scalar_lea.vmem %s327_s9, 32 }
  0xfa   :  { %p7009_p5 = scmp.ne.s32.totalorder %s327_s9, %s7008_s11  ;;  %p7013_p6 = scmp.lt.s32.totalorder %s327_s9, %s327_s9 }
  0xfb   :  { %p7014_p7 = scmp.lt.s32.totalorder %s7012_s0, %s7008_s11 }
  0xfd   :  { %p7015_p8 = por %p7014_p7, %p7013_p6 }
  0xff   :  { %p7016_p9 = pnand %p7015_p8, %p7009_p5 }
 0x101   :  { %7019 = shalt.err (!%p7016_p9)
}
 0x102   :  { %329 = dma.hbm_to_vmem [thread:$0]  %s7995_s30, 16, %s327_s9, [#allocation35]  }
 0x103   :  { %s7846_s14 = smov [#allocation37]   ;;  %s7847_s15 = smov [#allocation40]  }
 0x104   :  { %s348_s4 = sshll.u32 %s7846_s14, 4  ;;  %s370_s17 = sshll.u32 %s7847_s15, 4  ;;  %s349_s4 = int_to_ptr.vmem [resolvable:$true] %s348_s4  ;;  %s371_s17 = int_to_ptr.vmem [resolvable:$true] %s370_s17 }
 0x105   :  { %s7020_s16 = scalar_lea.hbm %s8005_s19, 48 }
 0x106   :  { %p7021_p10 = scmp.ne.s32.totalorder %s8005_s19, %s7020_s16  ;;  %p7024_p11 = scmp.lt.u32.totalorder %s7020_s16, %s8005_s19 }
 0x108   :  { %p7026_p12 = pnand %p7024_p11, %p7021_p10 }
 0x10a   :  { %7029 = shalt.err (!%p7026_p12)
}
 0x10b   :  { %s7030_s18 = scalar_lea.vmem %s349_s4, 48  ;;  %s7034_s22 = scalar_lea.vmem %s349_s4, 64 }
 0x10c   :  { %p7031_p13 = scmp.ne.s32.totalorder %s349_s4, %s7030_s18  ;;  %p7035_p0 = scmp.lt.s32.totalorder %s349_s4, %s349_s4 }
 0x10d   :  { %p7036_p1 = scmp.lt.s32.totalorder %s7034_s22, %s7030_s18 }
 0x10f   :  { %p7037_p2 = por %p7036_p1, %p7035_p0 }
 0x111   :  { %p7038_p3 = pnand %p7037_p2, %p7031_p13 }
 0x113   :  { %7041 = shalt.err (!%p7038_p3)
}
 0x114   :  { %351 = dma.hbm_to_vmem [thread:$0]  %s8005_s19, 48, %s349_s4, [#allocation38]  }
 0x115   :  { %s7042_s30 = scalar_lea.hbm %s8015_s8, 16 }
 0x116   :  { %p7043_p4 = scmp.ne.s32.totalorder %s8015_s8, %s7042_s30  ;;  %p7046_p5 = scmp.lt.u32.totalorder %s7042_s30, %s8015_s8 }
 0x118   :  { %p7048_p6 = pnand %p7046_p5, %p7043_p4 }
 0x11a   :  { %7051 = shalt.err (!%p7048_p6)
}
 0x11b   :  { %s7052_s24 = scalar_lea.vmem %s371_s17, 16  ;;  %s7056_s25 = scalar_lea.vmem %s371_s17, 32 }
 0x11c   :  { %p7053_p7 = scmp.ne.s32.totalorder %s371_s17, %s7052_s24  ;;  %p7057_p8 = scmp.lt.s32.totalorder %s371_s17, %s371_s17 }
 0x11d   :  { %p7058_p9 = scmp.lt.s32.totalorder %s7056_s25, %s7052_s24 }
 0x11f   :  { %p7059_p10 = por %p7058_p9, %p7057_p8 }
 0x121   :  { %p7060_p11 = pnand %p7059_p10, %p7053_p7 }
 0x123   :  { %7063 = shalt.err (!%p7060_p11)
}
 0x124   :  { %373 = dma.hbm_to_vmem [thread:$0]  %s8015_s8, 16, %s371_s17, [#allocation41]  }
 0x125   :  { %s7848_s23 = smov [#allocation43]   ;;  %s7849_s1 = smov [#allocation46]  }
 0x126   :  { %s390_s19 = sshll.u32 %s7848_s23, 4  ;;  %s412_s6 = sshll.u32 %s7849_s1, 4  ;;  %s391_s19 = int_to_ptr.vmem [resolvable:$true] %s390_s19  ;;  %s413_s6 = int_to_ptr.vmem [resolvable:$true] %s412_s6 }
 0x127   :  { %s7064_s2 = scalar_lea.hbm %s8025_s29, 16 }
 0x128   :  { %p7065_p12 = scmp.ne.s32.totalorder %s8025_s29, %s7064_s2  ;;  %p7068_p13 = scmp.lt.u32.totalorder %s7064_s2, %s8025_s29 }
 0x12a   :  { %p7070_p0 = pnand %p7068_p13, %p7065_p12 }
 0x12c   :  { %7073 = shalt.err (!%p7070_p0)
}
 0x12d   :  { %s7074_s9 = scalar_lea.vmem %s391_s19, 16  ;;  %s7078_s7 = scalar_lea.vmem %s391_s19, 32 }
 0x12e   :  { %p7075_p1 = scmp.ne.s32.totalorder %s391_s19, %s7074_s9  ;;  %p7079_p2 = scmp.lt.s32.totalorder %s391_s19, %s391_s19 }
 0x12f   :  { %p7080_p3 = scmp.lt.s32.totalorder %s7078_s7, %s7074_s9 }
 0x131   :  { %p7081_p4 = por %p7080_p3, %p7079_p2 }
 0x133   :  { %p7082_p5 = pnand %p7081_p4, %p7075_p1 }
 0x135   :  { %7085 = shalt.err (!%p7082_p5)
}
 0x136   :  { %393 = dma.hbm_to_vmem [thread:$0]  %s8025_s29, 16, %s391_s19, [#allocation44]  }
 0x137   :  { %s7086_s8 = scalar_lea.hbm %s8035_s21, 16 }
 0x138   :  { %p7087_p6 = scmp.ne.s32.totalorder %s8035_s21, %s7086_s8  ;;  %p7090_p7 = scmp.lt.u32.totalorder %s7086_s8, %s8035_s21 }
 0x13a   :  { %p7092_p8 = pnand %p7090_p7, %p7087_p6 }
 0x13c   :  { %7095 = shalt.err (!%p7092_p8)
}
 0x13d   :  { %s7096_s3 = scalar_lea.vmem %s413_s6, 16  ;;  %s7100_s10 = scalar_lea.vmem %s413_s6, 32 }
 0x13e   :  { %p7097_p9 = scmp.ne.s32.totalorder %s413_s6, %s7096_s3  ;;  %p7101_p10 = scmp.lt.s32.totalorder %s413_s6, %s413_s6 }
 0x13f   :  { %p7102_p11 = scmp.lt.s32.totalorder %s7100_s10, %s7096_s3 }
 0x141   :  { %p7103_p12 = por %p7102_p11, %p7101_p10 }
 0x143   :  { %p7104_p13 = pnand %p7103_p12, %p7097_p9 }
 0x145   :  { %7107 = shalt.err (!%p7104_p13)
}
 0x146   :  { %s9164_s20 = sld [smem:[#allocation110_spill]]  ;;  %s7850_s11 = smov [#allocation49]  }
 0x147   :  { %415 = dma.hbm_to_vmem [thread:$0]  %s8035_s21, 16, %s413_s6, [#allocation47]  }
 0x148   :  { %s432_s29 = sshll.u32 %s7850_s11, 4  ;;  %s7851_s0 = smov [#allocation52]   ;;  %s433_s29 = int_to_ptr.vmem [resolvable:$true] %s432_s29 }
 0x149   :  { %s454_s14 = sshll.u32 %s7851_s0, 4  ;;  %s455_s14 = int_to_ptr.vmem [resolvable:$true] %s454_s14 }
 0x14c   :  { %s7108_s4 = scalar_lea.hbm %s9164_s20, 16 }
 0x14d   :  { %p7109_p0 = scmp.ne.s32.totalorder %s9164_s20, %s7108_s4  ;;  %p7112_p1 = scmp.lt.u32.totalorder %s7108_s4, %s9164_s20 }
 0x14f   :  { %p7114_p2 = pnand %p7112_p1, %p7109_p0 }
 0x151   :  { %7117 = shalt.err (!%p7114_p2)
}
 0x152   :  { %s7118_s15 = scalar_lea.vmem %s433_s29, 16  ;;  %s7122_s17 = scalar_lea.vmem %s433_s29, 32 }
 0x153   :  { %p7119_p3 = scmp.ne.s32.totalorder %s433_s29, %s7118_s15  ;;  %p7123_p4 = scmp.lt.s32.totalorder %s433_s29, %s433_s29 }
 0x154   :  { %p7124_p5 = scmp.lt.s32.totalorder %s7122_s17, %s7118_s15 }
 0x156   :  { %p7125_p6 = por %p7124_p5, %p7123_p4 }
 0x158   :  { %p7126_p7 = pnand %p7125_p6, %p7119_p3 }
 0x15a   :  { %7129 = shalt.err (!%p7126_p7)
}
 0x15b   :  { %s9165_s21 = sld [smem:[#allocation112_spill]] }
 0x15c   :  { %435 = dma.hbm_to_vmem [thread:$0]  %s9164_s20, 16, %s433_s29, [#allocation50]  }
 0x161   :  { %s7130_s16 = scalar_lea.hbm %s9165_s21, 48 }
 0x162   :  { %p7131_p8 = scmp.ne.s32.totalorder %s9165_s21, %s7130_s16  ;;  %p7134_p9 = scmp.lt.u32.totalorder %s7130_s16, %s9165_s21 }
 0x164   :  { %p7136_p10 = pnand %p7134_p9, %p7131_p8 }
 0x166   :  { %7139 = shalt.err (!%p7136_p10)
}
 0x167   :  { %s7140_s18 = scalar_lea.vmem %s455_s14, 48  ;;  %s7144_s22 = scalar_lea.vmem %s455_s14, 64 }
 0x168   :  { %p7141_p11 = scmp.ne.s32.totalorder %s455_s14, %s7140_s18  ;;  %p7145_p12 = scmp.lt.s32.totalorder %s455_s14, %s455_s14 }
 0x169   :  { %p7146_p13 = scmp.lt.s32.totalorder %s7144_s22, %s7140_s18 }
 0x16b   :  { %p7147_p0 = por %p7146_p13, %p7145_p12 }
 0x16d   :  { %p7148_p1 = pnand %p7147_p0, %p7141_p11 }
 0x16f   :  { %7151 = shalt.err (!%p7148_p1)
}
 0x170   :  { %s9166_s30 = sld [smem:[#allocation114_spill]]  ;;  %s7852_s24 = smov [#allocation55]  }
 0x171   :  { %457 = dma.hbm_to_vmem [thread:$0]  %s9165_s21, 48, %s455_s14, [#allocation53]  }
 0x172   :  { %s476_s25 = sshll.u32 %s7852_s24, 4  ;;  %s7853_s23 = smov [#allocation58]   ;;  %s477_s25 = int_to_ptr.vmem [resolvable:$true] %s476_s25 }
 0x173   :  { %s496_s19 = sshll.u32 %s7853_s23, 4  ;;  %s497_s19 = int_to_ptr.vmem [resolvable:$true] %s496_s19 }
 0x176   :  { %s7152_s1 = scalar_lea.hbm %s9166_s30, 16 }
 0x177   :  { %p7153_p2 = scmp.ne.s32.totalorder %s9166_s30, %s7152_s1  ;;  %p7156_p3 = scmp.lt.u32.totalorder %s7152_s1, %s9166_s30 }
 0x179   :  { %p7158_p4 = pnand %p7156_p3, %p7153_p2 }
 0x17b   :  { %7161 = shalt.err (!%p7158_p4)
}
 0x17c   :  { %s7162_s6 = scalar_lea.vmem %s477_s25, 16  ;;  %s7166_s2 = scalar_lea.vmem %s477_s25, 32 }
 0x17d   :  { %p7163_p5 = scmp.ne.s32.totalorder %s477_s25, %s7162_s6  ;;  %p7167_p6 = scmp.lt.s32.totalorder %s477_s25, %s477_s25 }
 0x17e   :  { %p7168_p7 = scmp.lt.s32.totalorder %s7166_s2, %s7162_s6 }
 0x180   :  { %p7169_p8 = por %p7168_p7, %p7167_p6 }
 0x182   :  { %p7170_p9 = pnand %p7169_p8, %p7163_p5 }
 0x184   :  { %7173 = shalt.err (!%p7170_p9)
}
 0x185   :  { %s9167_s9 = sld [smem:[#allocation116_spill]] }
 0x186   :  { %479 = dma.hbm_to_vmem [thread:$0]  %s9166_s30, 16, %s477_s25, [#allocation56]  }
 0x18b   :  { %s7174_s7 = scalar_lea.hbm %s9167_s9, 16 }
 0x18c   :  { %p7175_p10 = scmp.ne.s32.totalorder %s9167_s9, %s7174_s7  ;;  %p7178_p11 = scmp.lt.u32.totalorder %s7174_s7, %s9167_s9 }
 0x18e   :  { %p7180_p12 = pnand %p7178_p11, %p7175_p10 }
 0x190   :  { %7183 = shalt.err (!%p7180_p12)
}
 0x191   :  { %s7184_s8 = scalar_lea.vmem %s497_s19, 16  ;;  %s7188_s3 = scalar_lea.vmem %s497_s19, 32 }
 0x192   :  { %p7185_p13 = scmp.ne.s32.totalorder %s497_s19, %s7184_s8  ;;  %p7189_p0 = scmp.lt.s32.totalorder %s497_s19, %s497_s19 }
 0x193   :  { %p7190_p1 = scmp.lt.s32.totalorder %s7188_s3, %s7184_s8 }
 0x195   :  { %p7191_p2 = por %p7190_p1, %p7189_p0 }
 0x197   :  { %p7192_p3 = pnand %p7191_p2, %p7185_p13 }
 0x199   :  { %7195 = shalt.err (!%p7192_p3)
}
 0x19a   :  { %s9168_s10 = sld [smem:[#allocation118_spill]]  ;;  %s7854_s20 = smov [#allocation61]  }
 0x19b   :  { %499 = dma.hbm_to_vmem [thread:$0]  %s9167_s9, 16, %s497_s19, [#allocation59]  }
 0x19c   :  { %s518_s11 = sshll.u32 %s7854_s20, 4  ;;  %s7855_s29 = smov [#allocation64]   ;;  %s519_s11 = int_to_ptr.vmem [resolvable:$true] %s518_s11 }
 0x19d   :  { %s538_s0 = sshll.u32 %s7855_s29, 4  ;;  %s539_s0 = int_to_ptr.vmem [resolvable:$true] %s538_s0 }
 0x1a0   :  { %s7196_s14 = scalar_lea.hbm %s9168_s10, 16 }
 0x1a1   :  { %p7197_p4 = scmp.ne.s32.totalorder %s9168_s10, %s7196_s14  ;;  %p7200_p5 = scmp.lt.u32.totalorder %s7196_s14, %s9168_s10 }
 0x1a3   :  { %p7202_p6 = pnand %p7200_p5, %p7197_p4 }
 0x1a5   :  { %7205 = shalt.err (!%p7202_p6)
}
 0x1a6   :  { %s7206_s4 = scalar_lea.vmem %s519_s11, 16  ;;  %s7210_s15 = scalar_lea.vmem %s519_s11, 32 }
 0x1a7   :  { %p7207_p7 = scmp.ne.s32.totalorder %s519_s11, %s7206_s4  ;;  %p7211_p8 = scmp.lt.s32.totalorder %s519_s11, %s519_s11 }
 0x1a8   :  { %p7212_p9 = scmp.lt.s32.totalorder %s7210_s15, %s7206_s4 }
 0x1aa   :  { %p7213_p10 = por %p7212_p9, %p7211_p8 }
 0x1ac   :  { %p7214_p11 = pnand %p7213_p10, %p7207_p7 }
 0x1ae   :  { %7217 = shalt.err (!%p7214_p11)
}
 0x1af   :  { %521 = dma.hbm_to_vmem [thread:$0]  %s9168_s10, 16, %s519_s11, [#allocation62]  }
 0x1b0   :  { %s7218_s17 = scalar_lea.hbm %s8095_s5, 16 }
 0x1b1   :  { %p7219_p12 = scmp.ne.s32.totalorder %s8095_s5, %s7218_s17  ;;  %p7222_p13 = scmp.lt.u32.totalorder %s7218_s17, %s8095_s5 }
 0x1b3   :  { %p7224_p0 = pnand %p7222_p13, %p7219_p12 }
 0x1b5   :  { %7227 = shalt.err (!%p7224_p0)
}
 0x1b6   :  { %s7228_s21 = scalar_lea.vmem %s539_s0, 16  ;;  %s7232_s16 = scalar_lea.vmem %s539_s0, 32 }
 0x1b7   :  { %p7229_p1 = scmp.ne.s32.totalorder %s539_s0, %s7228_s21  ;;  %p7233_p2 = scmp.lt.s32.totalorder %s539_s0, %s539_s0 }
 0x1b8   :  { %p7234_p3 = scmp.lt.s32.totalorder %s7232_s16, %s7228_s21 }
 0x1ba   :  { %p7235_p4 = por %p7234_p3, %p7233_p2 }
 0x1bc   :  { %p7236_p5 = pnand %p7235_p4, %p7229_p1 }
 0x1be   :  { %7239 = shalt.err (!%p7236_p5)
}
 0x1bf   :  { %s9169_s18 = sld [smem:[#allocation95_spill]]  ;;  %s7856_s22 = smov [#allocation4]  }
 0x1c0   :  { %541 = dma.hbm_to_vmem [thread:$0]  %s8095_s5, 16, %s539_s0, [#allocation65]  }
 0x1c1   :  { %s117_s30 = sshll.u32 %s7856_s22, 4  ;;  %s7857_s24 = smov [#allocation9]   ;;  %s118_s30 = int_to_ptr.vmem [resolvable:$true] %s117_s30 }
 0x1c2   :  { %s141_s25 = sshll.u32 %s7857_s24, 4  ;;  %s8205_s25 = int_to_ptr.vmem [resolvable:$true] %s141_s25 }
 0x1c5   :  { %s7240_s23 = scalar_lea.hbm %s9169_s18, 256 }
 0x1c6   :  { %p7241_p6 = scmp.ne.s32.totalorder %s9169_s18, %s7240_s23  ;;  %p7244_p7 = scmp.lt.u32.totalorder %s7240_s23, %s9169_s18 }
 0x1c8   :  { %p7246_p8 = pnand %p7244_p7, %p7241_p6 }
 0x1ca   :  { %7249 = shalt.err (!%p7246_p8)
}
 0x1cb   :  { %s7250_s19 = scalar_lea.vmem %s118_s30, 256  ;;  %p7255_p10 = scmp.lt.s32.totalorder %s118_s30, %s118_s30 }
 0x1cc   :  { %p7251_p9 = scmp.ne.s32.totalorder %s118_s30, %s7250_s19  ;;  %p7256_p11 = scmp.lt.s32.totalorder %s7250_s19, %s7250_s19 }
 0x1ce   :  { %p7257_p12 = por %p7256_p11, %p7255_p10 }
 0x1d0   :  { %p7258_p13 = pnand %p7257_p12, %p7251_p9 }
 0x1d2   :  { %7261 = shalt.err (!%p7258_p13)
}
 0x1d3   :  { %s9170_s5 = sld [smem:[#allocation96_spill]] }
 0x1d4   :  { %123 = dma.hbm_to_vmem [thread:$0]  %s9169_s18, 256, %s118_s30, [#allocation5], %s7836_s26, %s7836_s26, %s7837_s28  }
 0x1d9   :  { %s7262_s1 = scalar_lea.hbm %s9170_s5, 256 }
 0x1da   :  { %p7263_p0 = scmp.ne.s32.totalorder %s9170_s5, %s7262_s1  ;;  %p7266_p1 = scmp.lt.u32.totalorder %s7262_s1, %s9170_s5 }
 0x1dc   :  { %p7268_p2 = pnand %p7266_p1, %p7263_p0 }
 0x1de   :  { %7271 = shalt.err (!%p7268_p2)
}
 0x1df   :  { %s7272_s6 = scalar_lea.vmem %s8205_s25, 256  ;;  %p7277_p4 = scmp.lt.s32.totalorder %s8205_s25, %s8205_s25 }
 0x1e0   :  { %p7273_p3 = scmp.ne.s32.totalorder %s8205_s25, %s7272_s6  ;;  %p7278_p5 = scmp.lt.s32.totalorder %s7272_s6, %s7272_s6 }
 0x1e2   :  { %p7279_p6 = por %p7278_p5, %p7277_p4 }
 0x1e4   :  { %p7280_p7 = pnand %p7279_p6, %p7273_p3 }
 0x1e6   :  { %7283 = shalt.err (!%p7280_p7)
}
 0x1e7   :  { %s9171_s2 = sld [smem:[#allocation97_spill]]  ;;  %s7858_s9 = smov [#allocation12]  }
 0x1e8   :  { %147 = dma.hbm_to_vmem [thread:$0]  %s9170_s5, 256, %s8205_s25, [#allocation8], %s7836_s26, %s7836_s26, %s7837_s28  }
 0x1e9   :  { %s165_s7 = sshll.u32 %s7858_s9, 4  ;;  %s7859_s8 = smov [#allocation15]   ;;  %s166_s7 = int_to_ptr.vmem [resolvable:$true] %s165_s7 }
 0x1ea   :  { %s187_s3 = sshll.u32 %s7859_s8, 4  ;;  %s8226_s3 = int_to_ptr.vmem [resolvable:$true] %s187_s3 }
 0x1ed   :  { %s7284_s10 = scalar_lea.hbm %s9171_s2, 256 }
 0x1ee   :  { %p7285_p8 = scmp.ne.s32.totalorder %s9171_s2, %s7284_s10  ;;  %p7288_p9 = scmp.lt.u32.totalorder %s7284_s10, %s9171_s2 }
 0x1f0   :  { %p7290_p10 = pnand %p7288_p9, %p7285_p8 }
 0x1f2   :  { %7293 = shalt.err (!%p7290_p10)
}
 0x1f3   :  { %s7294_s20 = scalar_lea.vmem %s166_s7, 256  ;;  %p7299_p12 = scmp.lt.s32.totalorder %s166_s7, %s166_s7 }
 0x1f4   :  { %p7295_p11 = scmp.ne.s32.totalorder %s166_s7, %s7294_s20  ;;  %p7300_p13 = scmp.lt.s32.totalorder %s7294_s20, %s7294_s20 }
 0x1f6   :  { %p7301_p0 = por %p7300_p13, %p7299_p12 }
 0x1f8   :  { %p7302_p1 = pnand %p7301_p0, %p7295_p11 }
 0x1fa   :  { %7305 = shalt.err (!%p7302_p1)
}
 0x1fb   :  { %s9172_s11 = sld [smem:[#allocation98_spill]] }
 0x1fc   :  { %171 = dma.hbm_to_vmem [thread:$0]  %s9171_s2, 256, %s166_s7, [#allocation11], %s7836_s26, %s7836_s26, %s7837_s28  }
 0x201   :  { %s7306_s29 = scalar_lea.hbm %s9172_s11, 512 }
 0x202   :  { %p7307_p2 = scmp.ne.s32.totalorder %s9172_s11, %s7306_s29  ;;  %p7310_p3 = scmp.lt.u32.totalorder %s7306_s29, %s9172_s11 }
 0x204   :  { %p7312_p4 = pnand %p7310_p3, %p7307_p2 }
 0x206   :  { %7315 = shalt.err (!%p7312_p4)
}
 0x207   :  { %s7316_s0 = scalar_lea.vmem %s8226_s3, 512  ;;  %p7321_p6 = scmp.lt.s32.totalorder %s8226_s3, %s8226_s3 }
 0x208   :  { %p7317_p5 = scmp.ne.s32.totalorder %s8226_s3, %s7316_s0  ;;  %p7322_p7 = scmp.lt.s32.totalorder %s7316_s0, %s7316_s0 }
 0x20a   :  { %p7323_p8 = por %p7322_p7, %p7321_p6 }
 0x20c   :  { %p7324_p9 = pnand %p7323_p8, %p7317_p5 }
 0x20e   :  { %7327 = shalt.err (!%p7324_p9)
}
 0x20f   :  { %s7860_s14 = smov 64   ;;  %s9173_s26 = sld [smem:[#allocation99_spill]] }
 0x210   :  { %s7861_s28 = smov 4   ;;  %s7862_s4 = smov [#allocation18]  }
 0x211   :  { %193 = dma.hbm_to_vmem [thread:$0]  %s9172_s11, 512, %s8226_s3, [#allocation14], %s7860_s14, %s7860_s14, %s7861_s28  }
 0x212   :  { %s210_s15 = sshll.u32 %s7862_s4, 4  ;;  %s7863_s17 = smov [#allocation21]   ;;  %s211_s15 = int_to_ptr.vmem [resolvable:$true] %s210_s15 }
 0x213   :  { %s229_s21 = sshll.u32 %s7863_s17, 4  ;;  %s8247_s21 = int_to_ptr.vmem [resolvable:$true] %s229_s21 }
 0x215   :  { %s7328_s16 = scalar_lea.hbm %s9173_s26, 16 }
 0x216   :  { %p7329_p10 = scmp.ne.s32.totalorder %s9173_s26, %s7328_s16  ;;  %p7332_p11 = scmp.lt.u32.totalorder %s7328_s16, %s9173_s26 }
 0x218   :  { %p7334_p12 = pnand %p7332_p11, %p7329_p10 }
 0x21a   :  { %7337 = shalt.err (!%p7334_p12)
}
 0x21b   :  { %s7338_s18 = scalar_lea.vmem %s211_s15, 16  ;;  %s7342_s22 = scalar_lea.vmem %s211_s15, 32 }
 0x21c   :  { %p7339_p13 = scmp.ne.s32.totalorder %s211_s15, %s7338_s18  ;;  %p7343_p0 = scmp.lt.s32.totalorder %s211_s15, %s211_s15 }
 0x21d   :  { %p7344_p1 = scmp.lt.s32.totalorder %s7342_s22, %s7338_s18 }
 0x21f   :  { %p7345_p2 = por %p7344_p1, %p7343_p0 }
 0x221   :  { %p7346_p3 = pnand %p7345_p2, %p7339_p13 }
 0x223   :  { %7349 = shalt.err (!%p7346_p3)
}
 0x224   :  { %s9174_s30 = sld [smem:[#allocation100_spill]] }
 0x225   :  { %213 = dma.hbm_to_vmem [thread:$0]  %s9173_s26, 16, %s211_s15, [#allocation17]  }
 0x22a   :  { %s7350_s24 = scalar_lea.hbm %s9174_s30, 768 }
 0x22b   :  { %p7351_p4 = scmp.ne.s32.totalorder %s9174_s30, %s7350_s24  ;;  %p7354_p5 = scmp.lt.u32.totalorder %s7350_s24, %s9174_s30 }
 0x22d   :  { %p7356_p6 = pnand %p7354_p5, %p7351_p4 }
 0x22f   :  { %7359 = shalt.err (!%p7356_p6)
}
 0x230   :  { %s7360_s25 = scalar_lea.vmem %s8247_s21, 768  ;;  %p7365_p8 = scmp.lt.s32.totalorder %s8247_s21, %s8247_s21 }
 0x231   :  { %p7361_p7 = scmp.ne.s32.totalorder %s8247_s21, %s7360_s25  ;;  %p7366_p9 = scmp.lt.s32.totalorder %s7360_s25, %s7360_s25 }
 0x233   :  { %p7367_p10 = por %p7366_p9, %p7365_p8 }
 0x235   :  { %p7368_p11 = pnand %p7367_p10, %p7361_p7 }
 0x237   :  { %7371 = shalt.err (!%p7368_p11)
}
 0x238   :  { %s7864_s23 = smov 192   ;;  %s9175_s19 = sld [smem:[#allocation101_spill]] }
 0x239   :  { %s7865_s5 = smov 12   ;;  %s7866_s1 = smov [#allocation24]  }
 0x23a   :  { %235 = dma.hbm_to_vmem [thread:$0]  %s9174_s30, 768, %s8247_s21, [#allocation20], %s7864_s23, %s7864_s23, %s7865_s5  }
 0x23b   :  { %s251_s6 = sshll.u32 %s7866_s1, 4  ;;  %s7867_s2 = smov [#allocation27]   ;;  %s252_s6 = int_to_ptr.vmem [resolvable:$true] %s251_s6 }
 0x23c   :  { %s274_s9 = sshll.u32 %s7867_s2, 4  ;;  %s275_s9 = int_to_ptr.vmem [resolvable:$true] %s274_s9 }
 0x23e   :  { %s7372_s7 = scalar_lea.hbm %s9175_s19, 1024 }
 0x23f   :  { %p7373_p12 = scmp.ne.s32.totalorder %s9175_s19, %s7372_s7  ;;  %p7376_p13 = scmp.lt.u32.totalorder %s7372_s7, %s9175_s19 }
 0x241   :  { %p7378_p0 = pnand %p7376_p13, %p7373_p12 }
 0x243   :  { %7381 = shalt.err (!%p7378_p0)
}
 0x244   :  { %s7382_s8 = scalar_lea.vmem %s252_s6, 1024  ;;  %p7387_p2 = scmp.lt.s32.totalorder %s252_s6, %s252_s6 }
 0x245   :  { %p7383_p1 = scmp.ne.s32.totalorder %s252_s6, %s7382_s8  ;;  %p7388_p3 = scmp.lt.s32.totalorder %s7382_s8, %s7382_s8 }
 0x247   :  { %p7389_p4 = por %p7388_p3, %p7387_p2 }
 0x249   :  { %p7390_p5 = pnand %p7389_p4, %p7383_p1 }
 0x24b   :  { %7393 = shalt.err (!%p7390_p5)
}
 0x24c   :  { %s9176_s3 = sld [smem:[#allocation102_spill]] }
 0x24d   :  { %257 = dma.hbm_to_vmem [thread:$0]  %s9175_s19, 1024, %s252_s6, [#allocation23], %s7860_s14, %s7860_s14, %s7861_s28  }
 0x252   :  { %s7394_s10 = scalar_lea.hbm %s9176_s3, 16 }
 0x253   :  { %p7395_p6 = scmp.ne.s32.totalorder %s9176_s3, %s7394_s10  ;;  %p7398_p7 = scmp.lt.u32.totalorder %s7394_s10, %s9176_s3 }
 0x255   :  { %p7400_p8 = pnand %p7398_p7, %p7395_p6 }
 0x257   :  { %7403 = shalt.err (!%p7400_p8)
}
 0x258   :  { %s7404_s20 = scalar_lea.vmem %s275_s9, 16  ;;  %s7408_s11 = scalar_lea.vmem %s275_s9, 32 }
 0x259   :  { %p7405_p9 = scmp.ne.s32.totalorder %s275_s9, %s7404_s20  ;;  %p7409_p10 = scmp.lt.s32.totalorder %s275_s9, %s275_s9 }
 0x25a   :  { %p7410_p11 = scmp.lt.s32.totalorder %s7408_s11, %s7404_s20 }
 0x25c   :  { %p7411_p12 = por %p7410_p11, %p7409_p10 }
 0x25e   :  { %p7412_p13 = pnand %p7411_p12, %p7405_p9 }
 0x260   :  { %7415 = shalt.err (!%p7412_p13)
}
 0x261   :  { %s9177_s29 = sld [smem:[#allocation103_spill]]  ;;  %s7868_s0 = smov [#allocation30]  }
 0x262   :  { %277 = dma.hbm_to_vmem [thread:$0]  %s9176_s3, 16, %s275_s9, [#allocation26]  }
 0x263   :  { %s293_s26 = sshll.u32 %s7868_s0, 4  ;;  %s7869_s4 = smov [#allocation33]   ;;  %s294_s26 = int_to_ptr.vmem [resolvable:$true] %s293_s26 }
 0x264   :  { %s316_s15 = sshll.u32 %s7869_s4, 4  ;;  %s317_s15 = int_to_ptr.vmem [resolvable:$true] %s316_s15 }
 0x267   :  { %s7416_s17 = scalar_lea.hbm %s9177_s29, 512 }
 0x268   :  { %p7417_p0 = scmp.ne.s32.totalorder %s9177_s29, %s7416_s17  ;;  %p7420_p1 = scmp.lt.u32.totalorder %s7416_s17, %s9177_s29 }
 0x26a   :  { %p7422_p2 = pnand %p7420_p1, %p7417_p0 }
 0x26c   :  { %7425 = shalt.err (!%p7422_p2)
}
 0x26d   :  { %s7426_s21 = scalar_lea.vmem %s294_s26, 512  ;;  %p7431_p4 = scmp.lt.s32.totalorder %s294_s26, %s294_s26 }
 0x26e   :  { %p7427_p3 = scmp.ne.s32.totalorder %s294_s26, %s7426_s21  ;;  %p7432_p5 = scmp.lt.s32.totalorder %s7426_s21, %s7426_s21 }
 0x270   :  { %p7433_p6 = por %p7432_p5, %p7431_p4 }
 0x272   :  { %p7434_p7 = pnand %p7433_p6, %p7427_p3 }
 0x274   :  { %7437 = shalt.err (!%p7434_p7)
}
 0x275   :  { %s9178_s16 = sld [smem:[#allocation104_spill]] }
 0x276   :  { %299 = dma.hbm_to_vmem [thread:$0]  %s9177_s29, 512, %s294_s26, [#allocation29], %s7860_s14, %s7860_s14, %s7861_s28  }
 0x27b   :  { %s7438_s18 = scalar_lea.hbm %s9178_s16, 16 }
 0x27c   :  { %p7439_p8 = scmp.ne.s32.totalorder %s9178_s16, %s7438_s18  ;;  %p7442_p9 = scmp.lt.u32.totalorder %s7438_s18, %s9178_s16 }
 0x27e   :  { %p7444_p10 = pnand %p7442_p9, %p7439_p8 }
 0x280   :  { %7447 = shalt.err (!%p7444_p10)
}
 0x281   :  { %s7448_s22 = scalar_lea.vmem %s317_s15, 16  ;;  %s7452_s30 = scalar_lea.vmem %s317_s15, 32 }
 0x282   :  { %p7449_p11 = scmp.ne.s32.totalorder %s317_s15, %s7448_s22  ;;  %p7453_p12 = scmp.lt.s32.totalorder %s317_s15, %s317_s15 }
 0x283   :  { %p7454_p13 = scmp.lt.s32.totalorder %s7452_s30, %s7448_s22 }
 0x285   :  { %p7455_p0 = por %p7454_p13, %p7453_p12 }
 0x287   :  { %p7456_p1 = pnand %p7455_p0, %p7449_p11 }
 0x289   :  { %7459 = shalt.err (!%p7456_p1)
}
 0x28a   :  { %s9179_s24 = sld [smem:[#allocation105_spill]]  ;;  %s7870_s25 = smov [#allocation36]  }
 0x28b   :  { %319 = dma.hbm_to_vmem [thread:$0]  %s9178_s16, 16, %s317_s15, [#allocation32]  }
 0x28c   :  { %s335_s19 = sshll.u32 %s7870_s25, 4  ;;  %s7871_s1 = smov [#allocation39]   ;;  %s336_s19 = int_to_ptr.vmem [resolvable:$true] %s335_s19 }
 0x28d   :  { %s357_s6 = sshll.u32 %s7871_s1, 4  ;;  %s8287_s6 = int_to_ptr.vmem [resolvable:$true] %s357_s6 }
 0x290   :  { %s7460_s2 = scalar_lea.hbm %s9179_s24, 768 }
 0x291   :  { %p7461_p2 = scmp.ne.s32.totalorder %s9179_s24, %s7460_s2  ;;  %p7464_p3 = scmp.lt.u32.totalorder %s7460_s2, %s9179_s24 }
 0x293   :  { %p7466_p4 = pnand %p7464_p3, %p7461_p2 }
 0x295   :  { %7469 = shalt.err (!%p7466_p4)
}
 0x296   :  { %s7470_s9 = scalar_lea.vmem %s336_s19, 768  ;;  %p7475_p6 = scmp.lt.s32.totalorder %s336_s19, %s336_s19 }
 0x297   :  { %p7471_p5 = scmp.ne.s32.totalorder %s336_s19, %s7470_s9  ;;  %p7476_p7 = scmp.lt.s32.totalorder %s7470_s9, %s7470_s9 }
 0x299   :  { %p7477_p8 = por %p7476_p7, %p7475_p6 }
 0x29b   :  { %p7478_p9 = pnand %p7477_p8, %p7471_p5 }
 0x29d   :  { %7481 = shalt.err (!%p7478_p9)
}
 0x29e   :  { %s9180_s7 = sld [smem:[#allocation106_spill]] }
 0x29f   :  { %341 = dma.hbm_to_vmem [thread:$0]  %s9179_s24, 768, %s336_s19, [#allocation35], %s7864_s23, %s7864_s23, %s7865_s5  }
 0x2a4   :  { %s7482_s8 = scalar_lea.hbm %s9180_s7, 1024 }
 0x2a5   :  { %p7483_p10 = scmp.ne.s32.totalorder %s9180_s7, %s7482_s8  ;;  %p7486_p11 = scmp.lt.u32.totalorder %s7482_s8, %s9180_s7 }
 0x2a7   :  { %p7488_p12 = pnand %p7486_p11, %p7483_p10 }
 0x2a9   :  { %7491 = shalt.err (!%p7488_p12)
}
 0x2aa   :  { %s7492_s3 = scalar_lea.vmem %s8287_s6, 1024  ;;  %p7497_p0 = scmp.lt.s32.totalorder %s8287_s6, %s8287_s6 }
 0x2ab   :  { %p7493_p13 = scmp.ne.s32.totalorder %s8287_s6, %s7492_s3  ;;  %p7498_p1 = scmp.lt.s32.totalorder %s7492_s3, %s7492_s3 }
 0x2ad   :  { %p7499_p2 = por %p7498_p1, %p7497_p0 }
 0x2af   :  { %p7500_p3 = pnand %p7499_p2, %p7493_p13 }
 0x2b1   :  { %7503 = shalt.err (!%p7500_p3)
}
 0x2b2   :  { %s9181_s10 = sld [smem:[#allocation107_spill]]  ;;  %s7872_s20 = smov [#allocation42]  }
 0x2b3   :  { %363 = dma.hbm_to_vmem [thread:$0]  %s9180_s7, 1024, %s8287_s6, [#allocation38], %s7860_s14, %s7860_s14, %s7861_s28  }
 0x2b4   :  { %s380_s11 = sshll.u32 %s7872_s20, 4  ;;  %s7873_s29 = smov [#allocation45]   ;;  %s381_s11 = int_to_ptr.vmem [resolvable:$true] %s380_s11 }
 0x2b5   :  { %s399_s0 = sshll.u32 %s7873_s29, 4  ;;  %s8308_s0 = int_to_ptr.vmem [resolvable:$true] %s399_s0 }
 0x2b8   :  { %s7504_s26 = scalar_lea.hbm %s9181_s10, 16 }
 0x2b9   :  { %p7505_p4 = scmp.ne.s32.totalorder %s9181_s10, %s7504_s26  ;;  %p7508_p5 = scmp.lt.u32.totalorder %s7504_s26, %s9181_s10 }
 0x2bb   :  { %p7510_p6 = pnand %p7508_p5, %p7505_p4 }
 0x2bd   :  { %7513 = shalt.err (!%p7510_p6)
}
 0x2be   :  { %s7514_s4 = scalar_lea.vmem %s381_s11, 16  ;;  %s7518_s15 = scalar_lea.vmem %s381_s11, 32 }
 0x2bf   :  { %p7515_p7 = scmp.ne.s32.totalorder %s381_s11, %s7514_s4  ;;  %p7519_p8 = scmp.lt.s32.totalorder %s381_s11, %s381_s11 }
 0x2c0   :  { %p7520_p9 = scmp.lt.s32.totalorder %s7518_s15, %s7514_s4 }
 0x2c2   :  { %p7521_p10 = por %p7520_p9, %p7519_p8 }
 0x2c4   :  { %p7522_p11 = pnand %p7521_p10, %p7515_p7 }
 0x2c6   :  { %7525 = shalt.err (!%p7522_p11)
}
 0x2c7   :  { %s9182_s17 = sld [smem:[#allocation108_spill]] }
 0x2c8   :  { %383 = dma.hbm_to_vmem [thread:$0]  %s9181_s10, 16, %s381_s11, [#allocation41]  }
 0x2cd   :  { %s7526_s21 = scalar_lea.hbm %s9182_s17, 512 }
 0x2ce   :  { %p7527_p12 = scmp.ne.s32.totalorder %s9182_s17, %s7526_s21  ;;  %p7530_p13 = scmp.lt.u32.totalorder %s7526_s21, %s9182_s17 }
 0x2d0   :  { %p7532_p0 = pnand %p7530_p13, %p7527_p12 }
 0x2d2   :  { %7535 = shalt.err (!%p7532_p0)
}
 0x2d3   :  { %s7536_s16 = scalar_lea.vmem %s8308_s0, 512  ;;  %p7541_p2 = scmp.lt.s32.totalorder %s8308_s0, %s8308_s0 }
 0x2d4   :  { %p7537_p1 = scmp.ne.s32.totalorder %s8308_s0, %s7536_s16  ;;  %p7542_p3 = scmp.lt.s32.totalorder %s7536_s16, %s7536_s16 }
 0x2d6   :  { %p7543_p4 = por %p7542_p3, %p7541_p2 }
 0x2d8   :  { %p7544_p5 = pnand %p7543_p4, %p7537_p1 }
 0x2da   :  { %7547 = shalt.err (!%p7544_p5)
}
 0x2db   :  { %s9183_s18 = sld [smem:[#allocation109_spill]]  ;;  %s7874_s22 = smov [#allocation48]  }
 0x2dc   :  { %405 = dma.hbm_to_vmem [thread:$0]  %s9182_s17, 512, %s8308_s0, [#allocation44], %s7860_s14, %s7860_s14, %s7861_s28  }
 0x2dd   :  { %s422_s30 = sshll.u32 %s7874_s22, 4  ;;  %s7875_s24 = smov [#allocation51]   ;;  %s423_s30 = int_to_ptr.vmem [resolvable:$true] %s422_s30 }
 0x2de   :  { %s441_s25 = sshll.u32 %s7875_s24, 4  ;;  %s8326_s25 = int_to_ptr.vmem [resolvable:$true] %s441_s25 }
 0x2e1   :  { %s7548_s19 = scalar_lea.hbm %s9183_s18, 16 }
 0x2e2   :  { %p7549_p6 = scmp.ne.s32.totalorder %s9183_s18, %s7548_s19  ;;  %p7552_p7 = scmp.lt.u32.totalorder %s7548_s19, %s9183_s18 }
 0x2e4   :  { %p7554_p8 = pnand %p7552_p7, %p7549_p6 }
 0x2e6   :  { %7557 = shalt.err (!%p7554_p8)
}
 0x2e7   :  { %s7558_s1 = scalar_lea.vmem %s423_s30, 16  ;;  %s7562_s6 = scalar_lea.vmem %s423_s30, 32 }
 0x2e8   :  { %p7559_p9 = scmp.ne.s32.totalorder %s423_s30, %s7558_s1  ;;  %p7563_p10 = scmp.lt.s32.totalorder %s423_s30, %s423_s30 }
 0x2e9   :  { %p7564_p11 = scmp.lt.s32.totalorder %s7562_s6, %s7558_s1 }
 0x2eb   :  { %p7565_p12 = por %p7564_p11, %p7563_p10 }
 0x2ed   :  { %p7566_p13 = pnand %p7565_p12, %p7559_p9 }
 0x2ef   :  { %7569 = shalt.err (!%p7566_p13)
}
 0x2f0   :  { %s9184_s2 = sld [smem:[#allocation111_spill]] }
 0x2f1   :  { %425 = dma.hbm_to_vmem [thread:$0]  %s9183_s18, 16, %s423_s30, [#allocation47]  }
 0x2f6   :  { %s7570_s9 = scalar_lea.hbm %s9184_s2, 768 }
 0x2f7   :  { %p7571_p0 = scmp.ne.s32.totalorder %s9184_s2, %s7570_s9  ;;  %p7574_p1 = scmp.lt.u32.totalorder %s7570_s9, %s9184_s2 }
 0x2f9   :  { %p7576_p2 = pnand %p7574_p1, %p7571_p0 }
 0x2fb   :  { %7579 = shalt.err (!%p7576_p2)
}
 0x2fc   :  { %s7580_s7 = scalar_lea.vmem %s8326_s25, 768  ;;  %p7585_p4 = scmp.lt.s32.totalorder %s8326_s25, %s8326_s25 }
 0x2fd   :  { %p7581_p3 = scmp.ne.s32.totalorder %s8326_s25, %s7580_s7  ;;  %p7586_p5 = scmp.lt.s32.totalorder %s7580_s7, %s7580_s7 }
 0x2ff   :  { %p7587_p6 = por %p7586_p5, %p7585_p4 }
 0x301   :  { %p7588_p7 = pnand %p7587_p6, %p7581_p3 }
 0x303   :  { %7591 = shalt.err (!%p7588_p7)
}
 0x304   :  { %s9185_s8 = sld [smem:[#allocation113_spill]]  ;;  %s7876_s3 = smov [#allocation54]  }
 0x305   :  { %447 = dma.hbm_to_vmem [thread:$0]  %s9184_s2, 768, %s8326_s25, [#allocation50], %s7864_s23, %s7864_s23, %s7865_s5  }
 0x306   :  { %s463_s10 = sshll.u32 %s7876_s3, 4  ;;  %s7877_s20 = smov [#allocation57]   ;;  %s464_s10 = int_to_ptr.vmem [resolvable:$true] %s463_s10 }
 0x307   :  { %s486_s11 = sshll.u32 %s7877_s20, 4  ;;  %s487_s11 = int_to_ptr.vmem [resolvable:$true] %s486_s11 }
 0x30a   :  { %s7592_s29 = scalar_lea.hbm %s9185_s8, 512 }
 0x30b   :  { %p7593_p8 = scmp.ne.s32.totalorder %s9185_s8, %s7592_s29  ;;  %p7596_p9 = scmp.lt.u32.totalorder %s7592_s29, %s9185_s8 }
 0x30d   :  { %p7598_p10 = pnand %p7596_p9, %p7593_p8 }
 0x30f   :  { %7601 = shalt.err (!%p7598_p10)
}
 0x310   :  { %s7602_s0 = scalar_lea.vmem %s464_s10, 512  ;;  %p7607_p12 = scmp.lt.s32.totalorder %s464_s10, %s464_s10 }
 0x311   :  { %p7603_p11 = scmp.ne.s32.totalorder %s464_s10, %s7602_s0  ;;  %p7608_p13 = scmp.lt.s32.totalorder %s7602_s0, %s7602_s0 }
 0x313   :  { %p7609_p0 = por %p7608_p13, %p7607_p12 }
 0x315   :  { %p7610_p1 = pnand %p7609_p0, %p7603_p11 }
 0x317   :  { %7613 = shalt.err (!%p7610_p1)
}
 0x318   :  { %s9186_s23 = sld [smem:[#allocation115_spill]] }
 0x319   :  { %469 = dma.hbm_to_vmem [thread:$0]  %s9185_s8, 512, %s464_s10, [#allocation53], %s7860_s14, %s7860_s14, %s7861_s28  }
 0x31e   :  { %s7614_s5 = scalar_lea.hbm %s9186_s23, 16 }
 0x31f   :  { %p7615_p2 = scmp.ne.s32.totalorder %s9186_s23, %s7614_s5  ;;  %p7618_p3 = scmp.lt.u32.totalorder %s7614_s5, %s9186_s23 }
 0x321   :  { %p7620_p4 = pnand %p7618_p3, %p7615_p2 }
 0x323   :  { %7623 = shalt.err (!%p7620_p4)
}
 0x324   :  { %s7624_s26 = scalar_lea.vmem %s487_s11, 16  ;;  %s7628_s4 = scalar_lea.vmem %s487_s11, 32 }
 0x325   :  { %p7625_p5 = scmp.ne.s32.totalorder %s487_s11, %s7624_s26  ;;  %p7629_p6 = scmp.lt.s32.totalorder %s487_s11, %s487_s11 }
 0x326   :  { %p7630_p7 = scmp.lt.s32.totalorder %s7628_s4, %s7624_s26 }
 0x328   :  { %p7631_p8 = por %p7630_p7, %p7629_p6 }
 0x32a   :  { %p7632_p9 = pnand %p7631_p8, %p7625_p5 }
 0x32c   :  { %7635 = shalt.err (!%p7632_p9)
}
 0x32d   :  { %s9187_s15 = sld [smem:[#allocation117_spill]]  ;;  %s7878_s17 = smov [#allocation60]  }
 0x32e   :  { %489 = dma.hbm_to_vmem [thread:$0]  %s9186_s23, 16, %s487_s11, [#allocation56]  }
 0x32f   :  { %s505_s21 = sshll.u32 %s7878_s17, 4  ;;  %s7879_s16 = smov [#allocation63]   ;;  %s506_s21 = int_to_ptr.vmem [resolvable:$true] %s505_s21 }
 0x330   :  { %s528_s18 = sshll.u32 %s7879_s16, 4  ;;  %s529_s18 = int_to_ptr.vmem [resolvable:$true] %s528_s18 }
 0x333   :  { %s7636_s22 = scalar_lea.hbm %s9187_s15, 512 }
 0x334   :  { %p7637_p10 = scmp.ne.s32.totalorder %s9187_s15, %s7636_s22  ;;  %p7640_p11 = scmp.lt.u32.totalorder %s7636_s22, %s9187_s15 }
 0x336   :  { %p7642_p12 = pnand %p7640_p11, %p7637_p10 }
 0x338   :  { %7645 = shalt.err (!%p7642_p12)
}
 0x339   :  { %s7646_s30 = scalar_lea.vmem %s506_s21, 512  ;;  %p7651_p0 = scmp.lt.s32.totalorder %s506_s21, %s506_s21 }
 0x33a   :  { %p7647_p13 = scmp.ne.s32.totalorder %s506_s21, %s7646_s30  ;;  %p7652_p1 = scmp.lt.s32.totalorder %s7646_s30, %s7646_s30 }
 0x33c   :  { %p7653_p2 = por %p7652_p1, %p7651_p0 }
 0x33e   :  { %p7654_p3 = pnand %p7653_p2, %p7647_p13 }
 0x340   :  { %7657 = shalt.err (!%p7654_p3)
}
 0x341   :  { %s9188_s24 = sld [smem:[#allocation119_spill]] }
 0x342   :  { %511 = dma.hbm_to_vmem [thread:$0]  %s9187_s15, 512, %s506_s21, [#allocation59], %s7860_s14, %s7860_s14, %s7861_s28  }
 0x347   :  { %s7658_s25 = scalar_lea.hbm %s9188_s24, 16 }
 0x348   :  { %p7659_p4 = scmp.ne.s32.totalorder %s9188_s24, %s7658_s25  ;;  %p7662_p5 = scmp.lt.u32.totalorder %s7658_s25, %s9188_s24 }
 0x34a   :  { %p7664_p6 = pnand %p7662_p5, %p7659_p4 }
 0x34c   :  { %7667 = shalt.err (!%p7664_p6)
}
 0x34d   :  { %s7668_s19 = scalar_lea.vmem %s529_s18, 16  ;;  %s7672_s1 = scalar_lea.vmem %s529_s18, 32 }
 0x34e   :  { %p7669_p7 = scmp.ne.s32.totalorder %s529_s18, %s7668_s19  ;;  %p7673_p8 = scmp.lt.s32.totalorder %s529_s18, %s529_s18 }
 0x34f   :  { %p7674_p9 = scmp.lt.s32.totalorder %s7672_s1, %s7668_s19 }
 0x351   :  { %p7675_p10 = por %p7674_p9, %p7673_p8 }
 0x353   :  { %p7676_p11 = pnand %p7675_p10, %p7669_p7 }
 0x355   :  { %7679 = shalt.err (!%p7676_p11)
}
 0x356   :  { %531 = dma.hbm_to_vmem [thread:$0]  %s9188_s24, 16, %s529_s18, [#allocation62]  }
 0x357   :  { %s7880_s6 = smov [#allocation66]   ;;  %s7680_s2 = scalar_lea.hbm %s8105_s13, 16 }
 0x358   :  { %s548_s28 = sshll.u32 %s7880_s6, 4  ;;  %p7681_p12 = scmp.ne.s32.totalorder %s8105_s13, %s7680_s2  ;;  %s549_s28 = int_to_ptr.vmem [resolvable:$true] %s548_s28 }
 0x359   :  { %p7684_p13 = scmp.lt.u32.totalorder %s7680_s2, %s8105_s13 }
 0x35b   :  { %p7686_p0 = pnand %p7684_p13, %p7681_p12 }
 0x35d   :  { %7689 = shalt.err (!%p7686_p0)
}
 0x35e   :  { %s7690_s9 = scalar_lea.vmem %s549_s28, 16  ;;  %s7694_s7 = scalar_lea.vmem %s549_s28, 32 }
 0x35f   :  { %p7691_p1 = scmp.ne.s32.totalorder %s549_s28, %s7690_s9  ;;  %p7695_p2 = scmp.lt.s32.totalorder %s549_s28, %s549_s28 }
 0x360   :  { %p7696_p3 = scmp.lt.s32.totalorder %s7694_s7, %s7690_s9 }
 0x362   :  { %p7697_p4 = por %p7696_p3, %p7695_p2 }
 0x364   :  { %p7698_p5 = pnand %p7697_p4, %p7691_p1 }
 0x366   :  { %7701 = shalt.err (!%p7698_p5)
}
 0x367   :  { %551 = dma.hbm_to_vmem [thread:$0]  %s8105_s13, 16, %s549_s28, [#allocation65]  }
 0x368   :  { %7746 = dma.done.wait [#allocation5], 256  }
 0x369   :  { %7747 = vsyncadd [#allocation5], 4294967040 }
 0x36a   :  { %7748 = dma.done.wait [#allocation8], 512  }
 0x36b   :  { %7749 = vsyncadd [#allocation8], 4294966784 }
 0x36c   :  { %7750 = dma.done.wait [#allocation11], 512  }
 0x36d   :  { %7751 = vsyncadd [#allocation11], 4294966784 }
 0x36e   :  { %7752 = dma.done.wait [#allocation14], 640  }
 0x36f   :  { %7753 = vsyncadd [#allocation14], 4294966656 }
 0x370   :  { %7754 = dma.done.wait [#allocation17], 32  }
 0x371   :  { %7755 = vsyncadd [#allocation17], 4294967264 }
 0x372   :  { %7756 = dma.done.wait [#allocation20], 784  }
 0x373   :  { %7757 = vsyncadd [#allocation20], 4294966512 }
 0x374   :  { %7758 = dma.done.wait [#allocation23], 1072  }
 0x375   :  { %7759 = vsyncadd [#allocation23], 4294966224 }
 0x376   :  { %7760 = dma.done.wait [#allocation26], 32  }
 0x377   :  { %7761 = vsyncadd [#allocation26], 4294967264 }
 0x378   :  { %7762 = dma.done.wait [#allocation29], 528  }
 0x379   :  { %7763 = vsyncadd [#allocation29], 4294966768 }
 0x37a   :  { %7764 = dma.done.wait [#allocation32], 32  }
 0x37b   :  { %7765 = vsyncadd [#allocation32], 4294967264 }
 0x37c   :  { %7766 = dma.done.wait [#allocation35], 784  }
 0x37d   :  { %7767 = vsyncadd [#allocation35], 4294966512 }
 0x37e   :  { %7768 = dma.done.wait [#allocation38], 1072  }
 0x37f   :  { %7769 = vsyncadd [#allocation38], 4294966224 }
 0x380   :  { %7770 = dma.done.wait [#allocation41], 32  }
 0x381   :  { %7771 = vsyncadd [#allocation41], 4294967264 }
 0x382   :  { %7772 = dma.done.wait [#allocation44], 528  }
 0x383   :  { %7773 = vsyncadd [#allocation44], 4294966768 }
 0x384   :  { %7774 = dma.done.wait [#allocation47], 32  }
 0x385   :  { %7775 = vsyncadd [#allocation47], 4294967264 }
 0x386   :  { %7776 = dma.done.wait [#allocation50], 784  }
 0x387   :  { %7777 = vsyncadd [#allocation50], 4294966512 }
 0x388   :  { %7778 = dma.done.wait [#allocation53], 560  }
 0x389   :  { %7779 = vsyncadd [#allocation53], 4294966736 }
 0x38a   :  { %7780 = dma.done.wait [#allocation56], 32  }
 0x38b   :  { %7781 = vsyncadd [#allocation56], 4294967264 }
 0x38c   :  { %7782 = dma.done.wait [#allocation59], 528  }
 0x38d   :  { %7783 = vsyncadd [#allocation59], 4294966768 }
 0x38e   :  { %7784 = dma.done.wait [#allocation62], 32  }
 0x38f   :  { %7785 = vsyncadd [#allocation62], 4294967264 }
 0x390   :  { %7786 = dma.done.wait [#allocation65], 32  }
 0x391   :  { %7787 = vsyncadd [#allocation65], 4294967264  ;;  %v7881_v0 = vmov 0.0   ;;  %vm7882_vm0 = vmmov 0   ;;  %v6584_v1 = vld [vmem:[#allocation15 + $0x10] sm:$0xff]   ;;  %v6585_v2 = vld [vmem:[#allocation15] sm:$0xff]  }
 0x392   :  { %5947 = vmatprep.subr.bf16.mxu0 %v7881_v0  ;;  %5955 = vmatprep.subr.bf16.mxu1 %v7881_v0  ;;  %v6586_v3 = vld [vmem:[#allocation15 + $0x18] sm:$0xff]   ;;  %v6587_v4 = vld [vmem:[#allocation15 + $0x8] sm:$0xff]   ;;  %v690_v6 = vld [vmem:[#allocation7 + $0x8] sm:$0xff]  ;;  %vm719_vm1 = vcmask 261120   ;;  %v7883_v42 = vmov 0   ;;  %vm1164_vm2 = vcmask 1043456  }
 0x393   :  { %5951 = vmatprep.mubr.msk.bf16.mxu0 %vm7882_vm0, %v7881_v0  ;;  %5959 = vmatprep.mubr.msk.bf16.mxu1 %vm7882_vm0, %v7881_v0  ;;  %v689_v5 = vld [vmem:[#allocation7] sm:$0xff]  ;;  %v687_v7 = vld [vmem:[#allocation4] sm:$0xff]  ;;  %v688_v9 = vld [vmem:[#allocation4 + $0x8] sm:$0xff]  ;;  %vm1136_vm3 = vcmask 64512   ;;  %s7884_s13 = smov 96   ;;  %s7885_s8 = smov 32  }
 0x394   :  { %5948 = vmatpush3.bf16.msra.mxu0 %v6584_v1  ;;  %5956 = vmatpush3.bf16.msra.mxu1 %v6585_v2  ;;  %v706_v8 = vpack.c.bf16 %v690_v6, %v689_v5  ;;  %v705_v10 = vpack.c.bf16 %v688_v9, %v687_v7  ;;  %v5621_v14 = vld [vmem:[#allocation16] ss:$0 sm:$0xff]  ;;  %v6588_v36 = vld [vmem:[#allocation21] ss:$12 sps:$4 sm:$0xff]   ;;  %v6590_v37 = vld [vmem:[#allocation21 + $0x4] ss:$12 sps:$4 sm:$0xff]  }
 0x395   :  { %5949 = vmatprep.subr.bf16.mxu0 %v7881_v0  ;;  %5957 = vmatprep.subr.bf16.mxu1 %v7881_v0  ;;  %v6591_v38 = vld [vmem:[#allocation21 + $0x8] ss:$12 sps:$4 sm:$0xff]   ;;  %v6595_v40 = vld [vmem:[#allocation21 + $0x20] ss:$12 sps:$4 sm:$0xff]   ;;  %v6592_v41 = vld [vmem:[#allocation21 + $0x18] ss:$12 sps:$4 sm:$0xff]  }
 0x396   :  { %v6594_v39 = vld [vmem:[#allocation21 + $0x1c] ss:$12 sps:$4 sm:$0xff]   ;;  %v888_v5 = vld [vmem:[#allocation13] sm:$0xff]  ;;  %vm1952_vm4 = vcmask 523264   ;;  %vm1955_vm5 = vcmask 785408   ;;  %s7886_s3 = smov 112  }
 0x397   :  { %v5622_v50 = vld [vmem:[#allocation18] ss:$0 sm:$0xff]  ;;  %v5623_v52 = vld [vmem:[#allocation19] ss:$0 sm:$0xff]  ;;  %s7888_s10 = smov 16   ;;  %s7889_s20 = smov 48  }
 0x398   :  { %5950 = vmatpush3.bf16.msra.mxu0 %v6586_v3  ;;  %5958 = vmatpush3.bf16.msra.mxu1 %v6587_v4  ;;  %vm4778_vm6 = vcmask 130048   ;;  %vm4783_vm7 = vcmask 392192   ;;  %s7890_s11 = smov [#allocation2]   ;;  %s7702_s0 = scalar_lea.hbm %s8100_s27, 2048 }
 0x399   :  { %5963 = vmatprep.subr.bf16.mxu1 %v7881_v0  ;;  %952 = vmatprep.subr.bf16.mxu0 %v6590_v37  ;;  %s683_s29 = sshll.u32 %s7890_s11, 4  ;;  %p7703_p6 = scmp.ne.s32.totalorder %s8100_s27, %s7702_s0  ;;  %s684_s29 = int_to_ptr.vmem [resolvable:$true] %s683_s29 }
 0x39a   :  { %p7706_p7 = scmp.lt.u32.totalorder %s7702_s0, %s8100_s27 }
 0x39b   :  { %5952 = vmatmul.mubr.msk.bf16.vlgmr.msra.gmra.mrb[0].mxu0 %vm719_vm1, %v706_v8  ;;  %5960 = vmatmul.mubr.msk.bf16.vlgmr.msra.gmra.mrb[0].mxu1 %vm719_vm1, %v705_v10  ;;  %v902_v10 = vlaneseq }
 0x39c   :  { %5967 = vmatprep.mubr.msk.bf16.mxu1 %vm7882_vm0, %v7881_v0  ;;  %5964 = vmatpush3.bf16.msra.mxu1 %v6591_v38  ;;  %p7708_p8 = pnand %p7706_p7, %p7703_p6 }
 0x39d   :  { %953 = vmatpush1.bf16.msra.mxu0 %v6588_v36  ;;  %5965 = vmatprep.subr.bf16.mxu1 %v7881_v0 }
 0x39e   :  { %954 = vmatprep.subr.bf16.mxu0 %v6594_v39  ;;  %984 = vmatprep.mubr.bf16.mxu0 %v7883_v42 }
 0x3a0   :  { %5966 = vmatpush3.bf16.msra.mxu1 %v6595_v40 }
 0x3a1   :  { %955 = vmatpush1.bf16.msra.mxu0 %v6592_v41  ;;  %5977 = vmatprep.subr.bf16.mxu1 %v7881_v0 }
 0x3a2   :  { %5971 = vmatprep.subr.bf16.mxu0 %v7881_v0 }
 0x46e   :  { %v757_v11 = vpop.f32.mrb[0].mxu0  ;;  %v813_v12 = vpop.f32.mrb[0].mxu1 }
 0x46f   :  { %v5953_v13 = vpop.f32.mrb[1].mxu0  ;;  %v814_v15 = vadd.f32 %v813_v12, %v757_v11  ;;  %v5961_v16 = vpop.f32.mrb[1].mxu1  ;;  %v903_v11 = vshrl.u32 %v902_v10, 7 }
 0x470   :  { %v760_v17 = vpop.f32.mrb[2].mxu0  ;;  %v816_v18 = vpop.f32.mrb[2].mxu1  ;;  %v900_v13 = vld [vmem:[#allocation22] sm:$0x7] }
 0x471   :  { %v5954_v19 = vpop.f32.mrb[3].mxu0  ;;  %v817_v20 = vadd.f32 %v816_v18, %v760_v17  ;;  %v5962_v21 = vpop.f32.mrb[3].mxu1  ;;  %v827_v22 = vadd.f32 %v5621_v14, %v814_v15  ;;  %v8403_v12 = vsub.s32 1, %v903_v11  ;;  %v8408_v16 = vsub.s32 0, %v903_v11 }
 0x473   :  { %v831_v23 = vsel %vm719_vm1, %v827_v22, 0.0  ;;  %v828_v24 = vadd.f32 %v5621_v14, %v817_v20  ;;  %v8405_v14 = vsub.s32 2, %v903_v11  ;;  %v909_v15 = vrot.slane %v900_v13, %v8403_v12 }
 0x474   :  { %832 = vadd.xlane.f32.xlu0 %v831_v23 }
 0x475   :  { %v834_v25 = vsel %vm719_vm1, %v828_v24, 0.0  ;;  %v913_v21 = vrot.slane %v900_v13, %v8405_v14 }
 0x478   :  { %835 = vadd.xlane.f32.xlu0 %v834_v25 }
 0x501   :  { %v833_v26 = vpop.xlane.xlu0 %832 }
 0x502   :  { %v838_v27 = vmul.f32 0.03125, %v833_v26 }
 0x504   :  { %v840_v28 = vsub.f32 %v827_v22, %v838_v27  ;;  %v905_v27 = vrot.slane %v900_v13, %v8408_v16 }
 0x505   :  { %v836_v29 = vpop.xlane.xlu0 %835 }
 0x506   :  { %v839_v30 = vmul.f32 0.03125, %v836_v29  ;;  %v842_v31 = vmul.f32 %v840_v28, %v840_v28 }
 0x508   :  { %v841_v32 = vsub.f32 %v828_v24, %v839_v30  ;;  %v844_v33 = vsel %vm719_vm1, %v842_v31, 0.0 }
 0x509   :  { %845 = vadd.xlane.f32.xlu1 %v844_v33 }
 0x50a   :  { %v843_v34 = vmul.f32 %v841_v32, %v841_v32 }
 0x50c   :  { %v847_v35 = vsel %vm719_vm1, %v843_v34, 0.0 }
 0x50d   :  { %848 = vadd.xlane.f32.xlu1 %v847_v35 }
 0x596   :  { %v846_v43 = vpop.xlane.xlu1 %845 }
 0x597   :  { %v850_v44 = vmul.f32 0.03125, %v846_v43 }
 0x599   :  { %v852_v45 = vadd.f32 1e-05, %v850_v44 }
 0x59a   :  { %v849_v46 = vpop.xlane.xlu1 %848 }
 0x59b   :  { %6644 = vrsqrt.f32 %v852_v45  ;;  %v851_v47 = vmul.f32 0.03125, %v849_v46 }
 0x59d   :  { %v853_v48 = vadd.f32 1e-05, %v851_v47 }
 0x59f   :  { %6646 = vrsqrt.f32 %v853_v48 }
 0x5a5   :  { %v6645_v49 = vpop.eup %6644 }
 0x5a6   :  { %v856_v51 = vmul.f32 %v6645_v49, %v840_v28 }
 0x5a8   :  { %v864_v53 = vmul.f32 %v5622_v50, %v856_v51 }
 0x5a9   :  { %v6647_v54 = vpop.eup %6646 }
 0x5aa   :  { %v872_v55 = vadd.f32 %v5623_v52, %v864_v53  ;;  %v857_v56 = vmul.f32 %v6647_v54, %v841_v32 }
 0x5ac   :  { %v5624_v57 = vmul.f32 -1.442695, %v872_v55  ;;  %v865_v58 = vmul.f32 %v5622_v50, %v857_v56 }
 0x5ae   :  { %6648 = vpow2.f32 %v5624_v57  ;;  %v873_v59 = vadd.f32 %v5623_v52, %v865_v58 }
 0x5b0   :  { %v5625_v60 = vmul.f32 -1.442695, %v873_v59 }
 0x5b2   :  { %6650 = vpow2.f32 %v5625_v60 }
 0x5b8   :  { %v6649_v61 = vpop.eup %6648 }
 0x5b9   :  { %v880_v62 = vadd.f32 1.0, %v6649_v61 }
 0x5bb   :  { %6652 = vrcp.f32 %v880_v62 }
 0x5bc   :  { %v6651_v63 = vpop.eup %6650 }
 0x5bd   :  { %v881_v1 = vadd.f32 1.0, %v6651_v63 }
 0x5bf   :  { %6654 = vrcp.f32 %v881_v1 }
 0x5c5   :  { %v6653_v2 = vpop.eup %6652 }
 0x5c6   :  { %v886_v3 = vmul.f32 %v6653_v2, %v872_v55 }
 0x5c8   :  { %v8391_v7 = vadd.f32 %v888_v5, %v886_v3 }
 0x5c9   :  { %v6655_v4 = vpop.eup %6654 }
 0x5ca   :  { %v887_v6 = vmul.f32 %v6655_v4, %v873_v59 }
 0x5cc   :  { %v8393_v8 = vadd.f32 %v888_v5, %v887_v6 }
 0x5ce   :  { %v891_v9 = vpack.c.bf16 %v8393_v8, %v8391_v7 }
 0x5d0   :  { %5632 = vmatmul.mubr.msk.bf16.vlgmr.msra.gmra.mrb[4].mxu0 %vm719_vm1, %v891_v9  ;;  %5968 = vmatmul.mubr.msk.bf16.vlgmr.msra.gmra.mrb[4].mxu1 %vm719_vm1, %v891_v9 }
 0x5d1   :  { %5973 = vmatprep.mubr.msk.bf16.mxu0 %vm7882_vm0, %v7881_v0  ;;  %5979 = vmatprep.mubr.msk.bf16.mxu1 %vm7882_vm0, %v7881_v0 }
 0x6a3   :  { %v986_v17 = vpop.f32.mrb[4].mxu0  ;;  %v1029_v18 = vpop.f32.mrb[4].mxu1 }
 0x6a4   :  { %v988_v19 = vpop.f32.mrb[5].mxu0  ;;  %v5969_v20 = vpop.f32.mrb[5].mxu1  ;;  %v1030_v30 = vadd.f32 %v1029_v18, %v913_v21  ;;  %v987_v33 = vadd.f32 %v986_v17, %v905_v27 }
 0x6a5   :  { %v989_v22 = vadd.f32 %v988_v19, %v909_v15  ;;  %v990_v23 = vpop.f32.mrb[6].mxu0  ;;  %v1032_v24 = vpop.f32.mrb[6].mxu1 }
 0x6a6   :  { %v992_v25 = vpop.f32.mrb[7].mxu0  ;;  %v5970_v26 = vpop.f32.mrb[7].mxu1  ;;  %v1033_v34 = vadd.f32 %v1032_v24, %v913_v21  ;;  %v8421_v36 = vpack.c.bf16 %v1030_v30, %v1030_v30  ;;  %v991_v37 = vadd.f32 %v990_v23, %v905_v27  ;;  %v8424_v38 = vpack.c.bf16 %v987_v33, %v987_v33 }
 0x6a7   :  { %v8412_v28 = vpack.c.bf16 %v989_v22, %v989_v22  ;;  %v993_v29 = vadd.f32 %v992_v25, %v909_v15 }
 0x6a8   :  { %v8426_v39 = vpack.c.bf16 %v1033_v34, %v1033_v34  ;;  %v8428_v40 = vpack.c.bf16 %v991_v37, %v991_v37  ;;  %v1166_v41 = vsel %vm1164_vm2, %v8421_v36, 0 }
 0x6a9   :  { %v8414_v31 = vpack.c.bf16 %v993_v29, %v993_v29  ;;  %v1046_v32 = vsel %vm719_vm1, %v8412_v28, 0 }
 0x6aa   :  { %5972 = vmatpush3.bf16.xpose.msra.mxu0 %v1046_v32  ;;  %v1212_v43 = vsel %vm1164_vm2, %v8426_v39, 0 }
 0x6ab   :  { %v1092_v35 = vsel %vm719_vm1, %v8414_v31, 0  ;;  %5983 = vmatprep.subr.bf16.mxu0 %v7881_v0 }
 0x6ac   :  { %5978 = vmatpush3.bf16.xpose.msra.mxu1 %v1092_v35 }
 0x6ad   :  { %5989 = vmatprep.subr.bf16.mxu1 %v7881_v0 }
 0x6b1   :  { %5974 = vmatmul.mubr.msk.bf16.vlgmr.msra.gmra.mrb[8].mxu0 %vm719_vm1, %v8424_v38 }
 0x6b2   :  { %5984 = vmatpush3.bf16.msra.mxu0 %v1166_v41  ;;  %5985 = vmatprep.mubr.msk.bf16.mxu0 %vm7882_vm0, %v7881_v0 }
 0x6b3   :  { %5980 = vmatmul.mubr.msk.bf16.vlgmr.msra.gmra.mrb[8].mxu1 %vm719_vm1, %v8428_v40  ;;  %5995 = vmatprep.subr.bf16.mxu0 %v7881_v0 }
 0x6b4   :  { %5990 = vmatpush3.bf16.msra.mxu1 %v1212_v43  ;;  %5991 = vmatprep.mubr.msk.bf16.mxu1 %vm7882_vm0, %v7881_v0 }
 0x6b5   :  { %6001 = vmatprep.subr.bf16.mxu1 %v7881_v0 }
 0x784   :  { %v1082_v44 = vpop.f32.mrb[8].mxu0 }
 0x785   :  { %v1134_v45 = vmul.f32 0.17677669, %v1082_v44  ;;  %v5975_v46 = vpop.f32.mrb[9].mxu0 }
 0x786   :  { %v1085_v47 = vpop.f32.mrb[10].mxu0  ;;  %v1128_v48 = vpop.f32.mrb[8].mxu1 }
 0x787   :  { %v1135_v49 = vmul.f32 0.17677669, %v1128_v48  ;;  %v5976_v50 = vpop.f32.mrb[11].mxu0  ;;  %v5981_v51 = vpop.f32.mrb[9].mxu1  ;;  %v1137_v52 = vsel %vm1136_vm3, %v1134_v45, -inf }
 0x788   :  { %1138 = vmax.xlane.f32.xlu0 %v1137_v52  ;;  %v1131_v53 = vpop.f32.mrb[10].mxu1 }
 0x789   :  { %v5982_v54 = vpop.f32.mrb[11].mxu1  ;;  %v1140_v55 = vsel %vm1136_vm3, %v1135_v49, -inf }
 0x78a   :  { %1141 = vmax.xlane.f32.xlu1 %v1140_v55 }
 0x79b   :  { %1310 = vrot.lane.b32.xlu1 %v8414_v31, %s7884_s13 }
 0x815   :  { %v1139_v56 = vpop.xlane.xlu0 %1138 }
 0x816   :  { %v1143_v57 = vsub.f32 %v1134_v45, %v1139_v56 }
 0x817   :  { %v1142_v58 = vpop.xlane.xlu1 %1141 }
 0x818   :  { %v1145_v59 = vmul.f32 1.442695, %v1143_v57  ;;  %v1144_v60 = vsub.f32 %v1135_v49, %v1142_v58 }
 0x81a   :  { %6656 = vpow2.f32 %v1145_v59  ;;  %v1147_v61 = vmul.f32 1.442695, %v1144_v60 }
 0x81b   :  { %v1311_v3 = vpop.permute.xlu1 %1310 }
 0x81c   :  { %6658 = vpow2.f32 %v1147_v61  ;;  %v1316_v19 = vsel %vm719_vm1, %v1311_v3, 0 }
 0x824   :  { %v6657_v62 = vpop.eup %6656 }
 0x825   :  { %v1149_v63 = vsel %vm1136_vm3, %v6657_v62, 0.0 }
 0x826   :  { %v6659_v1 = vpop.eup %6658  ;;  %1150 = vadd.xlane.f32.xlu0 %v1149_v63 }
 0x827   :  { %v1152_v2 = vsel %vm1136_vm3, %v6659_v1, 0.0 }
 0x828   :  { %1153 = vadd.xlane.f32.xlu1 %v1152_v2 }
 0x839   :  { %1255 = vrot.lane.b32.xlu1 %v8424_v38, %s7884_s13 }
 0x83c   :  { %1258 = vrot.lane.b32.xlu0 %v8412_v28, %s7884_s13 }
 0x83d   :  { %1307 = vrot.lane.b32.xlu1 %v8428_v40, %s7884_s13 }
 0x8b3   :  { %v1151_v4 = vpop.xlane.xlu0 %1150 }
 0x8b4   :  { %6660 = vrcp.f32 %v1151_v4 }
 0x8b5   :  { %v1154_v5 = vpop.xlane.xlu1 %1153 }
 0x8b6   :  { %6662 = vrcp.f32 %v1154_v5 }
 0x8b7   :  { %v1259_v11 = vpop.permute.xlu0 %1258 }
 0x8b8   :  { %v1264_v17 = vsel %vm719_vm1, %v1259_v11, 0 }
 0x8b9   :  { %v1256_v20 = vpop.permute.xlu1 %1255 }
 0x8bd   :  { %v1308_v21 = vpop.permute.xlu1 %1307 }
 0x8be   :  { %v6661_v6 = vpop.eup %6660 }
 0x8bf   :  { %v1157_v9 = vmul.f32 %v6661_v6, %v6657_v62 }
 0x8c0   :  { %v6663_v10 = vpop.eup %6662 }
 0x8c1   :  { %v1159_v13 = vpack.c.bf16 %v1157_v9, %v1157_v9  ;;  %v1158_v15 = vmul.f32 %v6663_v10, %v6659_v1 }
 0x8c3   :  { %5986 = vmatmul.mubr.msk.bf16.vlgmr.msra.gmra.mrb[12].mxu0 %vm1136_vm3, %v1159_v13  ;;  %v1160_v18 = vpack.c.bf16 %v1158_v15, %v1158_v15 }
 0x8c4   :  { %5996 = vmatpush3.bf16.xpose.msra.mxu0 %v1264_v17  ;;  %5997 = vmatprep.mubr.msk.bf16.mxu0 %vm7882_vm0, %v7881_v0 }
 0x8c5   :  { %5992 = vmatmul.mubr.msk.bf16.vlgmr.msra.gmra.mrb[12].mxu1 %vm1136_vm3, %v1160_v18  ;;  %6007 = vmatprep.subr.bf16.mxu0 %v7881_v0 }
 0x8c6   :  { %6002 = vmatpush3.bf16.xpose.msra.mxu1 %v1316_v19  ;;  %6003 = vmatprep.mubr.msk.bf16.mxu1 %vm7882_vm0, %v7881_v0 }
 0x8c7   :  { %6013 = vmatprep.subr.bf16.mxu1 %v7881_v0 }
 0x8cb   :  { %5998 = vmatmul.mubr.msk.bf16.vlgmr.msra.gmra.mrb[16].mxu0 %vm719_vm1, %v1256_v20 }
 0x8cc   :  { %6009 = vmatprep.mubr.msk.bf16.mxu0 %vm7882_vm0, %v7881_v0 }
 0x8cd   :  { %6004 = vmatmul.mubr.msk.bf16.vlgmr.msra.gmra.mrb[16].mxu1 %vm719_vm1, %v1308_v21 }
 0x8ce   :  { %6015 = vmatprep.mubr.msk.bf16.mxu1 %vm7882_vm0, %v7881_v0 }
 0x996   :  { %v8472_v22 = vpop.f32.mrb[12].mxu0 }
 0x997   :  { %v5987_v23 = vpop.f32.mrb[13].mxu0 }
 0x998   :  { %v1205_v24 = vpop.f32.mrb[14].mxu0  ;;  %v8474_v25 = vpop.f32.mrb[12].mxu1 }
 0x999   :  { %v5988_v26 = vpop.f32.mrb[15].mxu0  ;;  %v5993_v27 = vpop.f32.mrb[13].mxu1 }
 0x99a   :  { %v1251_v29 = vpop.f32.mrb[14].mxu1 }
 0x99b   :  { %v5994_v30 = vpop.f32.mrb[15].mxu1 }
 0x99e   :  { %v1300_v32 = vpop.f32.mrb[16].mxu0 }
 0x99f   :  { %v1358_v33 = vmul.f32 0.17677669, %v1300_v32  ;;  %v5999_v34 = vpop.f32.mrb[17].mxu0 }
 0x9a0   :  { %v1303_v35 = vpop.f32.mrb[18].mxu0  ;;  %v1352_v37 = vpop.f32.mrb[16].mxu1 }
 0x9a1   :  { %v1359_v41 = vmul.f32 0.17677669, %v1352_v37  ;;  %v6000_v43 = vpop.f32.mrb[19].mxu0  ;;  %v6005_v44 = vpop.f32.mrb[17].mxu1  ;;  %v1360_v45 = vsel %vm1136_vm3, %v1358_v33, -inf }
 0x9a2   :  { %1361 = vmax.xlane.f32.xlu0 %v1360_v45  ;;  %v1355_v46 = vpop.f32.mrb[18].mxu1 }
 0x9a3   :  { %v6006_v47 = vpop.f32.mrb[19].mxu1  ;;  %v1363_v48 = vsel %vm1136_vm3, %v1359_v41, -inf }
 0x9a4   :  { %1364 = vmax.xlane.f32.xlu1 %v1363_v48 }
 0x9b5   :  { %1434 = vrot.lane.b32.xlu1 %v8426_v39, %s7884_s13 }
 0x9b9   :  { %1484 = vrot.lane.b32.xlu1 %v8412_v28, %s7860_s14 }
 0x9bd   :  { %1534 = vrot.lane.b32.xlu1 %v8414_v31, %s7860_s14 }
 0x9c1   :  { %1532 = vrot.lane.b32.xlu1 %v8428_v40, %s7860_s14 }
 0xa2f   :  { %v1362_v49 = vpop.xlane.xlu0 %1361 }
 0xa30   :  { %v1366_v50 = vsub.f32 %v1358_v33, %v1362_v49 }
 0xa31   :  { %v1365_v51 = vpop.xlane.xlu1 %1364 }
 0xa32   :  { %v1368_v52 = vmul.f32 1.442695, %v1366_v50  ;;  %v1367_v53 = vsub.f32 %v1359_v41, %v1365_v51 }
 0xa34   :  { %6664 = vpow2.f32 %v1368_v52  ;;  %v1370_v54 = vmul.f32 1.442695, %v1367_v53 }
 0xa35   :  { %v1435_v55 = vpop.permute.xlu1 %1434 }
 0xa36   :  { %6666 = vpow2.f32 %v1370_v54  ;;  %v1440_v56 = vsel %vm1164_vm2, %v1435_v55, 0 }
 0xa37   :  { %6014 = vmatpush3.bf16.msra.mxu1 %v1440_v56 }
 0xa38   :  { %6025 = vmatprep.subr.bf16.mxu1 %v7881_v0 }
 0xa39   :  { %v1485_v3 = vpop.permute.xlu1 %1484 }
 0xa3a   :  { %v1490_v11 = vsel %vm719_vm1, %v1485_v3, 0 }
 0xa3d   :  { %v1535_v10 = vpop.permute.xlu1 %1534 }
 0xa3e   :  { %v6665_v57 = vpop.eup %6664  ;;  %v1540_v15 = vsel %vm719_vm1, %v1535_v10, 0 }
 0xa3f   :  { %v1372_v58 = vsel %vm1136_vm3, %v6665_v57, 0.0 }
 0xa40   :  { %v6667_v59 = vpop.eup %6666  ;;  %1373 = vadd.xlane.f32.xlu0 %v1372_v58 }
 0xa41   :  { %v1375_v60 = vsel %vm1136_vm3, %v6667_v59, 0.0  ;;  %v1533_v18 = vpop.permute.xlu1 %1532 }
 0xa44   :  { %1376 = vadd.xlane.f32.xlu0 %v1375_v60 }
 0xa5a   :  { %1385 = vrot.lane.b32.xlu0 %v8421_v36, %s7884_s13 }
 0xa5e   :  { %1482 = vrot.lane.b32.xlu0 %v8424_v38, %s7860_s14 }
 0xacd   :  { %v1374_v61 = vpop.xlane.xlu0 %1373 }
 0xace   :  { %6668 = vrcp.f32 %v1374_v61 }
 0xad1   :  { %v1377_v62 = vpop.xlane.xlu0 %1376 }
 0xad2   :  { %6670 = vrcp.f32 %v1377_v62 }
 0xad5   :  { %v1386_v63 = vpop.permute.xlu0 %1385 }
 0xad6   :  { %v1391_v1 = vsel %vm1164_vm2, %v1386_v63, 0 }
 0xad7   :  { %6008 = vmatpush3.bf16.msra.mxu0 %v1391_v1 }
 0xad8   :  { %v6669_v2 = vpop.eup %6668  ;;  %6019 = vmatprep.subr.bf16.mxu0 %v7881_v0 }
 0xad9   :  { %v1380_v4 = vmul.f32 %v6669_v2, %v6665_v57  ;;  %v1483_v17 = vpop.permute.xlu0 %1482 }
 0xadb   :  { %v1382_v5 = vpack.c.bf16 %v1380_v4, %v1380_v4 }
 0xadc   :  { %v6671_v6 = vpop.eup %6670 }
 0xadd   :  { %6010 = vmatmul.mubr.msk.bf16.vlgmr.msra.gmra.mrb[20].mxu0 %vm1136_vm3, %v1382_v5  ;;  %v1381_v9 = vmul.f32 %v6671_v6, %v6667_v59 }
 0xade   :  { %6021 = vmatprep.mubr.msk.bf16.mxu0 %vm7882_vm0, %v7881_v0 }
 0xadf   :  { %v1383_v13 = vpack.c.bf16 %v1381_v9, %v1381_v9 }
 0xae0   :  { %6020 = vmatpush3.bf16.xpose.msra.mxu0 %v1490_v11 }
 0xae1   :  { %6016 = vmatmul.mubr.msk.bf16.vlgmr.msra.gmra.mrb[20].mxu1 %vm1136_vm3, %v1383_v13  ;;  %6031 = vmatprep.subr.bf16.mxu0 %v7881_v0 }
 0xae2   :  { %6026 = vmatpush3.bf16.xpose.msra.mxu1 %v1540_v15  ;;  %6027 = vmatprep.mubr.msk.bf16.mxu1 %vm7882_vm0, %v7881_v0 }
 0xae3   :  { %6037 = vmatprep.subr.bf16.mxu1 %v7881_v0 }
 0xae7   :  { %6022 = vmatmul.mubr.msk.bf16.vlgmr.msra.gmra.mrb[24].mxu0 %vm719_vm1, %v1483_v17 }
 0xae8   :  { %6033 = vmatprep.mubr.msk.bf16.mxu0 %vm7882_vm0, %v7881_v0 }
 0xae9   :  { %6028 = vmatmul.mubr.msk.bf16.vlgmr.msra.gmra.mrb[24].mxu1 %vm719_vm1, %v1533_v18 }
 0xaea   :  { %6039 = vmatprep.mubr.msk.bf16.mxu1 %vm7882_vm0, %v7881_v0 }
 0xbb0   :  { %v8512_v19 = vpop.f32.mrb[20].mxu0 }
 0xbb1   :  { %v6011_v20 = vpop.f32.mrb[21].mxu0 }
 0xbb2   :  { %v1430_v21 = vpop.f32.mrb[22].mxu0 }
 0xbb3   :  { %v6012_v23 = vpop.f32.mrb[23].mxu0 }
 0xbb4   :  { %v8514_v24 = vpop.f32.mrb[20].mxu1 }
 0xbb5   :  { %v6539_v26 = vpack.i.bf16 %v8514_v24, %v8512_v19  ;;  %v6017_v27 = vpop.f32.mrb[21].mxu1 }
 0xbb6   :  { %v1479_v29 = vpop.f32.mrb[22].mxu1 }
 0xbb7   :  { %v6018_v30 = vpop.f32.mrb[23].mxu1 }
 0xbba   :  { %v1526_v32 = vpop.f32.mrb[24].mxu0 }
 0xbbb   :  { %v1582_v33 = vmul.f32 0.17677669, %v1526_v32  ;;  %v6023_v34 = vpop.f32.mrb[25].mxu0 }
 0xbbc   :  { %v1529_v35 = vpop.f32.mrb[26].mxu0  ;;  %v1576_v37 = vpop.f32.mrb[24].mxu1 }
 0xbbd   :  { %v1583_v41 = vmul.f32 0.17677669, %v1576_v37  ;;  %v6024_v43 = vpop.f32.mrb[27].mxu0  ;;  %v6029_v44 = vpop.f32.mrb[25].mxu1  ;;  %v1584_v45 = vsel %vm1136_vm3, %v1582_v33, -inf }
 0xbbe   :  { %1585 = vmax.xlane.f32.xlu0 %v1584_v45  ;;  %v1579_v46 = vpop.f32.mrb[26].mxu1 }
 0xbbf   :  { %v6030_v47 = vpop.f32.mrb[27].mxu1  ;;  %v1587_v48 = vsel %vm1136_vm3, %v1583_v41, -inf }
 0xbc0   :  { %1588 = vmax.xlane.f32.xlu1 %v1587_v48 }
 0xbd1   :  { %1656 = vrot.lane.b32.xlu1 %v8426_v39, %s7860_s14 }
 0xbd5   :  { %1706 = vrot.lane.b32.xlu1 %v8412_v28, %s7885_s8 }
 0xbd9   :  { %1756 = vrot.lane.b32.xlu1 %v8414_v31, %s7885_s8 }
 0xbdd   :  { %1754 = vrot.lane.b32.xlu1 %v8428_v40, %s7885_s8 }
 0xc4b   :  { %v1586_v49 = vpop.xlane.xlu0 %1585 }
 0xc4c   :  { %v1590_v50 = vsub.f32 %v1582_v33, %v1586_v49 }
 0xc4d   :  { %v1589_v51 = vpop.xlane.xlu1 %1588 }
 0xc4e   :  { %v1592_v52 = vmul.f32 1.442695, %v1590_v50  ;;  %v1591_v53 = vsub.f32 %v1583_v41, %v1589_v51 }
 0xc50   :  { %6672 = vpow2.f32 %v1592_v52  ;;  %v1594_v54 = vmul.f32 1.442695, %v1591_v53 }
 0xc51   :  { %v1657_v55 = vpop.permute.xlu1 %1656 }
 0xc52   :  { %6674 = vpow2.f32 %v1594_v54  ;;  %v1662_v56 = vsel %vm1164_vm2, %v1657_v55, 0 }
 0xc53   :  { %6038 = vmatpush3.bf16.msra.mxu1 %v1662_v56 }
 0xc54   :  { %6049 = vmatprep.subr.bf16.mxu1 %v7881_v0 }
 0xc55   :  { %v1707_v63 = vpop.permute.xlu1 %1706 }
 0xc59   :  { %v1757_v5 = vpop.permute.xlu1 %1756 }
 0xc5a   :  { %v6673_v28 = vpop.eup %6672  ;;  %v1762_v9 = vsel %vm719_vm1, %v1757_v5, 0  ;;  %v6602_v5 = vld [vmem:[#allocation24 + $0x30] sm:$0xff]  }
 0xc5b   :  { %v1596_v31 = vsel %vm1136_vm3, %v6673_v28, 0.0 }
 0xc5c   :  { %v6675_v57 = vpop.eup %6674  ;;  %1597 = vadd.xlane.f32.xlu0 %v1596_v31 }
 0xc5d   :  { %v1599_v40 = vsel %vm1136_vm3, %v6675_v57, 0.0  ;;  %v1755_v11 = vpop.permute.xlu1 %1754 }
 0xc60   :  { %1600 = vadd.xlane.f32.xlu0 %v1599_v40 }
 0xc76   :  { %1608 = vrot.lane.b32.xlu0 %v8421_v36, %s7860_s14 }
 0xc7a   :  { %1704 = vrot.lane.b32.xlu0 %v8424_v38, %s7885_s8  ;;  %v1712_v38 = vsel %vm719_vm1, %v1707_v63, 0  ;;  %v6597_v63 = vld [vmem:[#allocation24 + $0x8] sm:$0xff]  }
 0xce9   :  { %v1598_v58 = vpop.xlane.xlu0 %1597 }
 0xcea   :  { %6676 = vrcp.f32 %v1598_v58 }
 0xced   :  { %v1601_v59 = vpop.xlane.xlu0 %1600 }
 0xcee   :  { %6678 = vrcp.f32 %v1601_v59 }
 0xcf1   :  { %v1609_v60 = vpop.permute.xlu0 %1608 }
 0xcf2   :  { %v1614_v61 = vsel %vm1164_vm2, %v1609_v60, 0 }
 0xcf3   :  { %6032 = vmatpush3.bf16.msra.mxu0 %v1614_v61 }
 0xcf4   :  { %v6677_v62 = vpop.eup %6676  ;;  %6043 = vmatprep.subr.bf16.mxu0 %v7881_v0 }
 0xcf5   :  { %v1604_v1 = vmul.f32 %v6677_v62, %v6673_v28  ;;  %v1705_v10 = vpop.permute.xlu0 %1704  ;;  %v6596_v62 = vld [vmem:[#allocation24] sm:$0xff]  }
 0xcf7   :  { %v1606_v2 = vpack.c.bf16 %v1604_v1, %v1604_v1  ;;  %v6598_v1 = vld [vmem:[#allocation24 + $0x10] sm:$0xff]  }
 0xcf8   :  { %v6679_v3 = vpop.eup %6678 }
 0xcf9   :  { %6034 = vmatmul.mubr.msk.bf16.vlgmr.msra.gmra.mrb[28].mxu0 %vm1136_vm3, %v1606_v2  ;;  %v1605_v4 = vmul.f32 %v6679_v3, %v6675_v57  ;;  %v6599_v2 = vld [vmem:[#allocation24 + $0x18] sm:$0xff]   ;;  %v6600_v3 = vld [vmem:[#allocation24 + $0x20] sm:$0xff]  }
 0xcfa   :  { %6045 = vmatprep.mubr.msk.bf16.mxu0 %vm7882_vm0, %v7881_v0 }
 0xcfb   :  { %v1607_v6 = vpack.c.bf16 %v1605_v4, %v1605_v4  ;;  %v6601_v4 = vld [vmem:[#allocation24 + $0x28] sm:$0xff]  }
 0xcfc   :  { %6044 = vmatpush3.bf16.xpose.msra.mxu0 %v1712_v38  ;;  %v6603_v38 = vld [vmem:[#allocation24 + $0x38] sm:$0xff]  }
 0xcfd   :  { %6040 = vmatmul.mubr.msk.bf16.vlgmr.msra.gmra.mrb[28].mxu1 %vm1136_vm3, %v1607_v6  ;;  %6055 = vmatprep.subr.bf16.mxu0 %v7881_v0 }
 0xcfe   :  { %6050 = vmatpush3.bf16.xpose.msra.mxu1 %v1762_v9  ;;  %6051 = vmatprep.mubr.msk.bf16.mxu1 %vm7882_vm0, %v7881_v0 }
 0xcff   :  { %6061 = vmatprep.subr.bf16.mxu1 %v7881_v0 }
 0xd03   :  { %6046 = vmatmul.mubr.msk.bf16.vlgmr.msra.gmra.mrb[32].mxu0 %vm719_vm1, %v1705_v10 }
 0xd04   :  { %6057 = vmatprep.mubr.msk.bf16.mxu0 %vm7882_vm0, %v7881_v0 }
 0xd05   :  { %6052 = vmatmul.mubr.msk.bf16.vlgmr.msra.gmra.mrb[32].mxu1 %vm719_vm1, %v1755_v11 }
 0xd06   :  { %6063 = vmatprep.mubr.msk.bf16.mxu1 %vm7882_vm0, %v7881_v0 }
 0xdcc   :  { %v1650_v13 = vpop.f32.mrb[28].mxu0 }
 0xdcd   :  { %v6035_v15 = vpop.f32.mrb[29].mxu0 }
 0xdce   :  { %v1653_v17 = vpop.f32.mrb[30].mxu0 }
 0xdcf   :  { %v6036_v18 = vpop.f32.mrb[31].mxu0 }
 0xdd0   :  { %v1698_v20 = vpop.f32.mrb[28].mxu1 }
 0xdd1   :  { %v6544_v21 = vpack.i.bf16 %v1698_v20, %v1650_v13  ;;  %v6041_v23 = vpop.f32.mrb[29].mxu1 }
 0xdd2   :  { %v1701_v27 = vpop.f32.mrb[30].mxu1 }
 0xdd3   :  { %v6042_v29 = vpop.f32.mrb[31].mxu1 }
 0xdd6   :  { %v1748_v30 = vpop.f32.mrb[32].mxu0 }
 0xdd7   :  { %v1804_v32 = vmul.f32 0.17677669, %v1748_v30  ;;  %v6047_v33 = vpop.f32.mrb[33].mxu0 }
 0xdd8   :  { %v1751_v34 = vpop.f32.mrb[34].mxu0  ;;  %v1798_v35 = vpop.f32.mrb[32].mxu1 }
 0xdd9   :  { %v1805_v37 = vmul.f32 0.17677669, %v1798_v35  ;;  %v6048_v41 = vpop.f32.mrb[35].mxu0  ;;  %v6053_v43 = vpop.f32.mrb[33].mxu1  ;;  %v1806_v44 = vsel %vm1136_vm3, %v1804_v32, -inf }
 0xdda   :  { %1807 = vmax.xlane.f32.xlu0 %v1806_v44  ;;  %v1801_v45 = vpop.f32.mrb[34].mxu1 }
 0xddb   :  { %v6054_v46 = vpop.f32.mrb[35].mxu1  ;;  %v1809_v47 = vsel %vm1136_vm3, %v1805_v37, -inf }
 0xddc   :  { %1810 = vmax.xlane.f32.xlu1 %v1809_v47 }
 0xded   :  { %1878 = vrot.lane.b32.xlu1 %v8426_v39, %s7885_s8 }
 0xdf1   :  { %6540 = vrot.lane.b32.xlu1 %v6539_v26, %s7885_s8 }
 0xdf5   :  { %6545 = vrot.lane.b32.xlu1 %v6544_v21, %s7860_s14 }
 0xe67   :  { %v1808_v48 = vpop.xlane.xlu0 %1807 }
 0xe68   :  { %v1812_v49 = vsub.f32 %v1804_v32, %v1808_v48 }
 0xe69   :  { %v1811_v50 = vpop.xlane.xlu1 %1810 }
 0xe6a   :  { %v1814_v51 = vmul.f32 1.442695, %v1812_v49  ;;  %v1813_v52 = vsub.f32 %v1805_v37, %v1811_v50 }
 0xe6c   :  { %6680 = vpow2.f32 %v1814_v51  ;;  %v1816_v53 = vmul.f32 1.442695, %v1813_v52 }
 0xe6d   :  { %v1879_v54 = vpop.permute.xlu1 %1878 }
 0xe6e   :  { %6682 = vpow2.f32 %v1816_v53  ;;  %v1884_v55 = vsel %vm1164_vm2, %v1879_v54, 0 }
 0xe6f   :  { %6062 = vmatpush3.bf16.msra.mxu1 %v1884_v55 }
 0xe70   :  { %6087 = vmatprep.subr.bf16.mxu1 %v7881_v0 }
 0xe71   :  { %v6541_v21 = vpop.permute.xlu1 %6540 }
 0xe72   :  { %v6543_v27 = vunpack.i.h.bf16 %v6541_v21  ;;  %v6542_v29 = vunpack.i.l.bf16 %v6541_v21 }
 0xe74   :  { %v1951_v34 = vsel %vm719_vm1, %v8474_v25, %v6543_v27  ;;  %v1950_v35 = vsel %vm719_vm1, %v8472_v22, %v6542_v29  ;;  %v5658_v25 = vld [vmem:[#allocation25] ss:$0 sm:$0xff] }
 0xe75   :  { %v6546_v23 = vpop.permute.xlu1 %6545 }
 0xe76   :  { %v6681_v39 = vpop.eup %6680  ;;  %v6548_v30 = vunpack.i.h.bf16 %v6546_v23  ;;  %v6547_v32 = vunpack.i.l.bf16 %v6546_v23 }
 0xe77   :  { %v1818_v19 = vsel %vm1136_vm3, %v6681_v39, 0.0 }
 0xe78   :  { %v6683_v24 = vpop.eup %6682  ;;  %1819 = vadd.xlane.f32.xlu0 %v1818_v19  ;;  %v1953_v43 = vsel %vm1952_vm4, %v1950_v35, %v6547_v32  ;;  %v1954_v44 = vsel %vm1952_vm4, %v1951_v34, %v6548_v30  ;;  %v5667_v34 = vld [vmem:[#allocation31] ss:$0 sm:$0xff] }
 0xe79   :  { %v1821_v26 = vsel %vm1136_vm3, %v6683_v24, 0.0 }
 0xe7c   :  { %1822 = vadd.xlane.f32.xlu0 %v1821_v26 }
 0xe92   :  { %1830 = vrot.lane.b32.xlu0 %v8421_v36, %s7885_s8 }
 0xf05   :  { %v1820_v56 = vpop.xlane.xlu0 %1819 }
 0xf06   :  { %6684 = vrcp.f32 %v1820_v56 }
 0xf09   :  { %v1823_v28 = vpop.xlane.xlu0 %1822 }
 0xf0a   :  { %6686 = vrcp.f32 %v1823_v28 }
 0xf0d   :  { %v1831_v31 = vpop.permute.xlu0 %1830 }
 0xf0e   :  { %v1836_v57 = vsel %vm1164_vm2, %v1831_v31, 0 }
 0xf0f   :  { %6056 = vmatpush3.bf16.msra.mxu0 %v1836_v57 }
 0xf10   :  { %v6685_v40 = vpop.eup %6684  ;;  %6067 = vmatprep.subr.bf16.mxu0 %v7881_v0 }
 0xf11   :  { %v1826_v58 = vmul.f32 %v6685_v40, %v6681_v39 }
 0xf13   :  { %v1828_v59 = vpack.c.bf16 %v1826_v58, %v1826_v58  ;;  %v6604_v58 = vld [vmem:[#allocation30 + $0x10] sm:$0xff]  }
 0xf14   :  { %v6687_v60 = vpop.eup %6686 }
 0xf15   :  { %6058 = vmatmul.mubr.msk.bf16.vlgmr.msra.gmra.mrb[36].mxu0 %vm1136_vm3, %v1828_v59  ;;  %v1827_v61 = vmul.f32 %v6687_v60, %v6683_v24  ;;  %v6605_v59 = vld [vmem:[#allocation30 + $0x18] sm:$0xff]   ;;  %v691_v60 = vld [vmem:[#allocation9] sm:$0xff] }
 0xf16   :  { %6083 = vmatprep.mubr.msk.bf16.mxu0 %vm7882_vm0, %v7881_v0  ;;  %6068 = vmatpush3.bf16.msra.mxu0 %v6596_v62  ;;  %v6606_v62 = vld [vmem:[#allocation30] sm:$0xff]  }
 0xf17   :  { %v1829_v36 = vpack.c.bf16 %v1827_v61, %v1827_v61  ;;  %6069 = vmatprep.subr.bf16.mxu0 %v7881_v0  ;;  %v692_v61 = vld [vmem:[#allocation9 + $0x8] sm:$0xff] }
 0xf19   :  { %6064 = vmatmul.mubr.msk.bf16.vlgmr.msra.gmra.mrb[36].mxu1 %vm1136_vm3, %v1829_v36  ;;  %v2128_v36 = vpack.c.bf16 %v692_v61, %v691_v60 }
 0xf1a   :  { %6091 = vmatprep.mubr.msk.bf16.mxu1 %vm7882_vm0, %v7881_v0  ;;  %6070 = vmatpush3.bf16.msra.mxu0 %v6597_v63  ;;  %v6607_v63 = vld [vmem:[#allocation30 + $0x8] sm:$0xff]  }
 0xf1b   :  { %6071 = vmatprep.subr.bf16.mxu0 %v7881_v0  ;;  %6088 = vmatpush3.bf16.msra.mxu1 %v6604_v58 }
 0xf1c   :  { %6089 = vmatprep.subr.bf16.mxu1 %v7881_v0 }
 0xf1e   :  { %6072 = vmatpush3.bf16.msra.mxu0 %v6598_v1 }
 0xf1f   :  { %6073 = vmatprep.subr.bf16.mxu0 %v7881_v0  ;;  %6090 = vmatpush3.bf16.msra.mxu1 %v6605_v59  ;;  %v5668_v59 = vld [vmem:[#allocation33] ss:$0 sm:$0xff] }
 0xf20   :  { %6095 = vmatprep.subr.bf16.mxu1 %v7881_v0 }
 0xf22   :  { %6074 = vmatpush3.bf16.msra.mxu0 %v6599_v2  ;;  %6092 = vmatmul.mubr.msk.bf16.vlgmr.msra.gmra.mrb[40].mxu1 %vm719_vm1, %v2128_v36  ;;  %v5669_v36 = vld [vmem:[#allocation34] ss:$0 sm:$0xff] }
 0xf23   :  { %6075 = vmatprep.subr.bf16.mxu0 %v7881_v0  ;;  %6099 = vmatprep.mubr.msk.bf16.mxu1 %vm7882_vm0, %v7881_v0 }
 0xf24   :  { %6096 = vmatpush3.bf16.msra.mxu1 %v6606_v62 }
 0xf25   :  { %6097 = vmatprep.subr.bf16.mxu1 %v7881_v0 }
 0xf26   :  { %6076 = vmatpush3.bf16.msra.mxu0 %v6600_v3 }
 0xf27   :  { %6077 = vmatprep.subr.bf16.mxu0 %v7881_v0 }
 0xf28   :  { %6098 = vmatpush3.bf16.msra.mxu1 %v6607_v63 }
 0xf2a   :  { %6078 = vmatpush3.bf16.msra.mxu0 %v6601_v4 }
 0xf2b   :  { %6079 = vmatprep.subr.bf16.mxu0 %v7881_v0 }
 0xf2e   :  { %6080 = vmatpush3.bf16.msra.mxu0 %v6602_v5 }
 0xf2f   :  { %6081 = vmatprep.subr.bf16.mxu0 %v7881_v0 }
 0xf32   :  { %6082 = vmatpush3.bf16.msra.mxu0 %v6603_v38 }
 0xf33   :  { %6111 = vmatprep.subr.bf16.mxu0 %v7881_v0 }
 0xfe8   :  { %v1872_v6 = vpop.f32.mrb[36].mxu0 }
 0xfe9   :  { %v6059_v9 = vpop.f32.mrb[37].mxu0 }
 0xfea   :  { %v1875_v10 = vpop.f32.mrb[38].mxu0 }
 0xfeb   :  { %v6060_v11 = vpop.f32.mrb[39].mxu0  ;;  %v5659_v10 = vld [vmem:[#allocation27] ss:$0 sm:$0xff] }
 0xfec   :  { %v1920_v13 = vpop.f32.mrb[36].mxu1 }
 0xfed   :  { %v6549_v15 = vpack.i.bf16 %v1920_v13, %v1872_v6  ;;  %v6065_v17 = vpop.f32.mrb[37].mxu1 }
 0xfee   :  { %v1923_v18 = vpop.f32.mrb[38].mxu1  ;;  %v5660_v17 = vld [vmem:[#allocation28] ss:$0 sm:$0xff] }
 0xfef   :  { %6550 = vrot.lane.b32.xlu0 %v6549_v15, %s7884_s13  ;;  %v6066_v20 = vpop.f32.mrb[39].mxu1 }
 0xff5   :  { %v2178_v27 = vpop.f32.mrb[40].mxu1 }
 0xff6   :  { %v6093_v29 = vpop.f32.mrb[41].mxu1 }
 0xff7   :  { %v2181_v30 = vpop.f32.mrb[42].mxu1 }
 0xff8   :  { %v6094_v32 = vpop.f32.mrb[43].mxu1 }
0x1061   :  { %v6551_v33 = vpop.permute.xlu0 %6550 }
0x1062   :  { %v6553_v37 = vunpack.i.h.bf16 %v6551_v33  ;;  %v6552_v41 = vunpack.i.l.bf16 %v6551_v33 }
0x1064   :  { %v1957_v45 = vsel %vm1955_vm5, %v1954_v44, %v6553_v37  ;;  %v1956_v46 = vsel %vm1955_vm5, %v1953_v43, %v6552_v41 }
0x1065   :  { %v1958_v47 = vpack.c.bf16 %v1957_v45, %v1956_v46 }
0x1067   :  { %6084 = vmatmul.mubr.bf16.vlgmr.msra.gmra.mrb[40].mxu0 %v1958_v47 }
0x1068   :  { %6113 = vmatprep.mubr.msk.bf16.mxu0 %vm7882_vm0, %v7881_v0 }
0x113a   :  { %v2057_v48 = vpop.f32.mrb[40].mxu0 }
0x113b   :  { %v2064_v49 = vadd.f32 %v2057_v48, %v8391_v7  ;;  %v6085_v22 = vpop.f32.mrb[41].mxu0 }
0x113c   :  { %v2060_v50 = vpop.f32.mrb[42].mxu0 }
0x113d   :  { %v2065_v51 = vadd.f32 %v2060_v50, %v8393_v8  ;;  %v6086_v52 = vpop.f32.mrb[43].mxu0  ;;  %v2073_v53 = vadd.f32 %v5658_v25, %v2064_v49 }
0x113f   :  { %v2077_v54 = vsel %vm719_vm1, %v2073_v53, 0.0  ;;  %v2074_v55 = vadd.f32 %v5658_v25, %v2065_v51 }
0x1140   :  { %2078 = vadd.xlane.f32.xlu1 %v2077_v54 }
0x1141   :  { %v2080_v39 = vsel %vm719_vm1, %v2074_v55, 0.0 }
0x1142   :  { %2081 = vadd.xlane.f32.xlu0 %v2080_v39 }
0x11cd   :  { %v2079_v19 = vpop.xlane.xlu1 %2078 }
0x11ce   :  { %v2083_v24 = vmul.f32 0.03125, %v2079_v19  ;;  %v6608_v19 = vld [vmem:[#allocation36] ss:$12 sps:$4 sm:$0xff]  }
0x11cf   :  { %v2082_v26 = vpop.xlane.xlu0 %2081 }
0x11d0   :  { %v2085_v56 = vsub.f32 %v2073_v53, %v2083_v24  ;;  %v2084_v28 = vmul.f32 0.03125, %v2082_v26  ;;  %v6610_v24 = vld [vmem:[#allocation36 + $0x4] ss:$12 sps:$4 sm:$0xff]   ;;  %v6613_v26 = vld [vmem:[#allocation36 + $0x1c] ss:$12 sps:$4 sm:$0xff]  }
0x11d1   :  { %2369 = vmatprep.subr.bf16.mxu1 %v6610_v24 }
0x11d2   :  { %v2086_v31 = vsub.f32 %v2074_v55, %v2084_v28  ;;  %v2087_v7 = vmul.f32 %v2085_v56, %v2085_v56 }
0x11d4   :  { %v2089_v57 = vsel %vm719_vm1, %v2087_v7, 0.0  ;;  %v2088_v40 = vmul.f32 %v2086_v31, %v2086_v31 }
0x11d5   :  { %2090 = vadd.xlane.f32.xlu0 %v2089_v57 }
0x11d6   :  { %v2092_v8 = vsel %vm719_vm1, %v2088_v40, 0.0 }
0x11d9   :  { %2093 = vadd.xlane.f32.xlu0 %v2092_v8 }
0x1262   :  { %v2091_v1 = vpop.xlane.xlu0 %2090 }
0x1263   :  { %v2095_v2 = vmul.f32 0.03125, %v2091_v1 }
0x1265   :  { %v2097_v3 = vadd.f32 1e-05, %v2095_v2 }
0x1266   :  { %v2094_v4 = vpop.xlane.xlu0 %2093 }
0x1267   :  { %6688 = vrsqrt.f32 %v2097_v3  ;;  %v2096_v5 = vmul.f32 0.03125, %v2094_v4 }
0x1269   :  { %v2098_v38 = vadd.f32 1e-05, %v2096_v5 }
0x126b   :  { %6690 = vrsqrt.f32 %v2098_v38 }
0x1271   :  { %v6689_v6 = vpop.eup %6688 }
0x1272   :  { %v2101_v9 = vmul.f32 %v6689_v6, %v2085_v56  ;;  %v6611_v56 = vld [vmem:[#allocation36 + $0x18] ss:$12 sps:$4 sm:$0xff]  }
0x1274   :  { %v2109_v13 = vmul.f32 %v5659_v10, %v2101_v9 }
0x1275   :  { %v6691_v11 = vpop.eup %6690 }
0x1276   :  { %v2102_v15 = vmul.f32 %v6691_v11, %v2086_v31  ;;  %v2117_v20 = vadd.f32 %v5660_v17, %v2109_v13 }
0x1278   :  { %v2110_v18 = vmul.f32 %v5659_v10, %v2102_v15 }
0x127a   :  { %v2118_v21 = vadd.f32 %v5660_v17, %v2110_v18  ;;  %v6614_v18 = vld [vmem:[#allocation36 + $0x8] ss:$12 sps:$4 sm:$0xff]  }
0x127c   :  { %v2127_v23 = vpack.c.bf16 %v2118_v21, %v2117_v20  ;;  %v6615_v21 = vld [vmem:[#allocation36 + $0x20] ss:$12 sps:$4 sm:$0xff]  }
0x127e   :  { %6100 = vmatmul.mubr.msk.bf16.vlgmr.msra.gmra.mrb[44].mxu1 %vm719_vm1, %v2127_v23  ;;  %v2317_v23 = vld [vmem:[#allocation37] sm:$0x7] }
0x127f   :  { %2401 = vmatprep.mubr.bf16.mxu1 %v7883_v42  ;;  %2370 = vmatpush1.bf16.msra.mxu1 %v6608_v19 }
0x1280   :  { %2371 = vmatprep.subr.bf16.mxu1 %v6613_v26 }
0x1283   :  { %2372 = vmatpush1.bf16.msra.mxu1 %v6611_v56 }
0x1284   :  { %6103 = vmatprep.subr.bf16.mxu1 %v7881_v0 }
0x1351   :  { %v2234_v33 = vpop.f32.mrb[44].mxu1 }
0x1352   :  { %v2235_v35 = vadd.f32 %v2234_v33, %v2178_v27  ;;  %v6101_v37 = vpop.f32.mrb[45].mxu1  ;;  %v2326_v27 = vrot.slane %v2317_v23, %v8403_v12 }
0x1353   :  { %v2237_v41 = vpop.f32.mrb[46].mxu1 }
0x1354   :  { %v2238_v43 = vadd.f32 %v2237_v41, %v2181_v30  ;;  %v6102_v44 = vpop.f32.mrb[47].mxu1  ;;  %v2248_v45 = vadd.f32 %v5667_v34, %v2235_v35  ;;  %v2322_v35 = vrot.slane %v2317_v23, %v8408_v16 }
0x1356   :  { %v2252_v46 = vsel %vm719_vm1, %v2248_v45, 0.0  ;;  %v2249_v47 = vadd.f32 %v5667_v34, %v2238_v43  ;;  %v2330_v43 = vrot.slane %v2317_v23, %v8405_v14 }
0x1357   :  { %2253 = vadd.xlane.f32.xlu1 %v2252_v46 }
0x1358   :  { %v2255_v48 = vsel %vm719_vm1, %v2249_v47, 0.0 }
0x1359   :  { %2256 = vadd.xlane.f32.xlu0 %v2255_v48 }
0x13e4   :  { %v2254_v25 = vpop.xlane.xlu1 %2253 }
0x13e5   :  { %v2258_v49 = vmul.f32 0.03125, %v2254_v25 }
0x13e6   :  { %v2257_v22 = vpop.xlane.xlu0 %2256 }
0x13e7   :  { %v2260_v50 = vsub.f32 %v2248_v45, %v2258_v49  ;;  %v2259_v51 = vmul.f32 0.03125, %v2257_v22 }
0x13e9   :  { %v2261_v52 = vsub.f32 %v2249_v47, %v2259_v51  ;;  %v2262_v53 = vmul.f32 %v2260_v50, %v2260_v50 }
0x13eb   :  { %v2264_v54 = vsel %vm719_vm1, %v2262_v53, 0.0  ;;  %v2263_v55 = vmul.f32 %v2261_v52, %v2261_v52 }
0x13ec   :  { %2265 = vadd.xlane.f32.xlu1 %v2264_v54 }
0x13ed   :  { %v2267_v39 = vsel %vm719_vm1, %v2263_v55, 0.0 }
0x13ee   :  { %2268 = vadd.xlane.f32.xlu0 %v2267_v39 }
0x1479   :  { %v2266_v28 = vpop.xlane.xlu1 %2265 }
0x147a   :  { %v2270_v31 = vmul.f32 0.03125, %v2266_v28 }
0x147b   :  { %v2269_v7 = vpop.xlane.xlu0 %2268 }
0x147c   :  { %v2272_v57 = vadd.f32 1e-05, %v2270_v31  ;;  %v2271_v40 = vmul.f32 0.03125, %v2269_v7 }
0x147e   :  { %6692 = vrsqrt.f32 %v2272_v57  ;;  %v2273_v8 = vadd.f32 1e-05, %v2271_v40 }
0x1480   :  { %6694 = vrsqrt.f32 %v2273_v8 }
0x1488   :  { %v6693_v58 = vpop.eup %6692 }
0x1489   :  { %v2276_v60 = vmul.f32 %v6693_v58, %v2260_v50 }
0x148a   :  { %v6695_v61 = vpop.eup %6694 }
0x148b   :  { %v2284_v62 = vmul.f32 %v5668_v59, %v2276_v60  ;;  %v2277_v63 = vmul.f32 %v6695_v61, %v2261_v52 }
0x148d   :  { %v2285_v1 = vmul.f32 %v5668_v59, %v2277_v63  ;;  %v2292_v2 = vadd.f32 %v5669_v36, %v2284_v62 }
0x148f   :  { %v2293_v3 = vadd.f32 %v5669_v36, %v2285_v1  ;;  %v5670_v4 = vmul.f32 -1.442695, %v2292_v2 }
0x1491   :  { %6696 = vpow2.f32 %v5670_v4  ;;  %v5671_v5 = vmul.f32 -1.442695, %v2293_v3 }
0x1493   :  { %6698 = vpow2.f32 %v5671_v5 }
0x149b   :  { %v6697_v38 = vpop.eup %6696 }
0x149c   :  { %v2300_v6 = vadd.f32 1.0, %v6697_v38 }
0x149d   :  { %v6699_v9 = vpop.eup %6698 }
0x149e   :  { %v2301_v10 = vadd.f32 1.0, %v6699_v9  ;;  %6700 = vrcp.f32 %v2300_v6 }
0x14a0   :  { %6702 = vrcp.f32 %v2301_v10 }
0x14a8   :  { %v6701_v11 = vpop.eup %6700 }
0x14a9   :  { %v8615_v15 = vmul.f32 %v6701_v11, %v2292_v2 }
0x14aa   :  { %v6703_v13 = vpop.eup %6702 }
0x14ab   :  { %v8617_v17 = vmul.f32 %v6703_v13, %v2293_v3 }
0x14ad   :  { %v2308_v20 = vpack.c.bf16 %v8617_v17, %v8615_v15 }
0x14af   :  { %5678 = vmatmul.mubr.msk.bf16.vlgmr.msra.gmra.mrb[48].mxu1 %vm719_vm1, %v2308_v20 }
0x14b0   :  { %6104 = vmatpush3.bf16.msra.mxu1 %v6614_v18  ;;  %6107 = vmatprep.mubr.msk.bf16.mxu1 %vm7882_vm0, %v7881_v0 }
0x14b1   :  { %6105 = vmatprep.subr.bf16.mxu1 %v7881_v0 }
0x14b4   :  { %6106 = vmatpush3.bf16.msra.mxu1 %v6615_v21 }
0x14b5   :  { %6117 = vmatprep.subr.bf16.mxu1 %v7881_v0 }
0x14b7   :  { %6108 = vmatmul.mubr.msk.bf16.vlgmr.msra.gmra.mrb[52].mxu1 %vm719_vm1, %v2308_v20 }
0x14b8   :  { %6119 = vmatprep.mubr.msk.bf16.mxu1 %vm7882_vm0, %v7881_v0 }
0x1582   :  { %v2403_v29 = vpop.f32.mrb[48].mxu1 }
0x1583   :  { %v2405_v30 = vpop.f32.mrb[49].mxu1  ;;  %v2404_v46 = vadd.f32 %v2403_v29, %v2322_v35 }
0x1584   :  { %v2406_v32 = vadd.f32 %v2405_v30, %v2326_v27  ;;  %v2407_v33 = vpop.f32.mrb[50].mxu1 }
0x1585   :  { %v2409_v34 = vpop.f32.mrb[51].mxu1  ;;  %v2408_v22 = vadd.f32 %v2407_v33, %v2322_v35  ;;  %v8644_v54 = vpack.c.bf16 %v2404_v46, %v2404_v46 }
0x1586   :  { %v8631_v37 = vpack.c.bf16 %v2406_v32, %v2406_v32  ;;  %v2410_v41 = vadd.f32 %v2409_v34, %v2326_v27 }
0x1587   :  { %v8650_v19 = vpack.c.bf16 %v2408_v22, %v2408_v22 }
0x1588   :  { %v8634_v44 = vpack.c.bf16 %v2410_v41, %v2410_v41  ;;  %v2463_v45 = vsel %vm719_vm1, %v8631_v37, 0 }
0x1589   :  { %6112 = vmatpush3.bf16.xpose.msra.mxu0 %v2463_v45 }
0x158a   :  { %v2446_v47 = vpop.f32.mrb[52].mxu1  ;;  %v2509_v48 = vsel %vm719_vm1, %v8634_v44, 0  ;;  %6123 = vmatprep.subr.bf16.mxu0 %v7881_v0 }
0x158b   :  { %v2447_v25 = vadd.f32 %v2446_v47, %v2330_v43  ;;  %v6109_v49 = vpop.f32.mrb[53].mxu1  ;;  %6118 = vmatpush3.bf16.xpose.msra.mxu1 %v2509_v48 }
0x158c   :  { %v2449_v50 = vpop.f32.mrb[54].mxu1  ;;  %6129 = vmatprep.subr.bf16.mxu1 %v7881_v0 }
0x158d   :  { %v8642_v51 = vpack.c.bf16 %v2447_v25, %v2447_v25  ;;  %v2450_v52 = vadd.f32 %v2449_v50, %v2330_v43  ;;  %v6110_v53 = vpop.f32.mrb[55].mxu1 }
0x158f   :  { %v8646_v55 = vpack.c.bf16 %v2450_v52, %v2450_v52  ;;  %v2581_v39 = vsel %vm1164_vm2, %v8642_v51, 0 }
0x1590   :  { %6114 = vmatmul.mubr.msk.bf16.vlgmr.msra.gmra.mrb[44].mxu0 %vm719_vm1, %v8644_v54 }
0x1591   :  { %6124 = vmatpush3.bf16.msra.mxu0 %v2581_v39  ;;  %v2627_v24 = vsel %vm1164_vm2, %v8646_v55, 0  ;;  %6125 = vmatprep.mubr.msk.bf16.mxu0 %vm7882_vm0, %v7881_v0 }
0x1592   :  { %6120 = vmatmul.mubr.msk.bf16.vlgmr.msra.gmra.mrb[56].mxu1 %vm719_vm1, %v8650_v19  ;;  %6135 = vmatprep.subr.bf16.mxu0 %v7881_v0 }
0x1593   :  { %6130 = vmatpush3.bf16.msra.mxu1 %v2627_v24  ;;  %6131 = vmatprep.mubr.msk.bf16.mxu1 %vm7882_vm0, %v7881_v0 }
0x1594   :  { %6141 = vmatprep.subr.bf16.mxu1 %v7881_v0 }
0x1663   :  { %v2499_v26 = vpop.f32.mrb[44].mxu0 }
0x1664   :  { %v2551_v56 = vmul.f32 0.17677669, %v2499_v26  ;;  %v6115_v28 = vpop.f32.mrb[45].mxu0 }
0x1665   :  { %v2502_v31 = vpop.f32.mrb[46].mxu0  ;;  %v2545_v7 = vpop.f32.mrb[56].mxu1 }
0x1666   :  { %v2552_v57 = vmul.f32 0.17677669, %v2545_v7  ;;  %v6116_v40 = vpop.f32.mrb[47].mxu0  ;;  %v6121_v8 = vpop.f32.mrb[57].mxu1  ;;  %v2553_v58 = vsel %vm1136_vm3, %v2551_v56, -inf }
0x1667   :  { %v2548_v59 = vpop.f32.mrb[58].mxu1  ;;  %2554 = vmax.xlane.f32.xlu1 %v2553_v58 }
0x1668   :  { %v6122_v60 = vpop.f32.mrb[59].mxu1  ;;  %v2556_v61 = vsel %vm1136_vm3, %v2552_v57, -inf }
0x1669   :  { %2557 = vmax.xlane.f32.xlu0 %v2556_v61 }
0x1678   :  { %2673 = vrot.lane.b32.xlu1 %v8631_v37, %s7884_s13 }
0x16f4   :  { %v2555_v36 = vpop.xlane.xlu1 %2554 }
0x16f5   :  { %v2559_v62 = vsub.f32 %v2551_v56, %v2555_v36 }
0x16f6   :  { %v2558_v63 = vpop.xlane.xlu0 %2557 }
0x16f7   :  { %v2561_v1 = vmul.f32 1.442695, %v2559_v62  ;;  %v2560_v2 = vsub.f32 %v2552_v57, %v2558_v63 }
0x16f8   :  { %v2674_v9 = vpop.permute.xlu1 %2673 }
0x16f9   :  { %6704 = vpow2.f32 %v2561_v1  ;;  %v2563_v3 = vmul.f32 1.442695, %v2560_v2  ;;  %v2679_v29 = vsel %vm719_vm1, %v2674_v9, 0 }
0x16fb   :  { %6706 = vpow2.f32 %v2563_v3 }
0x1703   :  { %v6705_v4 = vpop.eup %6704 }
0x1704   :  { %v2565_v5 = vsel %vm1136_vm3, %v6705_v4, 0.0 }
0x1705   :  { %v6707_v38 = vpop.eup %6706  ;;  %2566 = vadd.xlane.f32.xlu1 %v2565_v5 }
0x1706   :  { %v2568_v6 = vsel %vm1136_vm3, %v6707_v38, 0.0 }
0x1707   :  { %2569 = vadd.xlane.f32.xlu0 %v2568_v6 }
0x1716   :  { %2670 = vrot.lane.b32.xlu1 %v8644_v54, %s7884_s13 }
0x171a   :  { %2722 = vrot.lane.b32.xlu1 %v8650_v19, %s7884_s13 }
0x171d   :  { %2725 = vrot.lane.b32.xlu0 %v8634_v44, %s7884_s13 }
0x1792   :  { %v2567_v10 = vpop.xlane.xlu1 %2566 }
0x1793   :  { %6708 = vrcp.f32 %v2567_v10 }
0x1794   :  { %v2570_v11 = vpop.xlane.xlu0 %2569 }
0x1795   :  { %6710 = vrcp.f32 %v2570_v11 }
0x1796   :  { %v2671_v33 = vpop.permute.xlu1 %2670 }
0x1798   :  { %v2726_v27 = vpop.permute.xlu0 %2725 }
0x1799   :  { %v2731_v32 = vsel %vm719_vm1, %v2726_v27, 0 }
0x179a   :  { %v2723_v34 = vpop.permute.xlu1 %2722 }
0x179d   :  { %v6709_v13 = vpop.eup %6708 }
0x179e   :  { %v2573_v18 = vmul.f32 %v6709_v13, %v6705_v4 }
0x179f   :  { %v6711_v20 = vpop.eup %6710 }
0x17a0   :  { %v2574_v21 = vmul.f32 %v6711_v20, %v6707_v38  ;;  %v2575_v23 = vpack.c.bf16 %v2573_v18, %v2573_v18 }
0x17a2   :  { %6126 = vmatmul.mubr.msk.bf16.vlgmr.msra.gmra.mrb[48].mxu0 %vm1136_vm3, %v2575_v23  ;;  %v2576_v30 = vpack.c.bf16 %v2574_v21, %v2574_v21 }
0x17a3   :  { %6136 = vmatpush3.bf16.xpose.msra.mxu0 %v2679_v29  ;;  %6137 = vmatprep.mubr.msk.bf16.mxu0 %vm7882_vm0, %v7881_v0 }
0x17a4   :  { %6132 = vmatmul.mubr.msk.bf16.vlgmr.msra.gmra.mrb[60].mxu1 %vm1136_vm3, %v2576_v30  ;;  %6147 = vmatprep.subr.bf16.mxu0 %v7881_v0 }
0x17a5   :  { %6142 = vmatpush3.bf16.xpose.msra.mxu1 %v2731_v32  ;;  %6143 = vmatprep.mubr.msk.bf16.mxu1 %vm7882_vm0, %v7881_v0 }
0x17a6   :  { %6153 = vmatprep.subr.bf16.mxu1 %v7881_v0 }
0x17aa   :  { %6138 = vmatmul.mubr.msk.bf16.vlgmr.msra.gmra.mrb[52].mxu0 %vm719_vm1, %v2671_v33 }
0x17ab   :  { %6149 = vmatprep.mubr.msk.bf16.mxu0 %vm7882_vm0, %v7881_v0 }
0x17ac   :  { %6144 = vmatmul.mubr.msk.bf16.vlgmr.msra.gmra.mrb[64].mxu1 %vm719_vm1, %v2723_v34 }
0x17ad   :  { %6155 = vmatprep.mubr.msk.bf16.mxu1 %vm7882_vm0, %v7881_v0 }
0x1875   :  { %v8692_v35 = vpop.f32.mrb[48].mxu0 }
0x1876   :  { %v6127_v41 = vpop.f32.mrb[49].mxu0 }
0x1877   :  { %v2620_v43 = vpop.f32.mrb[50].mxu0  ;;  %v8694_v45 = vpop.f32.mrb[60].mxu1 }
0x1878   :  { %v6128_v46 = vpop.f32.mrb[51].mxu0  ;;  %v6133_v47 = vpop.f32.mrb[61].mxu1 }
0x1879   :  { %v2666_v48 = vpop.f32.mrb[62].mxu1 }
0x187a   :  { %v6134_v25 = vpop.f32.mrb[63].mxu1 }
0x187d   :  { %v2715_v49 = vpop.f32.mrb[52].mxu0 }
0x187e   :  { %v2773_v22 = vmul.f32 0.17677669, %v2715_v49  ;;  %v6139_v50 = vpop.f32.mrb[53].mxu0 }
0x187f   :  { %v2718_v52 = vpop.f32.mrb[54].mxu0  ;;  %v2767_v53 = vpop.f32.mrb[64].mxu1 }
0x1880   :  { %v2774_v39 = vmul.f32 0.17677669, %v2767_v53  ;;  %v6140_v24 = vpop.f32.mrb[55].mxu0  ;;  %v6145_v26 = vpop.f32.mrb[65].mxu1  ;;  %v2775_v56 = vsel %vm1136_vm3, %v2773_v22, -inf }
0x1881   :  { %v2770_v28 = vpop.f32.mrb[66].mxu1  ;;  %2776 = vmax.xlane.f32.xlu1 %v2775_v56 }
0x1882   :  { %v6146_v31 = vpop.f32.mrb[67].mxu1  ;;  %v2778_v7 = vsel %vm1136_vm3, %v2774_v39, -inf }
0x1883   :  { %2779 = vmax.xlane.f32.xlu0 %v2778_v7 }
0x1892   :  { %2800 = vrot.lane.b32.xlu1 %v8642_v51, %s7884_s13 }
0x1896   :  { %2899 = vrot.lane.b32.xlu1 %v8631_v37, %s7860_s14 }
0x189a   :  { %2949 = vrot.lane.b32.xlu1 %v8634_v44, %s7860_s14 }
0x189e   :  { %2897 = vrot.lane.b32.xlu1 %v8644_v54, %s7860_s14 }
0x190e   :  { %v2777_v57 = vpop.xlane.xlu1 %2776 }
0x190f   :  { %v2781_v40 = vsub.f32 %v2773_v22, %v2777_v57 }
0x1910   :  { %v2780_v8 = vpop.xlane.xlu0 %2779 }
0x1911   :  { %v2783_v58 = vmul.f32 1.442695, %v2781_v40  ;;  %v2782_v59 = vsub.f32 %v2774_v39, %v2780_v8 }
0x1912   :  { %v2801_v60 = vpop.permute.xlu1 %2800 }
0x1913   :  { %6712 = vpow2.f32 %v2783_v58  ;;  %v2785_v61 = vmul.f32 1.442695, %v2782_v59  ;;  %v2806_v36 = vsel %vm1164_vm2, %v2801_v60, 0 }
0x1914   :  { %6148 = vmatpush3.bf16.msra.mxu0 %v2806_v36 }
0x1915   :  { %6714 = vpow2.f32 %v2785_v61  ;;  %6159 = vmatprep.subr.bf16.mxu0 %v7881_v0 }
0x1916   :  { %v2900_v9 = vpop.permute.xlu1 %2899 }
0x1917   :  { %v2905_v18 = vsel %vm719_vm1, %v2900_v9, 0 }
0x191a   :  { %v2950_v21 = vpop.permute.xlu1 %2949 }
0x191b   :  { %v2955_v27 = vsel %vm719_vm1, %v2950_v21, 0 }
0x191d   :  { %v6713_v62 = vpop.eup %6712 }
0x191e   :  { %v2787_v63 = vsel %vm1136_vm3, %v6713_v62, 0.0  ;;  %v2898_v29 = vpop.permute.xlu1 %2897 }
0x191f   :  { %v6715_v1 = vpop.eup %6714  ;;  %2788 = vadd.xlane.f32.xlu0 %v2787_v63 }
0x1920   :  { %v2790_v2 = vsel %vm1136_vm3, %v6715_v1, 0.0 }
0x1923   :  { %2791 = vadd.xlane.f32.xlu0 %v2790_v2 }
0x1939   :  { %2849 = vrot.lane.b32.xlu0 %v8646_v55, %s7884_s13 }
0x193d   :  { %2947 = vrot.lane.b32.xlu0 %v8650_v19, %s7860_s14 }
0x19ac   :  { %v2789_v3 = vpop.xlane.xlu0 %2788 }
0x19ad   :  { %6716 = vrcp.f32 %v2789_v3 }
0x19b0   :  { %v2792_v4 = vpop.xlane.xlu0 %2791 }
0x19b1   :  { %6718 = vrcp.f32 %v2792_v4 }
0x19b4   :  { %v2850_v5 = vpop.permute.xlu0 %2849 }
0x19b5   :  { %v2855_v38 = vsel %vm1164_vm2, %v2850_v5, 0 }
0x19b6   :  { %6154 = vmatpush3.bf16.msra.mxu1 %v2855_v38 }
0x19b7   :  { %v6717_v6 = vpop.eup %6716  ;;  %6165 = vmatprep.subr.bf16.mxu1 %v7881_v0 }
0x19b8   :  { %v2795_v10 = vmul.f32 %v6717_v6, %v6713_v62  ;;  %v2948_v30 = vpop.permute.xlu0 %2947 }
0x19ba   :  { %v2797_v11 = vpack.c.bf16 %v2795_v10, %v2795_v10 }
0x19bb   :  { %v6719_v13 = vpop.eup %6718 }
0x19bc   :  { %v2796_v20 = vmul.f32 %v6719_v13, %v6715_v1  ;;  %6150 = vmatmul.mubr.msk.bf16.vlgmr.msra.gmra.mrb[56].mxu0 %vm1136_vm3, %v2797_v11 }
0x19bd   :  { %6160 = vmatpush3.bf16.xpose.msra.mxu0 %v2905_v18  ;;  %6161 = vmatprep.mubr.msk.bf16.mxu0 %vm7882_vm0, %v7881_v0 }
0x19be   :  { %v2798_v23 = vpack.c.bf16 %v2796_v20, %v2796_v20  ;;  %6171 = vmatprep.subr.bf16.mxu0 %v7881_v0 }
0x19c0   :  { %6156 = vmatmul.mubr.msk.bf16.vlgmr.msra.gmra.mrb[68].mxu1 %vm1136_vm3, %v2798_v23 }
0x19c1   :  { %6166 = vmatpush3.bf16.xpose.msra.mxu1 %v2955_v27  ;;  %6167 = vmatprep.mubr.msk.bf16.mxu1 %vm7882_vm0, %v7881_v0 }
0x19c2   :  { %6177 = vmatprep.subr.bf16.mxu1 %v7881_v0 }
0x19c4   :  { %6162 = vmatmul.mubr.msk.bf16.vlgmr.msra.gmra.mrb[60].mxu0 %vm719_vm1, %v2898_v29 }
0x19c5   :  { %6173 = vmatprep.mubr.msk.bf16.mxu0 %vm7882_vm0, %v7881_v0 }
0x19c8   :  { %6168 = vmatmul.mubr.msk.bf16.vlgmr.msra.gmra.mrb[72].mxu1 %vm719_vm1, %v2948_v30 }
0x19c9   :  { %6179 = vmatprep.mubr.msk.bf16.mxu1 %vm7882_vm0, %v7881_v0 }
0x1a8f   :  { %v8732_v32 = vpop.f32.mrb[56].mxu0 }
0x1a90   :  { %v6151_v33 = vpop.f32.mrb[57].mxu0 }
0x1a91   :  { %v2845_v34 = vpop.f32.mrb[58].mxu0 }
0x1a92   :  { %v6152_v41 = vpop.f32.mrb[59].mxu0 }
0x1a93   :  { %v8734_v43 = vpop.f32.mrb[68].mxu1 }
0x1a94   :  { %v6554_v46 = vpack.i.bf16 %v8734_v43, %v8732_v32  ;;  %v6157_v47 = vpop.f32.mrb[69].mxu1 }
0x1a95   :  { %v2894_v48 = vpop.f32.mrb[70].mxu1 }
0x1a96   :  { %v6158_v25 = vpop.f32.mrb[71].mxu1 }
0x1a97   :  { %v2941_v49 = vpop.f32.mrb[60].mxu0 }
0x1a98   :  { %v2997_v22 = vmul.f32 0.17677669, %v2941_v49  ;;  %v6163_v50 = vpop.f32.mrb[61].mxu0 }
0x1a99   :  { %v2944_v52 = vpop.f32.mrb[62].mxu0 }
0x1a9a   :  { %v6164_v53 = vpop.f32.mrb[63].mxu0  ;;  %v2999_v39 = vsel %vm1136_vm3, %v2997_v22, -inf }
0x1a9b   :  { %v2991_v24 = vpop.f32.mrb[72].mxu1  ;;  %3000 = vmax.xlane.f32.xlu1 %v2999_v39 }
0x1a9c   :  { %v2998_v26 = vmul.f32 0.17677669, %v2991_v24  ;;  %v6169_v56 = vpop.f32.mrb[73].mxu1 }
0x1a9d   :  { %v2994_v28 = vpop.f32.mrb[74].mxu1 }
0x1a9e   :  { %v6170_v31 = vpop.f32.mrb[75].mxu1  ;;  %v3002_v7 = vsel %vm1136_vm3, %v2998_v26, -inf }
0x1a9f   :  { %3003 = vmax.xlane.f32.xlu0 %v3002_v7 }
0x1aac   :  { %3023 = vrot.lane.b32.xlu1 %v8642_v51, %s7860_s14 }
0x1ab0   :  { %3121 = vrot.lane.b32.xlu1 %v8631_v37, %s7885_s8 }
0x1ab4   :  { %3171 = vrot.lane.b32.xlu1 %v8634_v44, %s7885_s8 }
0x1ab8   :  { %3119 = vrot.lane.b32.xlu1 %v8644_v54, %s7885_s8 }
0x1b28   :  { %v3001_v57 = vpop.xlane.xlu1 %3000 }
0x1b29   :  { %v3005_v40 = vsub.f32 %v2997_v22, %v3001_v57 }
0x1b2b   :  { %v3007_v8 = vmul.f32 1.442695, %v3005_v40 }
0x1b2c   :  { %v3004_v58 = vpop.xlane.xlu0 %3003  ;;  %v3024_v59 = vpop.permute.xlu1 %3023 }
0x1b2d   :  { %6720 = vpow2.f32 %v3007_v8  ;;  %v3006_v60 = vsub.f32 %v2998_v26, %v3004_v58  ;;  %v3029_v61 = vsel %vm1164_vm2, %v3024_v59, 0 }
0x1b2e   :  { %6172 = vmatpush3.bf16.msra.mxu0 %v3029_v61 }
0x1b2f   :  { %v3009_v36 = vmul.f32 1.442695, %v3006_v60  ;;  %6183 = vmatprep.subr.bf16.mxu0 %v7881_v0 }
0x1b30   :  { %v3122_v5 = vpop.permute.xlu1 %3121 }
0x1b31   :  { %6722 = vpow2.f32 %v3009_v36  ;;  %v3127_v10 = vsel %vm719_vm1, %v3122_v5, 0  ;;  %v6617_v5 = vld [vmem:[#allocation39 + $0x8] sm:$0xff]  }
0x1b37   :  { %v6721_v37 = vpop.eup %6720 }
0x1b38   :  { %v3011_v44 = vsel %vm1136_vm3, %v6721_v37, 0.0 }
0x1b39   :  { %3012 = vadd.xlane.f32.xlu0 %v3011_v44 }
0x1b3b   :  { %v6723_v62 = vpop.eup %6722 }
0x1b3c   :  { %v3014_v54 = vsel %vm1136_vm3, %v6723_v62, 0.0 }
0x1b3d   :  { %3015 = vadd.xlane.f32.xlu0 %v3014_v54 }
0x1b53   :  { %3071 = vrot.lane.b32.xlu0 %v8646_v55, %s7860_s14 }
0x1b57   :  { %3169 = vrot.lane.b32.xlu0 %v8650_v19, %s7885_s8  ;;  %v3172_v19 = vpop.permute.xlu1 %3171 }
0x1b58   :  { %v3177_v18 = vsel %vm719_vm1, %v3172_v19, 0  ;;  %v6623_v19 = vld [vmem:[#allocation39 + $0x38] sm:$0xff]  }
0x1b5b   :  { %v3120_v20 = vpop.permute.xlu1 %3119 }
0x1bc6   :  { %v3013_v63 = vpop.xlane.xlu0 %3012 }
0x1bc7   :  { %6724 = vrcp.f32 %v3013_v63 }
0x1bca   :  { %v3016_v1 = vpop.xlane.xlu0 %3015 }
0x1bcb   :  { %6726 = vrcp.f32 %v3016_v1 }
0x1bce   :  { %v3072_v2 = vpop.permute.xlu0 %3071 }
0x1bcf   :  { %v3077_v3 = vsel %vm1164_vm2, %v3072_v2, 0 }
0x1bd0   :  { %6178 = vmatpush3.bf16.msra.mxu1 %v3077_v3 }
0x1bd1   :  { %v6725_v4 = vpop.eup %6724  ;;  %6189 = vmatprep.subr.bf16.mxu1 %v7881_v0 }
0x1bd2   :  { %v3019_v38 = vmul.f32 %v6725_v4, %v6721_v37  ;;  %v3170_v21 = vpop.permute.xlu0 %3169  ;;  %v6616_v4 = vld [vmem:[#allocation39] sm:$0xff]  }
0x1bd4   :  { %v3021_v6 = vpack.c.bf16 %v3019_v38, %v3019_v38  ;;  %v6618_v38 = vld [vmem:[#allocation39 + $0x10] sm:$0xff]  }
0x1bd5   :  { %v6727_v9 = vpop.eup %6726 }
0x1bd6   :  { %v3020_v11 = vmul.f32 %v6727_v9, %v6723_v62  ;;  %6174 = vmatmul.mubr.msk.bf16.vlgmr.msra.gmra.mrb[64].mxu0 %vm1136_vm3, %v3021_v6  ;;  %v6619_v6 = vld [vmem:[#allocation39 + $0x18] sm:$0xff]   ;;  %v6620_v9 = vld [vmem:[#allocation39 + $0x20] sm:$0xff]  }
0x1bd7   :  { %6184 = vmatpush3.bf16.xpose.msra.mxu0 %v3127_v10  ;;  %6185 = vmatprep.mubr.msk.bf16.mxu0 %vm7882_vm0, %v7881_v0  ;;  %v6621_v10 = vld [vmem:[#allocation39 + $0x28] sm:$0xff]  }
0x1bd8   :  { %v3022_v13 = vpack.c.bf16 %v3020_v11, %v3020_v11  ;;  %6195 = vmatprep.subr.bf16.mxu0 %v7881_v0  ;;  %v6622_v11 = vld [vmem:[#allocation39 + $0x30] sm:$0xff]  }
0x1bda   :  { %6180 = vmatmul.mubr.msk.bf16.vlgmr.msra.gmra.mrb[76].mxu1 %vm1136_vm3, %v3022_v13 }
0x1bdb   :  { %6190 = vmatpush3.bf16.xpose.msra.mxu1 %v3177_v18  ;;  %6191 = vmatprep.mubr.msk.bf16.mxu1 %vm7882_vm0, %v7881_v0 }
0x1bdc   :  { %6201 = vmatprep.subr.bf16.mxu1 %v7881_v0 }
0x1bde   :  { %6186 = vmatmul.mubr.msk.bf16.vlgmr.msra.gmra.mrb[68].mxu0 %vm719_vm1, %v3120_v20 }
0x1bdf   :  { %6197 = vmatprep.mubr.msk.bf16.mxu0 %vm7882_vm0, %v7881_v0 }
0x1be2   :  { %6192 = vmatmul.mubr.msk.bf16.vlgmr.msra.gmra.mrb[80].mxu1 %vm719_vm1, %v3170_v21 }
0x1be3   :  { %6203 = vmatprep.mubr.msk.bf16.mxu1 %vm7882_vm0, %v7881_v0 }
0x1ca9   :  { %v3065_v23 = vpop.f32.mrb[64].mxu0 }
0x1caa   :  { %v6175_v27 = vpop.f32.mrb[65].mxu0 }
0x1cab   :  { %v3068_v29 = vpop.f32.mrb[66].mxu0 }
0x1cac   :  { %v6176_v30 = vpop.f32.mrb[67].mxu0 }
0x1cad   :  { %v3113_v33 = vpop.f32.mrb[76].mxu1 }
0x1cae   :  { %v6559_v34 = vpack.i.bf16 %v3113_v33, %v3065_v23  ;;  %v6181_v41 = vpop.f32.mrb[77].mxu1 }
0x1caf   :  { %v3116_v47 = vpop.f32.mrb[78].mxu1 }
0x1cb0   :  { %v6182_v48 = vpop.f32.mrb[79].mxu1 }
0x1cb1   :  { %v3163_v25 = vpop.f32.mrb[68].mxu0 }
0x1cb2   :  { %v3219_v49 = vmul.f32 0.17677669, %v3163_v25  ;;  %v6187_v22 = vpop.f32.mrb[69].mxu0 }
0x1cb3   :  { %v3166_v50 = vpop.f32.mrb[70].mxu0 }
0x1cb4   :  { %v6188_v52 = vpop.f32.mrb[71].mxu0  ;;  %v3221_v53 = vsel %vm1136_vm3, %v3219_v49, -inf }
0x1cb5   :  { %v3213_v39 = vpop.f32.mrb[80].mxu1  ;;  %3222 = vmax.xlane.f32.xlu1 %v3221_v53 }
0x1cb6   :  { %v3220_v24 = vmul.f32 0.17677669, %v3213_v39  ;;  %v6193_v26 = vpop.f32.mrb[81].mxu1 }
0x1cb7   :  { %v3216_v56 = vpop.f32.mrb[82].mxu1 }
0x1cb8   :  { %v6194_v28 = vpop.f32.mrb[83].mxu1  ;;  %v3224_v31 = vsel %vm1136_vm3, %v3220_v24, -inf }
0x1cb9   :  { %3225 = vmax.xlane.f32.xlu0 %v3224_v31 }
0x1cc6   :  { %3245 = vrot.lane.b32.xlu1 %v8642_v51, %s7885_s8 }
0x1cca   :  { %6555 = vrot.lane.b32.xlu1 %v6554_v46, %s7885_s8 }
0x1cce   :  { %6560 = vrot.lane.b32.xlu1 %v6559_v34, %s7860_s14 }
0x1d42   :  { %v3223_v7 = vpop.xlane.xlu1 %3222 }
0x1d43   :  { %v3227_v57 = vsub.f32 %v3219_v49, %v3223_v7 }
0x1d45   :  { %v3229_v40 = vmul.f32 1.442695, %v3227_v57 }
0x1d46   :  { %v3226_v8 = vpop.xlane.xlu0 %3225  ;;  %v3246_v58 = vpop.permute.xlu1 %3245 }
0x1d47   :  { %6728 = vpow2.f32 %v3229_v40  ;;  %v3228_v59 = vsub.f32 %v3220_v24, %v3226_v8  ;;  %v3251_v60 = vsel %vm1164_vm2, %v3246_v58, 0 }
0x1d48   :  { %6196 = vmatpush3.bf16.msra.mxu0 %v3251_v60 }
0x1d49   :  { %v3231_v61 = vmul.f32 1.442695, %v3228_v59  ;;  %6207 = vmatprep.subr.bf16.mxu0 %v7881_v0 }
0x1d4a   :  { %v6556_v34 = vpop.permute.xlu1 %6555 }
0x1d4b   :  { %6730 = vpow2.f32 %v3231_v61  ;;  %v6558_v47 = vunpack.i.h.bf16 %v6556_v34  ;;  %v6557_v48 = vunpack.i.l.bf16 %v6556_v34 }
0x1d4d   :  { %v3366_v50 = vsel %vm719_vm1, %v8694_v45, %v6558_v47  ;;  %v3365_v52 = vsel %vm719_vm1, %v8692_v35, %v6557_v48  ;;  %v5704_v45 = vld [vmem:[#allocation40] ss:$0 sm:$0xff] }
0x1d4e   :  { %v6561_v41 = vpop.permute.xlu1 %6560 }
0x1d4f   :  { %v6563_v25 = vunpack.i.h.bf16 %v6561_v41  ;;  %v6562_v49 = vunpack.i.l.bf16 %v6561_v41 }
0x1d51   :  { %v6729_v51 = vpop.eup %6728  ;;  %v3367_v24 = vsel %vm1952_vm4, %v3365_v52, %v6562_v49  ;;  %v3368_v26 = vsel %vm1952_vm4, %v3366_v50, %v6563_v25  ;;  %v5713_v50 = vld [vmem:[#allocation46] ss:$0 sm:$0xff] }
0x1d52   :  { %v3233_v32 = vsel %vm1136_vm3, %v6729_v51, 0.0 }
0x1d53   :  { %3234 = vadd.xlane.f32.xlu0 %v3233_v32 }
0x1d55   :  { %v6731_v43 = vpop.eup %6730 }
0x1d56   :  { %v3236_v46 = vsel %vm1136_vm3, %v6731_v43, 0.0 }
0x1d57   :  { %3237 = vadd.xlane.f32.xlu0 %v3236_v46 }
0x1d6d   :  { %3293 = vrot.lane.b32.xlu0 %v8646_v55, %s7885_s8 }
0x1de0   :  { %v3235_v36 = vpop.xlane.xlu0 %3234 }
0x1de1   :  { %6732 = vrcp.f32 %v3235_v36 }
0x1de4   :  { %v3238_v37 = vpop.xlane.xlu0 %3237 }
0x1de5   :  { %6734 = vrcp.f32 %v3238_v37 }
0x1de8   :  { %v3294_v44 = vpop.permute.xlu0 %3293 }
0x1de9   :  { %v3299_v62 = vsel %vm1164_vm2, %v3294_v44, 0 }
0x1dea   :  { %6202 = vmatpush3.bf16.msra.mxu1 %v3299_v62 }
0x1deb   :  { %v6733_v54 = vpop.eup %6732  ;;  %6227 = vmatprep.subr.bf16.mxu1 %v7881_v0 }
0x1dec   :  { %v3241_v63 = vmul.f32 %v6733_v54, %v6729_v51 }
0x1dee   :  { %v3243_v1 = vpack.c.bf16 %v3241_v63, %v3241_v63  ;;  %v6624_v63 = vld [vmem:[#allocation45 + $0x10] sm:$0xff]  }
0x1def   :  { %v6735_v2 = vpop.eup %6734 }
0x1df0   :  { %v3242_v3 = vmul.f32 %v6735_v2, %v6731_v43  ;;  %6198 = vmatmul.mubr.msk.bf16.vlgmr.msra.gmra.mrb[72].mxu0 %vm1136_vm3, %v3243_v1  ;;  %v6625_v1 = vld [vmem:[#allocation45 + $0x18] sm:$0xff]  }
0x1df1   :  { %6223 = vmatprep.mubr.msk.bf16.mxu0 %vm7882_vm0, %v7881_v0  ;;  %6208 = vmatpush3.bf16.msra.mxu0 %v6616_v4  ;;  %v693_v2 = vld [vmem:[#allocation10] sm:$0xff]  ;;  %v6626_v4 = vld [vmem:[#allocation45] sm:$0xff]  }
0x1df2   :  { %v3244_v55 = vpack.c.bf16 %v3242_v3, %v3242_v3  ;;  %6209 = vmatprep.subr.bf16.mxu0 %v7881_v0  ;;  %v694_v3 = vld [vmem:[#allocation10 + $0x8] sm:$0xff] }
0x1df4   :  { %6204 = vmatmul.mubr.msk.bf16.vlgmr.msra.gmra.mrb[84].mxu1 %vm1136_vm3, %v3244_v55  ;;  %v3541_v55 = vpack.c.bf16 %v694_v3, %v693_v2  ;;  %v5715_v3 = vld [vmem:[#allocation49] ss:$0 sm:$0xff] }
0x1df5   :  { %6231 = vmatprep.mubr.msk.bf16.mxu1 %vm7882_vm0, %v7881_v0  ;;  %6210 = vmatpush3.bf16.msra.mxu0 %v6617_v5  ;;  %v6627_v5 = vld [vmem:[#allocation45 + $0x8] sm:$0xff]  }
0x1df6   :  { %6211 = vmatprep.subr.bf16.mxu0 %v7881_v0  ;;  %6228 = vmatpush3.bf16.msra.mxu1 %v6624_v63  ;;  %v5714_v63 = vld [vmem:[#allocation48] ss:$0 sm:$0xff] }
0x1df7   :  { %6229 = vmatprep.subr.bf16.mxu1 %v7881_v0 }
0x1df9   :  { %6212 = vmatpush3.bf16.msra.mxu0 %v6618_v38 }
0x1dfa   :  { %6213 = vmatprep.subr.bf16.mxu0 %v7881_v0  ;;  %6230 = vmatpush3.bf16.msra.mxu1 %v6625_v1 }
0x1dfb   :  { %6235 = vmatprep.subr.bf16.mxu1 %v7881_v0 }
0x1dfd   :  { %6214 = vmatpush3.bf16.msra.mxu0 %v6619_v6  ;;  %6232 = vmatmul.mubr.msk.bf16.vlgmr.msra.gmra.mrb[88].mxu1 %vm719_vm1, %v3541_v55 }
0x1dfe   :  { %6215 = vmatprep.subr.bf16.mxu0 %v7881_v0  ;;  %6239 = vmatprep.mubr.msk.bf16.mxu1 %vm7882_vm0, %v7881_v0 }
0x1dff   :  { %6236 = vmatpush3.bf16.msra.mxu1 %v6626_v4 }
0x1e00   :  { %6237 = vmatprep.subr.bf16.mxu1 %v7881_v0 }
0x1e01   :  { %6216 = vmatpush3.bf16.msra.mxu0 %v6620_v9 }
0x1e02   :  { %6217 = vmatprep.subr.bf16.mxu0 %v7881_v0 }
0x1e03   :  { %6238 = vmatpush3.bf16.msra.mxu1 %v6627_v5 }
0x1e05   :  { %6218 = vmatpush3.bf16.msra.mxu0 %v6621_v10 }
0x1e06   :  { %6219 = vmatprep.subr.bf16.mxu0 %v7881_v0 }
0x1e09   :  { %6220 = vmatpush3.bf16.msra.mxu0 %v6622_v11 }
0x1e0a   :  { %6221 = vmatprep.subr.bf16.mxu0 %v7881_v0 }
0x1e0d   :  { %6222 = vmatpush3.bf16.msra.mxu0 %v6623_v19 }
0x1e0e   :  { %6251 = vmatprep.subr.bf16.mxu0 %v7881_v0 }
0x1ec3   :  { %v3287_v13 = vpop.f32.mrb[72].mxu0 }
0x1ec4   :  { %v6199_v18 = vpop.f32.mrb[73].mxu0 }
0x1ec5   :  { %v3290_v20 = vpop.f32.mrb[74].mxu0 }
0x1ec6   :  { %v6200_v21 = vpop.f32.mrb[75].mxu0  ;;  %v5705_v20 = vld [vmem:[#allocation42] ss:$0 sm:$0xff] }
0x1ec7   :  { %v3335_v23 = vpop.f32.mrb[84].mxu1 }
0x1ec8   :  { %v6564_v27 = vpack.i.bf16 %v3335_v23, %v3287_v13  ;;  %v6205_v29 = vpop.f32.mrb[85].mxu1 }
0x1ec9   :  { %v3338_v30 = vpop.f32.mrb[86].mxu1  ;;  %v5706_v29 = vld [vmem:[#allocation43] ss:$0 sm:$0xff] }
0x1eca   :  { %v6206_v33 = vpop.f32.mrb[87].mxu1  ;;  %6565 = vrot.lane.b32.xlu1 %v6564_v27, %s7884_s13 }
0x1ed0   :  { %v3591_v47 = vpop.f32.mrb[88].mxu1 }
0x1ed1   :  { %v6233_v48 = vpop.f32.mrb[89].mxu1 }
0x1ed2   :  { %v3594_v25 = vpop.f32.mrb[90].mxu1 }
0x1ed3   :  { %v6234_v49 = vpop.f32.mrb[91].mxu1 }
0x1f3c   :  { %v6566_v22 = vpop.permute.xlu1 %6565 }
0x1f3d   :  { %v6568_v53 = vunpack.i.h.bf16 %v6566_v22  ;;  %v6567_v39 = vunpack.i.l.bf16 %v6566_v22 }
0x1f3f   :  { %v3370_v56 = vsel %vm1955_vm5, %v3368_v26, %v6568_v53  ;;  %v3369_v28 = vsel %vm1955_vm5, %v3367_v24, %v6567_v39 }
0x1f40   :  { %v3371_v31 = vpack.c.bf16 %v3370_v56, %v3369_v28 }
0x1f42   :  { %6224 = vmatmul.mubr.bf16.vlgmr.msra.gmra.mrb[76].mxu0 %v3371_v31 }
0x1f43   :  { %6253 = vmatprep.mubr.msk.bf16.mxu0 %vm7882_vm0, %v7881_v0 }
0x2015   :  { %v3470_v7 = vpop.f32.mrb[76].mxu0 }
0x2016   :  { %v3477_v57 = vadd.f32 %v3470_v7, %v8615_v15  ;;  %v6225_v35 = vpop.f32.mrb[77].mxu0 }
0x2017   :  { %v3473_v40 = vpop.f32.mrb[78].mxu0 }
0x2018   :  { %v3478_v8 = vadd.f32 %v3473_v40, %v8617_v17  ;;  %v6226_v58 = vpop.f32.mrb[79].mxu0  ;;  %v3486_v59 = vadd.f32 %v5704_v45, %v3477_v57 }
0x201a   :  { %v3490_v60 = vsel %vm719_vm1, %v3486_v59, 0.0  ;;  %v3487_v61 = vadd.f32 %v5704_v45, %v3478_v8 }
0x201b   :  { %3491 = vadd.xlane.f32.xlu0 %v3490_v60 }
0x201c   :  { %v3493_v51 = vsel %vm719_vm1, %v3487_v61, 0.0 }
0x201d   :  { %3494 = vadd.xlane.f32.xlu1 %v3493_v51  ;;  %v6628_v51 = vld [vmem:[#allocation51] ss:$12 sps:$4 sm:$0xff]  }
0x20a8   :  { %v3492_v32 = vpop.xlane.xlu0 %3491 }
0x20a9   :  { %v3496_v43 = vmul.f32 0.03125, %v3492_v32  ;;  %v6630_v32 = vld [vmem:[#allocation51 + $0x4] ss:$12 sps:$4 sm:$0xff]  }
0x20aa   :  { %v3495_v46 = vpop.xlane.xlu1 %3494  ;;  %3782 = vmatprep.subr.bf16.mxu1 %v6630_v32 }
0x20ab   :  { %v3498_v36 = vsub.f32 %v3486_v59, %v3496_v43  ;;  %v3497_v37 = vmul.f32 0.03125, %v3495_v46  ;;  %v6633_v43 = vld [vmem:[#allocation51 + $0x1c] ss:$12 sps:$4 sm:$0xff]   ;;  %v6631_v46 = vld [vmem:[#allocation51 + $0x18] ss:$12 sps:$4 sm:$0xff]  }
0x20ad   :  { %v3499_v44 = vsub.f32 %v3487_v61, %v3497_v37  ;;  %v3500_v15 = vmul.f32 %v3498_v36, %v3498_v36 }
0x20af   :  { %v3502_v62 = vsel %vm719_vm1, %v3500_v15, 0.0  ;;  %v3501_v54 = vmul.f32 %v3499_v44, %v3499_v44 }
0x20b0   :  { %3503 = vadd.xlane.f32.xlu0 %v3502_v62 }
0x20b1   :  { %v3505_v17 = vsel %vm719_vm1, %v3501_v54, 0.0 }
0x20b4   :  { %3506 = vadd.xlane.f32.xlu0 %v3505_v17 }
0x213d   :  { %v3504_v38 = vpop.xlane.xlu0 %3503 }
0x213e   :  { %v3508_v6 = vmul.f32 0.03125, %v3504_v38 }
0x2140   :  { %v3510_v9 = vadd.f32 1e-05, %v3508_v6 }
0x2141   :  { %v3507_v10 = vpop.xlane.xlu0 %3506 }
0x2142   :  { %6736 = vrsqrt.f32 %v3510_v9  ;;  %v3509_v11 = vmul.f32 0.03125, %v3507_v10 }
0x2144   :  { %v3511_v19 = vadd.f32 1e-05, %v3509_v11 }
0x2146   :  { %6738 = vrsqrt.f32 %v3511_v19 }
0x214c   :  { %v6737_v13 = vpop.eup %6736 }
0x214d   :  { %v3514_v18 = vmul.f32 %v6737_v13, %v3498_v36 }
0x214f   :  { %v3522_v23 = vmul.f32 %v5705_v20, %v3514_v18 }
0x2150   :  { %v6739_v21 = vpop.eup %6738 }
0x2151   :  { %v3515_v27 = vmul.f32 %v6739_v21, %v3499_v44  ;;  %v3530_v33 = vadd.f32 %v5706_v29, %v3522_v23 }
0x2153   :  { %v3523_v30 = vmul.f32 %v5705_v20, %v3515_v27 }
0x2155   :  { %v3531_v34 = vadd.f32 %v5706_v29, %v3523_v30  ;;  %v6634_v29 = vld [vmem:[#allocation51 + $0x8] ss:$12 sps:$4 sm:$0xff]  }
0x2157   :  { %v3540_v41 = vpack.c.bf16 %v3531_v34, %v3530_v33  ;;  %v6635_v33 = vld [vmem:[#allocation51 + $0x20] ss:$12 sps:$4 sm:$0xff]   ;;  %v3730_v34 = vld [vmem:[#allocation52] sm:$0x7] }
0x2159   :  { %6240 = vmatmul.mubr.msk.bf16.vlgmr.msra.gmra.mrb[92].mxu1 %vm719_vm1, %v3540_v41  ;;  %v3739_v41 = vrot.slane %v3730_v34, %v8403_v12 }
0x215a   :  { %3814 = vmatprep.mubr.bf16.mxu1 %v7883_v42  ;;  %3783 = vmatpush1.bf16.msra.mxu1 %v6628_v51 }
0x215b   :  { %3784 = vmatprep.subr.bf16.mxu1 %v6633_v43 }
0x215e   :  { %3785 = vmatpush1.bf16.msra.mxu1 %v6631_v46 }
0x215f   :  { %6243 = vmatprep.subr.bf16.mxu1 %v7881_v0 }
0x222c   :  { %v3647_v22 = vpop.f32.mrb[92].mxu1 }
0x222d   :  { %v3648_v52 = vadd.f32 %v3647_v22, %v3591_v47  ;;  %v6241_v53 = vpop.f32.mrb[93].mxu1 }
0x222e   :  { %v3650_v39 = vpop.f32.mrb[94].mxu1 }
0x222f   :  { %v3651_v24 = vadd.f32 %v3650_v39, %v3594_v25  ;;  %v6242_v26 = vpop.f32.mrb[95].mxu1  ;;  %v3661_v56 = vadd.f32 %v5713_v50, %v3648_v52  ;;  %v3743_v39 = vrot.slane %v3730_v34, %v8405_v14 }
0x2231   :  { %v3665_v28 = vsel %vm719_vm1, %v3661_v56, 0.0  ;;  %v3662_v31 = vadd.f32 %v5713_v50, %v3651_v24  ;;  %v3735_v50 = vrot.slane %v3730_v34, %v8408_v16 }
0x2232   :  { %3666 = vadd.xlane.f32.xlu0 %v3665_v28 }
0x2233   :  { %v3668_v7 = vsel %vm719_vm1, %v3662_v31, 0.0 }
0x2234   :  { %3669 = vadd.xlane.f32.xlu1 %v3668_v7 }
0x22bf   :  { %v3667_v42 = vpop.xlane.xlu0 %3666 }
0x22c0   :  { %v3671_v45 = vmul.f32 0.03125, %v3667_v42 }
0x22c1   :  { %v3670_v57 = vpop.xlane.xlu1 %3669 }
0x22c2   :  { %v3673_v35 = vsub.f32 %v3661_v56, %v3671_v45  ;;  %v3672_v40 = vmul.f32 0.03125, %v3670_v57 }
0x22c4   :  { %v3674_v8 = vsub.f32 %v3662_v31, %v3672_v40  ;;  %v3675_v58 = vmul.f32 %v3673_v35, %v3673_v35 }
0x22c6   :  { %v3677_v59 = vsel %vm719_vm1, %v3675_v58, 0.0  ;;  %v3676_v60 = vmul.f32 %v3674_v8, %v3674_v8 }
0x22c7   :  { %3678 = vadd.xlane.f32.xlu0 %v3677_v59 }
0x22c8   :  { %v3680_v61 = vsel %vm719_vm1, %v3676_v60, 0.0 }
0x22c9   :  { %3681 = vadd.xlane.f32.xlu1 %v3680_v61 }
0x2354   :  { %v3679_v36 = vpop.xlane.xlu0 %3678 }
0x2355   :  { %v3683_v37 = vmul.f32 0.03125, %v3679_v36 }
0x2356   :  { %v3682_v44 = vpop.xlane.xlu1 %3681 }
0x2357   :  { %v3685_v15 = vadd.f32 1e-05, %v3683_v37  ;;  %v3684_v62 = vmul.f32 0.03125, %v3682_v44 }
0x2359   :  { %6740 = vrsqrt.f32 %v3685_v15  ;;  %v3686_v54 = vadd.f32 1e-05, %v3684_v62 }
0x235b   :  { %6742 = vrsqrt.f32 %v3686_v54 }
0x2363   :  { %v6741_v17 = vpop.eup %6740 }
0x2364   :  { %v3689_v1 = vmul.f32 %v6741_v17, %v3673_v35 }
0x2365   :  { %v6743_v2 = vpop.eup %6742 }
0x2366   :  { %v3697_v55 = vmul.f32 %v5714_v63, %v3689_v1  ;;  %v3690_v4 = vmul.f32 %v6743_v2, %v3674_v8 }
0x2368   :  { %v3698_v5 = vmul.f32 %v5714_v63, %v3690_v4  ;;  %v3705_v38 = vadd.f32 %v5715_v3, %v3697_v55 }
0x236a   :  { %v3706_v6 = vadd.f32 %v5715_v3, %v3698_v5  ;;  %v5716_v9 = vmul.f32 -1.442695, %v3705_v38 }
0x236c   :  { %6744 = vpow2.f32 %v5716_v9  ;;  %v5717_v10 = vmul.f32 -1.442695, %v3706_v6 }
0x236e   :  { %6746 = vpow2.f32 %v5717_v10 }
0x2376   :  { %v6745_v11 = vpop.eup %6744 }
0x2377   :  { %v3713_v19 = vadd.f32 1.0, %v6745_v11 }
0x2378   :  { %v6747_v13 = vpop.eup %6746 }
0x2379   :  { %v3714_v18 = vadd.f32 1.0, %v6747_v13  ;;  %6748 = vrcp.f32 %v3713_v19 }
0x237b   :  { %6750 = vrcp.f32 %v3714_v18 }
0x2383   :  { %v6749_v20 = vpop.eup %6748 }
0x2384   :  { %v8835_v23 = vmul.f32 %v6749_v20, %v3705_v38 }
0x2385   :  { %v6751_v21 = vpop.eup %6750 }
0x2386   :  { %v8837_v27 = vmul.f32 %v6751_v21, %v3706_v6 }
0x2388   :  { %v3721_v30 = vpack.c.bf16 %v8837_v27, %v8835_v23 }
0x238a   :  { %5724 = vmatmul.mubr.msk.bf16.vlgmr.msra.gmra.mrb[96].mxu1 %vm719_vm1, %v3721_v30 }
0x238b   :  { %6244 = vmatpush3.bf16.msra.mxu1 %v6634_v29  ;;  %6247 = vmatprep.mubr.msk.bf16.mxu1 %vm7882_vm0, %v7881_v0 }
0x238c   :  { %6245 = vmatprep.subr.bf16.mxu1 %v7881_v0 }
0x238f   :  { %6246 = vmatpush3.bf16.msra.mxu1 %v6635_v33 }
0x2390   :  { %6257 = vmatprep.subr.bf16.mxu1 %v7881_v0 }
0x2392   :  { %6248 = vmatmul.mubr.msk.bf16.vlgmr.msra.gmra.mrb[100].mxu1 %vm719_vm1, %v3721_v30 }
0x2393   :  { %6259 = vmatprep.mubr.msk.bf16.mxu1 %vm7882_vm0, %v7881_v0 }
0x245d   :  { %v3816_v47 = vpop.f32.mrb[96].mxu1 }
0x245e   :  { %v3818_v48 = vpop.f32.mrb[97].mxu1  ;;  %v3817_v56 = vadd.f32 %v3816_v47, %v3735_v50 }
0x245f   :  { %v3819_v25 = vadd.f32 %v3818_v48, %v3739_v41  ;;  %v3820_v49 = vpop.f32.mrb[98].mxu1 }
0x2460   :  { %v3822_v22 = vpop.f32.mrb[99].mxu1  ;;  %v3821_v7 = vadd.f32 %v3820_v49, %v3735_v50  ;;  %v8864_v35 = vpack.c.bf16 %v3817_v56, %v3817_v56 }
0x2461   :  { %v8851_v52 = vpack.c.bf16 %v3819_v25, %v3819_v25  ;;  %v3823_v53 = vadd.f32 %v3822_v22, %v3739_v41 }
0x2462   :  { %v8870_v58 = vpack.c.bf16 %v3821_v7, %v3821_v7 }
0x2463   :  { %v8854_v24 = vpack.c.bf16 %v3823_v53, %v3823_v53  ;;  %v3876_v26 = vsel %vm719_vm1, %v8851_v52, 0 }
0x2464   :  { %6252 = vmatpush3.bf16.xpose.msra.mxu0 %v3876_v26 }
0x2465   :  { %v3859_v12 = vpop.f32.mrb[100].mxu1  ;;  %v3922_v28 = vsel %vm719_vm1, %v8854_v24, 0  ;;  %6263 = vmatprep.subr.bf16.mxu0 %v7881_v0 }
0x2466   :  { %v3860_v31 = vadd.f32 %v3859_v12, %v3743_v39  ;;  %v6249_v16 = vpop.f32.mrb[101].mxu1  ;;  %6258 = vmatpush3.bf16.xpose.msra.mxu1 %v3922_v28 }
0x2467   :  { %v3862_v42 = vpop.f32.mrb[102].mxu1  ;;  %6269 = vmatprep.subr.bf16.mxu1 %v7881_v0 }
0x2468   :  { %v8862_v14 = vpack.c.bf16 %v3860_v31, %v3860_v31  ;;  %v3863_v45 = vadd.f32 %v3862_v42, %v3743_v39  ;;  %v6250_v57 = vpop.f32.mrb[103].mxu1 }
0x246a   :  { %v8866_v40 = vpack.c.bf16 %v3863_v45, %v3863_v45  ;;  %v3994_v8 = vsel %vm1164_vm2, %v8862_v14, 0 }
0x246b   :  { %6254 = vmatmul.mubr.msk.bf16.vlgmr.msra.gmra.mrb[80].mxu0 %vm719_vm1, %v8864_v35 }
0x246c   :  { %6264 = vmatpush3.bf16.msra.mxu0 %v3994_v8  ;;  %v4040_v59 = vsel %vm1164_vm2, %v8866_v40, 0  ;;  %6265 = vmatprep.mubr.msk.bf16.mxu0 %vm7882_vm0, %v7881_v0 }
0x246d   :  { %6260 = vmatmul.mubr.msk.bf16.vlgmr.msra.gmra.mrb[104].mxu1 %vm719_vm1, %v8870_v58  ;;  %6275 = vmatprep.subr.bf16.mxu0 %v7881_v0 }
0x246e   :  { %6270 = vmatpush3.bf16.msra.mxu1 %v4040_v59  ;;  %6271 = vmatprep.mubr.msk.bf16.mxu1 %vm7882_vm0, %v7881_v0 }
0x246f   :  { %6281 = vmatprep.subr.bf16.mxu1 %v7881_v0 }
0x253e   :  { %v3912_v60 = vpop.f32.mrb[80].mxu0 }
0x253f   :  { %v3964_v61 = vmul.f32 0.17677669, %v3912_v60  ;;  %v6255_v51 = vpop.f32.mrb[81].mxu0 }
0x2540   :  { %v3915_v32 = vpop.f32.mrb[82].mxu0  ;;  %v3958_v43 = vpop.f32.mrb[104].mxu1 }
0x2541   :  { %v3965_v46 = vmul.f32 0.17677669, %v3958_v43  ;;  %v6256_v36 = vpop.f32.mrb[83].mxu0  ;;  %v6261_v37 = vpop.f32.mrb[105].mxu1  ;;  %v3966_v44 = vsel %vm1136_vm3, %v3964_v61, -inf }
0x2542   :  { %v3961_v15 = vpop.f32.mrb[106].mxu1  ;;  %3967 = vmax.xlane.f32.xlu0 %v3966_v44 }
0x2543   :  { %v6262_v62 = vpop.f32.mrb[107].mxu1  ;;  %v3969_v54 = vsel %vm1136_vm3, %v3965_v46, -inf }
0x2544   :  { %3970 = vmax.xlane.f32.xlu1 %v3969_v54 }
0x2555   :  { %4138 = vrot.lane.b32.xlu1 %v8854_v24, %s7884_s13 }
0x25cf   :  { %v3968_v17 = vpop.xlane.xlu0 %3967 }
0x25d0   :  { %v3972_v63 = vsub.f32 %v3964_v61, %v3968_v17 }
0x25d1   :  { %v3971_v1 = vpop.xlane.xlu1 %3970 }
0x25d2   :  { %v3974_v2 = vmul.f32 1.442695, %v3972_v63  ;;  %v3973_v3 = vsub.f32 %v3965_v46, %v3971_v1 }
0x25d4   :  { %6752 = vpow2.f32 %v3974_v2  ;;  %v3976_v55 = vmul.f32 1.442695, %v3973_v3 }
0x25d5   :  { %v4139_v9 = vpop.permute.xlu1 %4138 }
0x25d6   :  { %6754 = vpow2.f32 %v3976_v55  ;;  %v4144_v34 = vsel %vm719_vm1, %v4139_v9, 0 }
0x25de   :  { %v6753_v4 = vpop.eup %6752 }
0x25df   :  { %v3978_v5 = vsel %vm1136_vm3, %v6753_v4, 0.0 }
0x25e0   :  { %v6755_v38 = vpop.eup %6754  ;;  %3979 = vadd.xlane.f32.xlu0 %v3978_v5 }
0x25e1   :  { %v3981_v6 = vsel %vm1136_vm3, %v6755_v38, 0.0 }
0x25e2   :  { %3982 = vadd.xlane.f32.xlu1 %v3981_v6 }
0x25f3   :  { %4083 = vrot.lane.b32.xlu1 %v8864_v35, %s7884_s13 }
0x25f6   :  { %4086 = vrot.lane.b32.xlu0 %v8851_v52, %s7884_s13 }
0x25f7   :  { %4135 = vrot.lane.b32.xlu1 %v8870_v58, %s7884_s13 }
0x266d   :  { %v3980_v10 = vpop.xlane.xlu0 %3979 }
0x266e   :  { %6756 = vrcp.f32 %v3980_v10 }
0x266f   :  { %v3983_v11 = vpop.xlane.xlu1 %3982 }
0x2670   :  { %6758 = vrcp.f32 %v3983_v11 }
0x2671   :  { %v4087_v20 = vpop.permute.xlu0 %4086 }
0x2672   :  { %v4092_v30 = vsel %vm719_vm1, %v4087_v20, 0 }
0x2673   :  { %v4084_v41 = vpop.permute.xlu1 %4083 }
0x2677   :  { %v4136_v47 = vpop.permute.xlu1 %4135 }
0x2678   :  { %v6757_v19 = vpop.eup %6756 }
0x2679   :  { %v3986_v13 = vmul.f32 %v6757_v19, %v6753_v4 }
0x267a   :  { %v6759_v18 = vpop.eup %6758 }
0x267b   :  { %v3987_v21 = vmul.f32 %v6759_v18, %v6755_v38  ;;  %v3988_v29 = vpack.c.bf16 %v3986_v13, %v3986_v13 }
0x267d   :  { %6266 = vmatmul.mubr.msk.bf16.vlgmr.msra.gmra.mrb[84].mxu0 %vm1136_vm3, %v3988_v29  ;;  %v3989_v33 = vpack.c.bf16 %v3987_v21, %v3987_v21 }
0x267e   :  { %6276 = vmatpush3.bf16.xpose.msra.mxu0 %v4092_v30  ;;  %6277 = vmatprep.mubr.msk.bf16.mxu0 %vm7882_vm0, %v7881_v0 }
0x267f   :  { %6272 = vmatmul.mubr.msk.bf16.vlgmr.msra.gmra.mrb[108].mxu1 %vm1136_vm3, %v3989_v33  ;;  %6287 = vmatprep.subr.bf16.mxu0 %v7881_v0 }
0x2680   :  { %6282 = vmatpush3.bf16.xpose.msra.mxu1 %v4144_v34  ;;  %6283 = vmatprep.mubr.msk.bf16.mxu1 %vm7882_vm0, %v7881_v0 }
0x2681   :  { %6293 = vmatprep.subr.bf16.mxu1 %v7881_v0 }
0x2685   :  { %6278 = vmatmul.mubr.msk.bf16.vlgmr.msra.gmra.mrb[88].mxu0 %vm719_vm1, %v4084_v41 }
0x2686   :  { %6289 = vmatprep.mubr.msk.bf16.mxu0 %vm7882_vm0, %v7881_v0 }
0x2687   :  { %6284 = vmatmul.mubr.msk.bf16.vlgmr.msra.gmra.mrb[112].mxu1 %vm719_vm1, %v4136_v47 }
0x2688   :  { %6295 = vmatprep.mubr.msk.bf16.mxu1 %vm7882_vm0, %v7881_v0 }
0x2750   :  { %v8912_v48 = vpop.f32.mrb[84].mxu0 }
0x2751   :  { %v6267_v25 = vpop.f32.mrb[85].mxu0 }
0x2752   :  { %v4033_v49 = vpop.f32.mrb[86].mxu0  ;;  %v8914_v22 = vpop.f32.mrb[108].mxu1 }
0x2753   :  { %v6268_v50 = vpop.f32.mrb[87].mxu0  ;;  %v6273_v53 = vpop.f32.mrb[109].mxu1 }
0x2754   :  { %v4079_v39 = vpop.f32.mrb[110].mxu1 }
0x2755   :  { %v6274_v26 = vpop.f32.mrb[111].mxu1 }
0x2758   :  { %v4128_v56 = vpop.f32.mrb[88].mxu0 }
0x2759   :  { %v4186_v12 = vmul.f32 0.17677669, %v4128_v56  ;;  %v6279_v28 = vpop.f32.mrb[89].mxu0 }
0x275a   :  { %v4131_v31 = vpop.f32.mrb[90].mxu0  ;;  %v4180_v16 = vpop.f32.mrb[112].mxu1 }
0x275b   :  { %v4187_v7 = vmul.f32 0.17677669, %v4180_v16  ;;  %v6280_v42 = vpop.f32.mrb[91].mxu0  ;;  %v6285_v45 = vpop.f32.mrb[113].mxu1  ;;  %v4188_v57 = vsel %vm1136_vm3, %v4186_v12, -inf }
0x275c   :  { %v4183_v8 = vpop.f32.mrb[114].mxu1  ;;  %4189 = vmax.xlane.f32.xlu0 %v4188_v57 }
0x275d   :  { %v6286_v59 = vpop.f32.mrb[115].mxu1  ;;  %v4191_v60 = vsel %vm1136_vm3, %v4187_v7, -inf }
0x275e   :  { %4192 = vmax.xlane.f32.xlu1 %v4191_v60 }
0x276f   :  { %4262 = vrot.lane.b32.xlu1 %v8866_v40, %s7886_s3 }
0x2773   :  { %4312 = vrot.lane.b32.xlu1 %v8851_v52, %s7860_s14 }
0x2777   :  { %4362 = vrot.lane.b32.xlu1 %v8854_v24, %s7860_s14 }
0x277b   :  { %4360 = vrot.lane.b32.xlu1 %v8870_v58, %s7860_s14 }
0x27e9   :  { %v4190_v61 = vpop.xlane.xlu0 %4189 }
0x27ea   :  { %v4194_v51 = vsub.f32 %v4186_v12, %v4190_v61 }
0x27eb   :  { %v4193_v32 = vpop.xlane.xlu1 %4192 }
0x27ec   :  { %v4196_v43 = vmul.f32 1.442695, %v4194_v51  ;;  %v4195_v46 = vsub.f32 %v4187_v7, %v4193_v32 }
0x27ee   :  { %6760 = vpow2.f32 %v4196_v43  ;;  %v4198_v36 = vmul.f32 1.442695, %v4195_v46 }
0x27ef   :  { %v4263_v37 = vpop.permute.xlu1 %4262 }
0x27f0   :  { %6762 = vpow2.f32 %v4198_v36  ;;  %v4268_v44 = vsel %vm1164_vm2, %v4263_v37, 0 }
0x27f1   :  { %6294 = vmatpush3.bf16.msra.mxu1 %v4268_v44 }
0x27f2   :  { %6305 = vmatprep.subr.bf16.mxu1 %v7881_v0 }
0x27f3   :  { %v4313_v4 = vpop.permute.xlu1 %4312 }
0x27f4   :  { %v4318_v11 = vsel %vm719_vm1, %v4313_v4, 0 }
0x27f7   :  { %v4363_v10 = vpop.permute.xlu1 %4362 }
0x27f8   :  { %v6761_v15 = vpop.eup %6760  ;;  %v4368_v13 = vsel %vm719_vm1, %v4363_v10, 0 }
0x27f9   :  { %v4200_v62 = vsel %vm1136_vm3, %v6761_v15, 0.0 }
0x27fa   :  { %v6763_v54 = vpop.eup %6762  ;;  %4201 = vadd.xlane.f32.xlu0 %v4200_v62 }
0x27fb   :  { %v4203_v17 = vsel %vm1136_vm3, %v6763_v54, 0.0  ;;  %v4361_v20 = vpop.permute.xlu1 %4360 }
0x27fe   :  { %4204 = vadd.xlane.f32.xlu0 %v4203_v17 }
0x2814   :  { %4213 = vrot.lane.b32.xlu0 %v8862_v14, %s7886_s3 }
0x2818   :  { %4310 = vrot.lane.b32.xlu0 %v8864_v35, %s7860_s14  ;;  %s7887_s14 = smov 80  }
0x2887   :  { %v4202_v63 = vpop.xlane.xlu0 %4201 }
0x2888   :  { %6764 = vrcp.f32 %v4202_v63 }
0x288b   :  { %v4205_v1 = vpop.xlane.xlu0 %4204 }
0x288c   :  { %6766 = vrcp.f32 %v4205_v1 }
0x288f   :  { %v4214_v2 = vpop.permute.xlu0 %4213 }
0x2890   :  { %v4219_v3 = vsel %vm1164_vm2, %v4214_v2, 0 }
0x2891   :  { %6288 = vmatpush3.bf16.msra.mxu0 %v4219_v3 }
0x2892   :  { %v6765_v55 = vpop.eup %6764  ;;  %6299 = vmatprep.subr.bf16.mxu0 %v7881_v0 }
0x2893   :  { %v4208_v5 = vmul.f32 %v6765_v55, %v6761_v15  ;;  %v4311_v18 = vpop.permute.xlu0 %4310 }
0x2895   :  { %v4210_v38 = vpack.c.bf16 %v4208_v5, %v4208_v5 }
0x2896   :  { %v6767_v6 = vpop.eup %6766 }
0x2897   :  { %v4209_v9 = vmul.f32 %v6767_v6, %v6763_v54  ;;  %6290 = vmatmul.mubr.msk.bf16.vlgmr.msra.gmra.mrb[92].mxu0 %vm1136_vm3, %v4210_v38 }
0x2898   :  { %6301 = vmatprep.mubr.msk.bf16.mxu0 %vm7882_vm0, %v7881_v0 }
0x2899   :  { %v4211_v19 = vpack.c.bf16 %v4209_v9, %v4209_v9 }
0x289a   :  { %6300 = vmatpush3.bf16.xpose.msra.mxu0 %v4318_v11 }
0x289b   :  { %6296 = vmatmul.mubr.msk.bf16.vlgmr.msra.gmra.mrb[116].mxu1 %vm1136_vm3, %v4211_v19  ;;  %6311 = vmatprep.subr.bf16.mxu0 %v7881_v0 }
0x289c   :  { %6306 = vmatpush3.bf16.xpose.msra.mxu1 %v4368_v13  ;;  %6307 = vmatprep.mubr.msk.bf16.mxu1 %vm7882_vm0, %v7881_v0 }
0x289d   :  { %6317 = vmatprep.subr.bf16.mxu1 %v7881_v0 }
0x28a1   :  { %6302 = vmatmul.mubr.msk.bf16.vlgmr.msra.gmra.mrb[96].mxu0 %vm719_vm1, %v4311_v18 }
0x28a2   :  { %6313 = vmatprep.mubr.msk.bf16.mxu0 %vm7882_vm0, %v7881_v0 }
0x28a3   :  { %6308 = vmatmul.mubr.msk.bf16.vlgmr.msra.gmra.mrb[120].mxu1 %vm719_vm1, %v4361_v20 }
0x28a4   :  { %6319 = vmatprep.mubr.msk.bf16.mxu1 %vm7882_vm0, %v7881_v0 }
0x296a   :  { %v8950_v21 = vpop.f32.mrb[92].mxu0 }
0x296b   :  { %v6291_v29 = vpop.f32.mrb[93].mxu0 }
0x296c   :  { %v4258_v30 = vpop.f32.mrb[94].mxu0 }
0x296d   :  { %v6292_v33 = vpop.f32.mrb[95].mxu0 }
0x296e   :  { %v8952_v34 = vpop.f32.mrb[116].mxu1 }
0x296f   :  { %v6569_v41 = vpack.i.bf16 %v8952_v34, %v8950_v21  ;;  %v6297_v47 = vpop.f32.mrb[117].mxu1 }
0x2970   :  { %v4307_v25 = vpop.f32.mrb[118].mxu1 }
0x2971   :  { %v6298_v49 = vpop.f32.mrb[119].mxu1 }
0x2974   :  { %v4354_v50 = vpop.f32.mrb[96].mxu0 }
0x2975   :  { %v4410_v53 = vmul.f32 0.17677669, %v4354_v50  ;;  %v6303_v39 = vpop.f32.mrb[97].mxu0 }
0x2976   :  { %v4357_v26 = vpop.f32.mrb[98].mxu0  ;;  %v4404_v56 = vpop.f32.mrb[120].mxu1 }
0x2977   :  { %v4411_v12 = vmul.f32 0.17677669, %v4404_v56  ;;  %v6304_v28 = vpop.f32.mrb[99].mxu0  ;;  %v6309_v31 = vpop.f32.mrb[121].mxu1  ;;  %v4412_v16 = vsel %vm1136_vm3, %v4410_v53, -inf }
0x2978   :  { %v4407_v7 = vpop.f32.mrb[122].mxu1  ;;  %4413 = vmax.xlane.f32.xlu0 %v4412_v16 }
0x2979   :  { %v6310_v42 = vpop.f32.mrb[123].mxu1  ;;  %v4415_v45 = vsel %vm1136_vm3, %v4411_v12, -inf }
0x297a   :  { %4416 = vmax.xlane.f32.xlu1 %v4415_v45 }
0x298b   :  { %4484 = vrot.lane.b32.xlu1 %v8866_v40, %s7884_s13 }
0x298f   :  { %4534 = vrot.lane.b32.xlu1 %v8851_v52, %s7885_s8 }
0x2993   :  { %4584 = vrot.lane.b32.xlu1 %v8854_v24, %s7885_s8 }
0x2997   :  { %4582 = vrot.lane.b32.xlu1 %v8870_v58, %s7885_s8 }
0x2a05   :  { %v4414_v57 = vpop.xlane.xlu0 %4413 }
0x2a06   :  { %v4418_v8 = vsub.f32 %v4410_v53, %v4414_v57 }
0x2a07   :  { %v4417_v59 = vpop.xlane.xlu1 %4416 }
0x2a08   :  { %v4420_v60 = vmul.f32 1.442695, %v4418_v8  ;;  %v4419_v61 = vsub.f32 %v4411_v12, %v4417_v59 }
0x2a0a   :  { %6768 = vpow2.f32 %v4420_v60  ;;  %v4422_v51 = vmul.f32 1.442695, %v4419_v61 }
0x2a0b   :  { %v4485_v32 = vpop.permute.xlu1 %4484 }
0x2a0c   :  { %6770 = vpow2.f32 %v4422_v51  ;;  %v4490_v43 = vsel %vm1164_vm2, %v4485_v32, 0 }
0x2a0d   :  { %6318 = vmatpush3.bf16.msra.mxu1 %v4490_v43 }
0x2a0e   :  { %6329 = vmatprep.subr.bf16.mxu1 %v7881_v0 }
0x2a0f   :  { %v4535_v54 = vpop.permute.xlu1 %4534 }
0x2a13   :  { %v4585_v3 = vpop.permute.xlu1 %4584 }
0x2a14   :  { %v6769_v52 = vpop.eup %6768  ;;  %v4590_v4 = vsel %vm719_vm1, %v4585_v3, 0 }
0x2a15   :  { %v4424_v24 = vsel %vm1136_vm3, %v6769_v52, 0.0 }
0x2a16   :  { %v6771_v46 = vpop.eup %6770  ;;  %4425 = vadd.xlane.f32.xlu0 %v4424_v24 }
0x2a17   :  { %v4427_v58 = vsel %vm1136_vm3, %v6771_v46, 0.0  ;;  %v4583_v38 = vpop.permute.xlu1 %4582 }
0x2a1a   :  { %4428 = vadd.xlane.f32.xlu0 %v4427_v58 }
0x2a30   :  { %4436 = vrot.lane.b32.xlu0 %v8862_v14, %s7884_s13 }
0x2a34   :  { %4532 = vrot.lane.b32.xlu0 %v8864_v35, %s7885_s8  ;;  %v4540_v35 = vsel %vm719_vm1, %v4535_v54, 0 }
0x2aa3   :  { %v4426_v36 = vpop.xlane.xlu0 %4425 }
0x2aa4   :  { %6772 = vrcp.f32 %v4426_v36  ;;  %v6636_v36 = vld [vmem:[#allocation54] sm:$0xff]  }
0x2aa7   :  { %v4429_v37 = vpop.xlane.xlu0 %4428 }
0x2aa8   :  { %6774 = vrcp.f32 %v4429_v37  ;;  %v6637_v37 = vld [vmem:[#allocation54 + $0x8] sm:$0xff]  }
0x2aab   :  { %v4437_v44 = vpop.permute.xlu0 %4436 }
0x2aac   :  { %v4442_v15 = vsel %vm1164_vm2, %v4437_v44, 0  ;;  %v6638_v44 = vld [vmem:[#allocation54 + $0x10] sm:$0xff]  }
0x2aad   :  { %6312 = vmatpush3.bf16.msra.mxu0 %v4442_v15  ;;  %v6639_v15 = vld [vmem:[#allocation54 + $0x18] sm:$0xff]  }
0x2aae   :  { %v6773_v62 = vpop.eup %6772  ;;  %6323 = vmatprep.subr.bf16.mxu0 %v7881_v0 }
0x2aaf   :  { %v4432_v17 = vmul.f32 %v6773_v62, %v6769_v52  ;;  %v4533_v5 = vpop.permute.xlu0 %4532 }
0x2ab1   :  { %v4434_v63 = vpack.c.bf16 %v4432_v17, %v4432_v17 }
0x2ab2   :  { %v6775_v1 = vpop.eup %6774 }
0x2ab3   :  { %v4433_v2 = vmul.f32 %v6775_v1, %v6771_v46  ;;  %6314 = vmatmul.mubr.msk.bf16.vlgmr.msra.gmra.mrb[100].mxu0 %vm1136_vm3, %v4434_v63 }
0x2ab4   :  { %6325 = vmatprep.mubr.msk.bf16.mxu0 %vm7882_vm0, %v7881_v0 }
0x2ab5   :  { %v4435_v55 = vpack.c.bf16 %v4433_v2, %v4433_v2 }
0x2ab6   :  { %6324 = vmatpush3.bf16.xpose.msra.mxu0 %v4540_v35 }
0x2ab7   :  { %6320 = vmatmul.mubr.msk.bf16.vlgmr.msra.gmra.mrb[124].mxu1 %vm1136_vm3, %v4435_v55  ;;  %6335 = vmatprep.subr.bf16.mxu0 %v7881_v0 }
0x2ab8   :  { %6330 = vmatpush3.bf16.xpose.msra.mxu1 %v4590_v4  ;;  %6331 = vmatprep.mubr.msk.bf16.mxu1 %vm7882_vm0, %v7881_v0 }
0x2ab9   :  { %6341 = vmatprep.subr.bf16.mxu1 %v7881_v0 }
0x2abd   :  { %6326 = vmatmul.mubr.msk.bf16.vlgmr.msra.gmra.mrb[104].mxu0 %vm719_vm1, %v4533_v5 }
0x2abe   :  { %6337 = vmatprep.mubr.msk.bf16.mxu0 %vm7882_vm0, %v7881_v0 }
0x2abf   :  { %6332 = vmatmul.mubr.msk.bf16.vlgmr.msra.gmra.mrb[128].mxu1 %vm719_vm1, %v4583_v38 }
0x2ac0   :  { %6343 = vmatprep.mubr.msk.bf16.mxu1 %vm7882_vm0, %v7881_v0 }
0x2b86   :  { %v4478_v6 = vpop.f32.mrb[100].mxu0 }
0x2b87   :  { %v6315_v9 = vpop.f32.mrb[101].mxu0 }
0x2b88   :  { %v4481_v10 = vpop.f32.mrb[102].mxu0 }
0x2b89   :  { %v6316_v11 = vpop.f32.mrb[103].mxu0 }
0x2b8a   :  { %v4526_v19 = vpop.f32.mrb[124].mxu1 }
0x2b8b   :  { %v6574_v13 = vpack.i.bf16 %v4526_v19, %v4478_v6  ;;  %v6321_v18 = vpop.f32.mrb[125].mxu1 }
0x2b8c   :  { %v4529_v20 = vpop.f32.mrb[126].mxu1 }
0x2b8d   :  { %v6322_v29 = vpop.f32.mrb[127].mxu1 }
0x2b90   :  { %v4576_v30 = vpop.f32.mrb[104].mxu0 }
0x2b91   :  { %v4632_v33 = vmul.f32 0.17677669, %v4576_v30  ;;  %v6327_v47 = vpop.f32.mrb[105].mxu0 }
0x2b92   :  { %v4579_v25 = vpop.f32.mrb[106].mxu0  ;;  %v4626_v49 = vpop.f32.mrb[128].mxu1 }
0x2b93   :  { %v4633_v50 = vmul.f32 0.17677669, %v4626_v49  ;;  %v6328_v53 = vpop.f32.mrb[107].mxu0  ;;  %v6333_v39 = vpop.f32.mrb[129].mxu1  ;;  %v4634_v26 = vsel %vm1136_vm3, %v4632_v33, -inf }
0x2b94   :  { %v4629_v56 = vpop.f32.mrb[130].mxu1  ;;  %4635 = vmax.xlane.f32.xlu0 %v4634_v26 }
0x2b95   :  { %v6334_v12 = vpop.f32.mrb[131].mxu1  ;;  %v4637_v28 = vsel %vm1136_vm3, %v4633_v50, -inf }
0x2b96   :  { %4638 = vmax.xlane.f32.xlu1 %v4637_v28 }
0x2ba7   :  { %4706 = vrot.lane.b32.xlu1 %v8866_v40, %s7887_s14 }
0x2bab   :  { %6570 = vrot.lane.b32.xlu1 %v6569_v41, %s7888_s10 }
0x2baf   :  { %6575 = vrot.lane.b32.xlu1 %v6574_v13, %s7885_s8 }
0x2c21   :  { %v4636_v31 = vpop.xlane.xlu0 %4635 }
0x2c22   :  { %v4640_v16 = vsub.f32 %v4632_v33, %v4636_v31 }
0x2c23   :  { %v4639_v7 = vpop.xlane.xlu1 %4638 }
0x2c24   :  { %v4642_v42 = vmul.f32 1.442695, %v4640_v16  ;;  %v4641_v45 = vsub.f32 %v4633_v50, %v4639_v7  ;;  %v5747_v50 = vld [vmem:[#allocation55] ss:$0 sm:$0xff] }
0x2c26   :  { %6776 = vpow2.f32 %v4642_v42  ;;  %v4644_v57 = vmul.f32 1.442695, %v4641_v45 }
0x2c27   :  { %v4707_v8 = vpop.permute.xlu1 %4706 }
0x2c28   :  { %6778 = vpow2.f32 %v4644_v57  ;;  %v4712_v59 = vsel %vm1164_vm2, %v4707_v8, 0 }
0x2c29   :  { %6342 = vmatpush3.bf16.msra.mxu1 %v4712_v59 }
0x2c2a   :  { %6359 = vmatprep.subr.bf16.mxu1 %v7881_v0 }
0x2c2b   :  { %v6571_v4 = vpop.permute.xlu1 %6570 }
0x2c2c   :  { %v6573_v38 = vunpack.i.h.bf16 %v6571_v4  ;;  %v6572_v6 = vunpack.i.l.bf16 %v6571_v4 }
0x2c2e   :  { %v4780_v19 = vsel %vm4778_vm6, %v8914_v22, %v6573_v38  ;;  %v4779_v13 = vsel %vm4778_vm6, %v8912_v48, %v6572_v6  ;;  %v5756_v6 = vld [vmem:[#allocation61] ss:$0 sm:$0xff] }
0x2c2f   :  { %v6576_v5 = vpop.permute.xlu1 %6575 }
0x2c30   :  { %v6777_v40 = vpop.eup %6776  ;;  %v6578_v9 = vunpack.i.h.bf16 %v6576_v5  ;;  %v6577_v10 = vunpack.i.l.bf16 %v6576_v5 }
0x2c31   :  { %v4646_v21 = vsel %vm1136_vm3, %v6777_v40, 0.0 }
0x2c32   :  { %v6779_v34 = vpop.eup %6778  ;;  %4647 = vadd.xlane.f32.xlu0 %v4646_v21  ;;  %v4782_v29 = vsel %vm719_vm1, %v4780_v19, %v6578_v9  ;;  %v4781_v30 = vsel %vm719_vm1, %v4779_v13, %v6577_v10  ;;  %v6640_v21 = vld [vmem:[#allocation60 + $0x10] sm:$0xff]  }
0x2c33   :  { %v4649_v41 = vsel %vm1136_vm3, %v6779_v34, 0.0 }
0x2c36   :  { %4650 = vadd.xlane.f32.xlu0 %v4649_v41  ;;  %v695_v41 = vld [vmem:[#allocation12] sm:$0xff] }
0x2c4c   :  { %4658 = vrot.lane.b32.xlu0 %v8862_v14, %s7887_s14 }
0x2cbf   :  { %v4648_v60 = vpop.xlane.xlu0 %4647 }
0x2cc0   :  { %6780 = vrcp.f32 %v4648_v60  ;;  %v696_v60 = vld [vmem:[#allocation12 + $0x8] sm:$0xff] }
0x2cc3   :  { %v4651_v61 = vpop.xlane.xlu0 %4650 }
0x2cc4   :  { %6782 = vrcp.f32 %v4651_v61  ;;  %v4927_v61 = vpack.c.bf16 %v696_v60, %v695_v41 }
0x2cc7   :  { %v4659_v51 = vpop.permute.xlu0 %4658 }
0x2cc8   :  { %v4664_v32 = vsel %vm1164_vm2, %v4659_v51, 0  ;;  %v6642_v51 = vld [vmem:[#allocation60] sm:$0xff]  }
0x2cc9   :  { %6336 = vmatpush3.bf16.msra.mxu0 %v4664_v32  ;;  %v6643_v32 = vld [vmem:[#allocation60 + $0x8] sm:$0xff]  }
0x2cca   :  { %v6781_v43 = vpop.eup %6780  ;;  %6347 = vmatprep.subr.bf16.mxu0 %v7881_v0 }
0x2ccb   :  { %v4654_v52 = vmul.f32 %v6781_v43, %v6777_v40 }
0x2ccd   :  { %v4656_v24 = vpack.c.bf16 %v4654_v52, %v4654_v52 }
0x2cce   :  { %v6783_v46 = vpop.eup %6782 }
0x2ccf   :  { %v4655_v58 = vmul.f32 %v6783_v46, %v6779_v34  ;;  %6338 = vmatmul.mubr.msk.bf16.vlgmr.msra.gmra.mrb[108].mxu0 %vm1136_vm3, %v4656_v24  ;;  %v6641_v34 = vld [vmem:[#allocation60 + $0x18] sm:$0xff]  }
0x2cd0   :  { %6355 = vmatprep.mubr.msk.bf16.mxu0 %vm7882_vm0, %v7881_v0  ;;  %6348 = vmatpush3.bf16.msra.mxu0 %v6636_v36 }
0x2cd1   :  { %v4657_v14 = vpack.c.bf16 %v4655_v58, %v4655_v58  ;;  %6349 = vmatprep.subr.bf16.mxu0 %v7881_v0 }
0x2cd3   :  { %6344 = vmatmul.mubr.msk.bf16.vlgmr.msra.gmra.mrb[132].mxu1 %vm1136_vm3, %v4657_v14 }
0x2cd4   :  { %6363 = vmatprep.mubr.msk.bf16.mxu1 %vm7882_vm0, %v7881_v0  ;;  %6350 = vmatpush3.bf16.msra.mxu0 %v6637_v37 }
0x2cd5   :  { %6351 = vmatprep.subr.bf16.mxu0 %v7881_v0  ;;  %6360 = vmatpush3.bf16.msra.mxu1 %v6640_v21 }
0x2cd6   :  { %6361 = vmatprep.subr.bf16.mxu1 %v7881_v0 }
0x2cd8   :  { %6352 = vmatpush3.bf16.msra.mxu0 %v6638_v44  ;;  %v5748_v44 = vld [vmem:[#allocation57] ss:$0 sm:$0xff] }
0x2cd9   :  { %6353 = vmatprep.subr.bf16.mxu0 %v7881_v0  ;;  %6362 = vmatpush3.bf16.msra.mxu1 %v6641_v34 }
0x2cda   :  { %6367 = vmatprep.subr.bf16.mxu1 %v7881_v0 }
0x2cdc   :  { %6354 = vmatpush3.bf16.msra.mxu0 %v6639_v15  ;;  %6364 = vmatmul.mubr.msk.bf16.vlgmr.msra.gmra.mrb[136].mxu1 %vm719_vm1, %v4927_v61 }
0x2cdd   :  { %6371 = vmatprep.mubr.msk.bf16.mxu1 %vm7882_vm0, %v7881_v0  ;;  %6368 = vmatpush3.bf16.msra.mxu1 %v6642_v51 }
0x2cde   :  { %6369 = vmatprep.subr.bf16.mxu1 %v7881_v0 }
0x2ce1   :  { %6370 = vmatpush3.bf16.msra.mxu1 %v6643_v32 }
0x2da2   :  { %v4700_v62 = vpop.f32.mrb[108].mxu0 }
0x2da3   :  { %v6339_v54 = vpop.f32.mrb[109].mxu0 }
0x2da4   :  { %v4703_v17 = vpop.f32.mrb[110].mxu0 }
0x2da5   :  { %v6340_v63 = vpop.f32.mrb[111].mxu0  ;;  %v5749_v17 = vld [vmem:[#allocation58] ss:$0 sm:$0xff] }
0x2da6   :  { %v4748_v1 = vpop.f32.mrb[132].mxu1 }
0x2da7   :  { %v6579_v2 = vpack.i.bf16 %v4748_v1, %v4700_v62  ;;  %v6345_v3 = vpop.f32.mrb[133].mxu1 }
0x2da8   :  { %v4751_v35 = vpop.f32.mrb[134].mxu1 }
0x2da9   :  { %v6346_v55 = vpop.f32.mrb[135].mxu1  ;;  %6580 = vrot.lane.b32.xlu0 %v6579_v2, %s7889_s20 }
0x2daf   :  { %v4977_v35 = vpop.f32.mrb[136].mxu1 }
0x2db0   :  { %v6365_v55 = vpop.f32.mrb[137].mxu1 }
0x2db1   :  { %v4980_v4 = vpop.f32.mrb[138].mxu1 }
0x2db2   :  { %v6366_v5 = vpop.f32.mrb[139].mxu1 }
0x2e1b   :  { %v6581_v11 = vpop.permute.xlu0 %6580 }
0x2e1c   :  { %v6583_v18 = vunpack.i.h.bf16 %v6581_v11  ;;  %v6582_v20 = vunpack.i.l.bf16 %v6581_v11 }
0x2e1e   :  { %v4785_v33 = vsel %vm4783_vm7, %v4782_v29, %v6583_v18  ;;  %v4784_v47 = vsel %vm4783_vm7, %v4781_v30, %v6582_v20 }
0x2e1f   :  { %v4786_v25 = vpack.c.bf16 %v4785_v33, %v4784_v47 }
0x2e21   :  { %6356 = vmatmul.mubr.msk.bf16.vlgmr.msra.gmra.mrb[112].mxu0 %vm1952_vm4, %v4786_v25 }
0x2ef4   :  { %v4856_v49 = vpop.f32.mrb[112].mxu0 }
0x2ef5   :  { %v4863_v53 = vadd.f32 %v4856_v49, %v8835_v23  ;;  %v6357_v39 = vpop.f32.mrb[113].mxu0 }
0x2ef6   :  { %v4859_v26 = vpop.f32.mrb[114].mxu0 }
0x2ef7   :  { %v4872_v22 = vadd.f32 %v5747_v50, %v4863_v53  ;;  %v4864_v48 = vadd.f32 %v4859_v26, %v8837_v27  ;;  %v6358_v56 = vpop.f32.mrb[115].mxu0 }
0x2ef9   :  { %v4873_v12 = vadd.f32 %v5747_v50, %v4864_v48  ;;  %v4876_v28 = vsel %vm719_vm1, %v4872_v22, 0.0 }
0x2efa   :  { %4877 = vadd.xlane.f32.xlu1 %v4876_v28 }
0x2efb   :  { %v4879_v31 = vsel %vm719_vm1, %v4873_v12, 0.0 }
0x2efc   :  { %4880 = vadd.xlane.f32.xlu0 %v4879_v31 }
0x2f87   :  { %v4878_v16 = vpop.xlane.xlu1 %4877 }
0x2f88   :  { %v4882_v7 = vmul.f32 0.03125, %v4878_v16 }
0x2f89   :  { %v4881_v42 = vpop.xlane.xlu0 %4880 }
0x2f8a   :  { %v4884_v45 = vsub.f32 %v4872_v22, %v4882_v7  ;;  %v4883_v57 = vmul.f32 0.03125, %v4881_v42 }
0x2f8c   :  { %v4885_v8 = vsub.f32 %v4873_v12, %v4883_v57  ;;  %v4886_v23 = vmul.f32 %v4884_v45, %v4884_v45 }
0x2f8e   :  { %v4888_v59 = vsel %vm719_vm1, %v4886_v23, 0.0  ;;  %v4887_v40 = vmul.f32 %v4885_v8, %v4885_v8 }
0x2f8f   :  { %4889 = vadd.xlane.f32.xlu0 %v4888_v59 }
0x2f90   :  { %v4891_v27 = vsel %vm719_vm1, %v4887_v40, 0.0 }
0x2f93   :  { %4892 = vadd.xlane.f32.xlu0 %v4891_v27 }
0x301c   :  { %v4890_v43 = vpop.xlane.xlu0 %4889 }
0x301d   :  { %v4894_v52 = vmul.f32 0.03125, %v4890_v43 }
0x301f   :  { %v4896_v24 = vadd.f32 1e-05, %v4894_v52 }
0x3020   :  { %v4893_v46 = vpop.xlane.xlu0 %4892 }
0x3021   :  { %6784 = vrsqrt.f32 %v4896_v24  ;;  %v4895_v58 = vmul.f32 0.03125, %v4893_v46 }
0x3023   :  { %v4897_v14 = vadd.f32 1e-05, %v4895_v58 }
0x3025   :  { %6786 = vrsqrt.f32 %v4897_v14 }
0x302b   :  { %v6785_v36 = vpop.eup %6784 }
0x302c   :  { %v4900_v37 = vmul.f32 %v6785_v36, %v4884_v45 }
0x302e   :  { %v4908_v62 = vmul.f32 %v5748_v44, %v4900_v37 }
0x302f   :  { %v6787_v15 = vpop.eup %6786 }
0x3030   :  { %v4901_v54 = vmul.f32 %v6787_v15, %v4885_v8  ;;  %v4916_v1 = vadd.f32 %v5749_v17, %v4908_v62 }
0x3032   :  { %v4909_v63 = vmul.f32 %v5748_v44, %v4901_v54 }
0x3034   :  { %v4917_v2 = vadd.f32 %v5749_v17, %v4909_v63 }
0x3036   :  { %v4926_v3 = vpack.c.bf16 %v4917_v2, %v4916_v1 }
0x3038   :  { %6372 = vmatmul.mubr.msk.bf16.vlgmr.msra.gmra.mrb[140].mxu1 %vm719_vm1, %v4926_v3 }
0x310b   :  { %v5033_v38 = vpop.f32.mrb[140].mxu1 }
0x310c   :  { %v5034_v9 = vadd.f32 %v5033_v38, %v4977_v35  ;;  %v6373_v10 = vpop.f32.mrb[141].mxu1 }
0x310d   :  { %v5036_v11 = vpop.f32.mrb[142].mxu1 }
0x310e   :  { %v5047_v19 = vadd.f32 %v5756_v6, %v5034_v9  ;;  %v5037_v13 = vadd.f32 %v5036_v11, %v4980_v4  ;;  %v6374_v18 = vpop.f32.mrb[143].mxu1 }
0x3110   :  { %v5048_v20 = vadd.f32 %v5756_v6, %v5037_v13  ;;  %v5051_v29 = vsel %vm719_vm1, %v5047_v19, 0.0 }
0x3111   :  { %5052 = vadd.xlane.f32.xlu1 %v5051_v29 }
0x3112   :  { %v5054_v30 = vsel %vm719_vm1, %v5048_v20, 0.0 }
0x3113   :  { %5055 = vadd.xlane.f32.xlu0 %v5054_v30 }
0x319e   :  { %v5053_v33 = vpop.xlane.xlu1 %5052 }
0x319f   :  { %v5057_v47 = vmul.f32 0.03125, %v5053_v33 }
0x31a0   :  { %v5056_v25 = vpop.xlane.xlu0 %5055 }
0x31a1   :  { %v5059_v49 = vsub.f32 %v5047_v19, %v5057_v47  ;;  %v5058_v50 = vmul.f32 0.03125, %v5056_v25 }
0x31a3   :  { %v5060_v53 = vsub.f32 %v5048_v20, %v5058_v50  ;;  %v5061_v39 = vmul.f32 %v5059_v49, %v5059_v49 }
0x31a5   :  { %v5063_v26 = vsel %vm719_vm1, %v5061_v39, 0.0  ;;  %v5062_v22 = vmul.f32 %v5060_v53, %v5060_v53 }
0x31a6   :  { %5064 = vadd.xlane.f32.xlu1 %v5063_v26 }
0x31a7   :  { %v5066_v48 = vsel %vm719_vm1, %v5062_v22, 0.0 }
0x31a8   :  { %5067 = vadd.xlane.f32.xlu0 %v5066_v48 }
0x31a9   :  { %7711 = shalt.err (!%p7708_p8)  }
0x31aa   :  { %s7712_s23 = scalar_lea.vmem %s684_s29, 2048  ;;  %p7717_p10 = scmp.lt.s32.totalorder %s684_s29, %s684_s29 }
0x31ab   :  { %p7713_p9 = scmp.ne.s32.totalorder %s684_s29, %s7712_s23  ;;  %p7718_p11 = scmp.lt.s32.totalorder %s7712_s23, %s7712_s23 }
0x31ad   :  { %p7719_p12 = por %p7718_p11, %p7717_p10 }
0x31af   :  { %p7720_p13 = pnand %p7719_p12, %p7713_p9 }
0x31b1   :  { %7723 = shalt.err (!%p7720_p13)  }
0x31b2   :  { %686 = dma.hbm_to_vmem [thread:$0]  %s8100_s27, 2048, %s684_s29, [#allocation3]  ;;  %v5757_v45 = vld [vmem:[#allocation63] ss:$0 sm:$0xff]  ;;  %v5758_v23 = vld [vmem:[#allocation64] ss:$0 sm:$0xff] }
0x3233   :  { %v5065_v56 = vpop.xlane.xlu1 %5064 }
0x3234   :  { %v5069_v12 = vmul.f32 0.03125, %v5065_v56 }
0x3235   :  { %v5068_v28 = vpop.xlane.xlu0 %5067 }
0x3236   :  { %v5071_v31 = vadd.f32 1e-05, %v5069_v12  ;;  %v5070_v16 = vmul.f32 0.03125, %v5068_v28 }
0x3238   :  { %6788 = vrsqrt.f32 %v5071_v31  ;;  %v5072_v7 = vadd.f32 1e-05, %v5070_v16 }
0x323a   :  { %6790 = vrsqrt.f32 %v5072_v7 }
0x3242   :  { %v6789_v42 = vpop.eup %6788 }
0x3243   :  { %v5075_v57 = vmul.f32 %v6789_v42, %v5059_v49 }
0x3244   :  { %v6791_v8 = vpop.eup %6790 }
0x3245   :  { %v5083_v59 = vmul.f32 %v5757_v45, %v5075_v57  ;;  %v5076_v40 = vmul.f32 %v6791_v8, %v5060_v53 }
0x3247   :  { %v5091_v27 = vadd.f32 %v5758_v23, %v5083_v59  ;;  %v5084_v21 = vmul.f32 %v5757_v45, %v5076_v40 }
0x3249   :  { %v5759_v34 = vmul.f32 -1.442695, %v5091_v27  ;;  %v5092_v41 = vadd.f32 %v5758_v23, %v5084_v21 }
0x324b   :  { %6792 = vpow2.f32 %v5759_v34  ;;  %v5760_v60 = vmul.f32 -1.442695, %v5092_v41 }
0x324d   :  { %6794 = vpow2.f32 %v5760_v60 }
0x3255   :  { %v6793_v61 = vpop.eup %6792 }
0x3256   :  { %v5099_v51 = vadd.f32 1.0, %v6793_v61 }
0x3257   :  { %v6795_v32 = vpop.eup %6794 }
0x3258   :  { %6796 = vrcp.f32 %v5099_v51  ;;  %v5100_v43 = vadd.f32 1.0, %v6795_v32 }
0x325a   :  { %6798 = vrcp.f32 %v5100_v43 }
0x3262   :  { %v6797_v52 = vpop.eup %6796 }
0x3263   :  { %v5105_v24 = vmul.f32 %v6797_v52, %v5091_v27 }
0x3264   :  { %v6799_v46 = vpop.eup %6798 }
0x3265   :  { %v5106_v58 = vmul.f32 %v6799_v46, %v5092_v41 }
0x3266   :  { %7788 = dma.done.wait [#allocation3], 2048 }
0x3267   :  { %7789 = vsyncadd [#allocation3], 4294965248  ;;  %6375 = vmatprep.subr.bf16.mxu0 %v7881_v0  ;;  %6383 = vmatprep.subr.bf16.mxu1 %v7881_v0  ;;  %v5112_v14 = vpack.c.bf16 %v5105_v24, %v5105_v24  ;;  %v5113_v36 = vpack.c.bf16 %v5106_v58, %v5106_v58  ;;  %vm5124_vm8 = vcmask 1041409   ;;  %v5117_v54 = vld [vmem:[#allocation2 + $0x10] sm:$0xff]  ;;  %v5114_v17 = vld [vmem:[#allocation2] sm:$0xff]  ;;  %s7891_s27 = smov [#allocation67]  }
0x3268   :  { %6379 = vmatprep.mubr.msk.bf16.mxu0 %vm7882_vm0, %v7881_v0  ;;  %6387 = vmatprep.mubr.msk.bf16.mxu1 %vm7882_vm0, %v7881_v0  ;;  %v5118_v2 = vld [vmem:[#allocation2 + $0x18] sm:$0xff]  ;;  %v5115_v3 = vld [vmem:[#allocation2 + $0x8] sm:$0xff]  ;;  %v5217_v9 = vld [vmem:[#allocation2 + $0x20] sm:$0xff]  ;;  %s5538_s5 = sshll.u32 %s7891_s27, 4  ;;  %vm5530_vm9 = vcmask 123904   ;;  %s5539_s5 = int_to_ptr.vmem [resolvable:$true] %s5538_s5 }
0x3269   :  { %v9047_v37 = vunpack.c.l.b16 %v5112_v14  ;;  %v9049_v44 = vunpack.c.l.b16 %v5113_v36  ;;  %6376 = vmatpush3.bf16.msra.mxu0 %v5117_v54  ;;  %6384 = vmatpush3.bf16.msra.mxu1 %v5114_v17  ;;  %v5268_v10 = vld [vmem:[#allocation2 + $0x30] sm:$0xff]  ;;  %v5218_v13 = vld [vmem:[#allocation2 + $0x28] sm:$0xff]  ;;  %v5269_v18 = vld [vmem:[#allocation2 + $0x38] sm:$0xff]  ;;  %s7724_s26 = scalar_lea.vmem %s5539_s5, 32  ;;  %p7729_p1 = scmp.lt.s32.totalorder %s5539_s5, %s5539_s5 }
0x326a   :  { %6377 = vmatprep.subr.bf16.mxu0 %v7881_v0  ;;  %6385 = vmatprep.subr.bf16.mxu1 %v7881_v0  ;;  %v5319_v49 = vld [vmem:[#allocation2 + $0x40] sm:$0xff]  ;;  %v5370_v50 = vld [vmem:[#allocation2 + $0x50] sm:$0xff]  ;;  %v5320_v26 = vld [vmem:[#allocation2 + $0x48] sm:$0xff]  ;;  %p7725_p0 = scmp.ne.s32.totalorder %s5539_s5, %s7724_s26  ;;  %p7730_p2 = scmp.lt.s32.totalorder %s7724_s26, %s7724_s26 }
0x326b   :  { %v5123_v15 = vrot.slane %v9047_v37, 1  ;;  %v5170_v62 = vrot.slane %v9049_v44, 7  ;;  %v5219_v4 = vrot.slane %v9047_v37, 2  ;;  %v5220_v5 = vrot.slane %v9049_v44, 1  ;;  %v5371_v22 = vld [vmem:[#allocation2 + $0x58] sm:$0xff]  ;;  %v5421_v7 = vld [vmem:[#allocation2 + $0x60] sm:$0xff] }
0x326c   :  { %v5270_v38 = vrot.slane %v9047_v37, 3  ;;  %v5271_v6 = vrot.slane %v9049_v44, 2  ;;  %v5321_v30 = vrot.slane %v9047_v37, 4  ;;  %v5322_v33 = vrot.slane %v9049_v44, 3  ;;  %v5472_v42 = vld [vmem:[#allocation2 + $0x70] sm:$0xff]  ;;  %v5422_v8 = vld [vmem:[#allocation2 + $0x68] sm:$0xff]  ;;  %p7731_p3 = por %p7730_p2, %p7729_p1 }
0x326d   :  { %v5125_v63 = vsel %vm5124_vm8, %v9049_v44, %v5123_v15  ;;  %v5171_v1 = vsel %vm5124_vm8, %v5170_v62, %v9047_v37  ;;  %6378 = vmatpush3.bf16.msra.mxu0 %v5118_v2  ;;  %6386 = vmatpush3.bf16.msra.mxu1 %v5115_v3  ;;  %v5221_v11 = vsel %vm5124_vm8, %v5220_v5, %v5219_v4  ;;  %v5372_v47 = vrot.slane %v9047_v37, 5  ;;  %v5473_v23 = vld [vmem:[#allocation2 + $0x78] sm:$0xff] }
0x326e   :  { %v5126_v35 = vpack.c.b16 %v5125_v63, %v5125_v63  ;;  %v5172_v55 = vpack.c.b16 %v5171_v1, %v5171_v1  ;;  %6391 = vmatprep.subr.bf16.mxu0 %v7881_v0  ;;  %6399 = vmatprep.subr.bf16.mxu1 %v7881_v0  ;;  %v5272_v19 = vsel %vm5124_vm8, %v5271_v6, %v5270_v38  ;;  %v5373_v25 = vrot.slane %v9049_v44, 4  ;;  %p7732_p4 = pnand %p7731_p3, %p7725_p0 }
0x326f   :  { %v5222_v20 = vpack.c.b16 %v5221_v11, %v5221_v11  ;;  %v5273_v29 = vpack.c.b16 %v5272_v19, %v5272_v19  ;;  %v5323_v53 = vsel %vm5124_vm8, %v5322_v33, %v5321_v30  ;;  %v5423_v12 = vrot.slane %v9047_v37, 6  ;;  %v5769_v11 = vld [vmem:[#allocation66] ss:$0 sm:$0xff] }
0x3270   :  { %6380 = vmatmul.mubr.msk.bf16.vlgmr.msra.gmra.mrb[116].mxu0 %vm719_vm1, %v5126_v35  ;;  %6388 = vmatmul.mubr.msk.bf16.vlgmr.msra.gmra.mrb[144].mxu1 %vm719_vm1, %v5172_v55  ;;  %v5374_v39 = vsel %vm5124_vm8, %v5373_v25, %v5372_v47  ;;  %v5324_v48 = vpack.c.b16 %v5323_v53, %v5323_v53  ;;  %v5424_v28 = vrot.slane %v9049_v44, 5  ;;  %v5474_v31 = vrot.slane %v9047_v37, 7 }
0x3271   :  { %6392 = vmatpush3.bf16.msra.mxu0 %v5217_v9  ;;  %6400 = vmatpush3.bf16.msra.mxu1 %v5268_v10  ;;  %v5375_v56 = vpack.c.b16 %v5374_v39, %v5374_v39  ;;  %v5475_v16 = vrot.slane %v9049_v44, 6 }
0x3272   :  { %6393 = vmatprep.subr.bf16.mxu0 %v7881_v0  ;;  %6401 = vmatprep.subr.bf16.mxu1 %v7881_v0  ;;  %v5425_v45 = vsel %vm5124_vm8, %v5424_v28, %v5423_v12 }
0x3273   :  { %6395 = vmatprep.mubr.msk.bf16.mxu0 %vm7882_vm0, %v7881_v0  ;;  %6403 = vmatprep.mubr.msk.bf16.mxu1 %vm7882_vm0, %v7881_v0  ;;  %v5476_v57 = vsel %vm5124_vm8, %v5475_v16, %v5474_v31  ;;  %v5426_v59 = vpack.c.b16 %v5425_v45, %v5425_v45 }
0x3274   :  { %v5477_v40 = vpack.c.b16 %v5476_v57, %v5476_v57 }
0x3275   :  { %6394 = vmatpush3.bf16.msra.mxu0 %v5218_v13  ;;  %6402 = vmatpush3.bf16.msra.mxu1 %v5269_v18 }
0x3276   :  { %6407 = vmatprep.subr.bf16.mxu0 %v7881_v0  ;;  %6415 = vmatprep.subr.bf16.mxu1 %v7881_v0 }
0x3278   :  { %6396 = vmatmul.mubr.msk.bf16.vlgmr.msra.gmra.mrb[120].mxu0 %vm719_vm1, %v5222_v20  ;;  %6404 = vmatmul.mubr.msk.bf16.vlgmr.msra.gmra.mrb[148].mxu1 %vm719_vm1, %v5273_v29 }
0x3279   :  { %6408 = vmatpush3.bf16.msra.mxu0 %v5319_v49  ;;  %6416 = vmatpush3.bf16.msra.mxu1 %v5370_v50 }
0x327a   :  { %6409 = vmatprep.subr.bf16.mxu0 %v7881_v0  ;;  %6417 = vmatprep.subr.bf16.mxu1 %v7881_v0 }
0x327b   :  { %6411 = vmatprep.mubr.msk.bf16.mxu0 %vm7882_vm0, %v7881_v0  ;;  %6419 = vmatprep.mubr.msk.bf16.mxu1 %vm7882_vm0, %v7881_v0 }
0x327d   :  { %6410 = vmatpush3.bf16.msra.mxu0 %v5320_v26  ;;  %6418 = vmatpush3.bf16.msra.mxu1 %v5371_v22 }
0x327e   :  { %6423 = vmatprep.subr.bf16.mxu0 %v7881_v0  ;;  %6431 = vmatprep.subr.bf16.mxu1 %v7881_v0 }
0x3280   :  { %6412 = vmatmul.mubr.msk.bf16.vlgmr.msra.gmra.mrb[124].mxu0 %vm719_vm1, %v5324_v48  ;;  %6420 = vmatmul.mubr.msk.bf16.vlgmr.msra.gmra.mrb[152].mxu1 %vm719_vm1, %v5375_v56 }
0x3281   :  { %6424 = vmatpush3.bf16.msra.mxu0 %v5421_v7  ;;  %6432 = vmatpush3.bf16.msra.mxu1 %v5472_v42 }
0x3282   :  { %6425 = vmatprep.subr.bf16.mxu0 %v7881_v0  ;;  %6433 = vmatprep.subr.bf16.mxu1 %v7881_v0 }
0x3283   :  { %6427 = vmatprep.mubr.msk.bf16.mxu0 %vm7882_vm0, %v7881_v0  ;;  %6435 = vmatprep.mubr.msk.bf16.mxu1 %vm7882_vm0, %v7881_v0 }
0x3285   :  { %6426 = vmatpush3.bf16.msra.mxu0 %v5422_v8  ;;  %6434 = vmatpush3.bf16.msra.mxu1 %v5473_v23 }
0x3288   :  { %6428 = vmatmul.mubr.msk.bf16.vlgmr.msra.gmra.mrb[128].mxu0 %vm719_vm1, %v5426_v59  ;;  %6436 = vmatmul.mubr.msk.bf16.vlgmr.msra.gmra.mrb[156].mxu1 %vm719_vm1, %v5477_v40 }
0x3343   :  { %v5164_v27 = vpop.f32.mrb[116].mxu0  ;;  %v5210_v21 = vpop.f32.mrb[144].mxu1 }
0x3344   :  { %v5211_v34 = vadd.f32 %v5210_v21, %v5164_v27  ;;  %v6381_v41 = vpop.f32.mrb[117].mxu0  ;;  %v6389_v60 = vpop.f32.mrb[145].mxu1 }
0x3345   :  { %v5167_v61 = vpop.f32.mrb[118].mxu0  ;;  %v5213_v51 = vpop.f32.mrb[146].mxu1 }
0x3346   :  { %v6382_v32 = vpop.f32.mrb[119].mxu0  ;;  %v6390_v43 = vpop.f32.mrb[147].mxu1 }
0x334b   :  { %v5260_v52 = vpop.f32.mrb[120].mxu0  ;;  %v5311_v24 = vpop.f32.mrb[148].mxu1 }
0x334c   :  { %v5266_v0 = vadd.f32 %v5260_v52, %v5211_v34  ;;  %v6397_v46 = vpop.f32.mrb[121].mxu0  ;;  %v6405_v58 = vpop.f32.mrb[149].mxu1 }
0x334d   :  { %v5263_v14 = vpop.f32.mrb[122].mxu0  ;;  %v5314_v36 = vpop.f32.mrb[150].mxu1 }
0x334e   :  { %v5317_v37 = vadd.f32 %v5311_v24, %v5266_v0  ;;  %v6398_v44 = vpop.f32.mrb[123].mxu0  ;;  %v6406_v15 = vpop.f32.mrb[151].mxu1 }
0x3353   :  { %v5362_v62 = vpop.f32.mrb[124].mxu0  ;;  %v5413_v54 = vpop.f32.mrb[152].mxu1 }
0x3354   :  { %v5368_v17 = vadd.f32 %v5362_v62, %v5317_v37  ;;  %v6413_v63 = vpop.f32.mrb[125].mxu0  ;;  %v6421_v1 = vpop.f32.mrb[153].mxu1 }
0x3355   :  { %v5365_v2 = vpop.f32.mrb[126].mxu0  ;;  %v5416_v3 = vpop.f32.mrb[154].mxu1 }
0x3356   :  { %v5419_v35 = vadd.f32 %v5413_v54, %v5368_v17  ;;  %v6414_v55 = vpop.f32.mrb[127].mxu0  ;;  %v6422_v4 = vpop.f32.mrb[155].mxu1 }
0x335b   :  { %v5464_v5 = vpop.f32.mrb[128].mxu0  ;;  %v5515_v38 = vpop.f32.mrb[156].mxu1 }
0x335c   :  { %v5470_v6 = vadd.f32 %v5464_v5, %v5419_v35  ;;  %v6429_v9 = vpop.f32.mrb[129].mxu0  ;;  %v6437_v10 = vpop.f32.mrb[157].mxu1 }
0x335d   :  { %v5467_v19 = vpop.f32.mrb[130].mxu0  ;;  %v5518_v13 = vpop.f32.mrb[158].mxu1 }
0x335e   :  { %v5521_v18 = vadd.f32 %v5515_v38, %v5470_v6  ;;  %v6430_v20 = vpop.f32.mrb[131].mxu0  ;;  %v6438_v29 = vpop.f32.mrb[159].mxu1 }
0x3360   :  { %v5529_v30 = vadd.f32 %v5769_v11, %v5521_v18 }
0x3362   :  { %5531 = vst.msk [vmem:[#allocation67] sm:$0x3] %vm5530_vm9, %v5529_v30 }
0x3363   :  { %7735 = shalt.err (!%p7732_p4)
}
0x3364   :  { %s7736_s4 = scalar_lea.hbm %s8110_s12, 32 }
0x3365   :  { %p7737_p5 = scmp.ne.s32.totalorder %s8110_s12, %s7736_s4  ;;  %p7740_p6 = scmp.lt.u32.totalorder %s7736_s4, %s8110_s12 }
0x3367   :  { %p7742_p7 = pnand %p7740_p6, %p7737_p5 }
0x3369   :  { %7745 = shalt.err (!%p7742_p7)
}
0x336a   :  { %5541 = dma.vmem_to_hbm [thread:$0]  %s5539_s5, 32, %s8110_s12, [#allocation6]  }
0x336b   :  { %7790 = dma.done.wait [#allocation6], 32  }
0x336c   :  { %7791 = vsyncadd [#allocation6], 4294967264 }
0x336d   :  { %5545 = vsyncpa [#allocation5], 1 }
0x336e   :  { %5546 = vsyncpa [#allocation8], 1 }
0x336f   :  { %5547 = vsyncpa [#allocation11], 1 }
0x3370   :  { %5548 = vsyncpa [#allocation14], 1 }
0x3371   :  { %5549 = vsyncpa [#allocation17], 1 }
0x3372   :  { %5550 = vsyncpa [#allocation20], 1 }
0x3373   :  { %5551 = vsyncpa [#allocation23], 1 }
0x3374   :  { %5552 = vsyncpa [#allocation26], 1 }
0x3375   :  { %5553 = vsyncpa [#allocation29], 1 }
0x3376   :  { %5554 = vsyncpa [#allocation32], 1 }
0x3377   :  { %5555 = vsyncpa [#allocation35], 1 }
0x3378   :  { %5556 = vsyncpa [#allocation38], 1 }
0x3379   :  { %5557 = vsyncpa [#allocation41], 1 }
0x337a   :  { %5558 = vsyncpa [#allocation44], 1 }
0x337b   :  { %5559 = vsyncpa [#allocation47], 1 }
0x337c   :  { %5560 = vsyncpa [#allocation50], 1 }
0x337d   :  { %5561 = vsyncpa [#allocation53], 1 }
0x337e   :  { %5562 = vsyncpa [#allocation56], 1 }
0x337f   :  { %5563 = vsyncpa [#allocation59], 1 }
0x3380   :  { %5564 = vsyncpa [#allocation62], 1 }
0x3381   :  { %5565 = vsyncpa [#allocation65], 1 }
0x3382   :  { %5566 = vsyncpa [#allocation6], 1 }
0x3383   :  { %5567 = vsyncmov [#allocation3] }
0x3386   :  { %s5568_s12 = vpop.sfrf %5567 }
0x3387   :  { %p5770_p8 = scmp.ne.s32.totalorder %s5568_s12, 0 }
0x3389   :  { %5572 = shalt.err (%p5770_p8)  }

</bundles_post_ra>
